<compile_context>
chip_gen: v6e
topology: v6e:2x2x1
jax: 0.10.0
libtpu: 0.0.40
codegen_flags: <defaults>
</compile_context>

<pallas_src>
import functools

import jax
import jax.numpy as jnp
from jax import lax
from jax.experimental import pallas as pl
from jax.experimental.pallas import tpu as pltpu


def _egcn_kernel(x_ref, adj_ref, w0_ref, glhs_ref, gbias_ref, uh_ref,
                 gamma_ref, beta_ref, wout_ref, bout_ref, out_ref,
                 *, n_layers, n_steps, hidden, out_dim, norm, eps):
    """Whole forward pass in one kernel invocation.

    x_ref:     (N, H)        node features at the FINAL timestep
    adj_ref:   (N, N)        mean-normalized dense adjacency (self loops)
    w0_ref:    (L, H, H)     initial GCN weights per layer
    glhs_ref:  (L, 3H, H)    per layer stacked [Wz+Uz; Wr+Ur; Wh]
    gbias_ref: (L, 3H, H)    per layer stacked [Bz; Br; Bh]
    uh_ref:    (L, H, H)     per layer Uh
    gamma_ref: (1, H)        LayerNorm scale
    beta_ref:  (1, H)        LayerNorm shift
    wout_ref:  (1, H) if O==1 else (H, O)   output linear weight
    bout_ref:  (1, O)        output linear bias
    out_ref:   (N, O)        predictions
    """
    H = hidden

    def mm(a, b):
        return jnp.dot(a, b, preferred_element_type=jnp.float32)

    # ---- weight evolution (matrix GRU, EvolveGCN-O style) -------------------
    # Each layer's recurrence depends only on its own previous weight, so all
    # layers advance inside one loop (independent matmul chains interleave and
    # hide MXU latency).  Per layer per step: one (3H,H)@(H,H) + one
    # (H,H)@(H,H) matmul (gate LHS folded + stacked host-side).
    glhs = [glhs_ref[l] for l in range(n_layers)]
    gbias = [gbias_ref[l] for l in range(n_layers)]
    uh = [uh_ref[l] for l in range(n_layers)]

    def step(_, ws):
        new_ws = []
        for l in range(n_layers):
            w_prev = ws[l]
            pre = mm(glhs[l], w_prev) + gbias[l]             # (3H, H)
            z = jax.nn.sigmoid(pre[0:H])
            r = jax.nn.sigmoid(pre[H:2 * H])
            w_tilde = jnp.tanh(pre[2 * H:3 * H] + mm(uh[l], r * w_prev))
            new_ws.append((1.0 - z) * w_prev + z * w_tilde)
        return tuple(new_ws)

    ws0 = tuple(w0_ref[l] for l in range(n_layers))
    ws = lax.fori_loop(0, n_steps, step, ws0, unroll=True)

    # ---- GCN propagation, final timestep only --------------------------------
    adj = adj_ref[...]
    h = x_ref[...].astype(jnp.float32)
    for l in range(n_layers):
        h = jax.nn.relu(mm(adj, mm(h, ws[l])))

    # ---- output normalization + linear head ----------------------------------
    if norm == "LayerNorm":
        mean = jnp.mean(h, axis=-1, keepdims=True)
        var = jnp.mean(jnp.square(h - mean), axis=-1, keepdims=True)
        h = (h - mean) * lax.rsqrt(var + eps)
        h = h * gamma_ref[...] + beta_ref[...]
    # else: 'none' -> Identity

    if out_dim == 1:
        # (N,H)@(H,1) would waste the MXU and push a 1-lane result; a VPU
        # multiply + cross-lane reduction is cheaper here.
        y = jnp.sum(h * wout_ref[...], axis=-1, keepdims=True) + bout_ref[...]
    else:
        y = mm(h, wout_ref[...]) + bout_ref[...]
    out_ref[...] = y.astype(out_ref.dtype)


def _mean_adjacency(edge_index, n_nodes):
    """Dense row-normalized adjacency with self loops (plain-JAX glue)."""
    src, dst = edge_index[0], edge_index[1]
    adj = jnp.zeros((n_nodes, n_nodes), jnp.float32).at[dst, src].set(1.0)
    adj = jnp.maximum(adj, jnp.eye(n_nodes, dtype=jnp.float32))
    return adj / jnp.sum(adj, axis=1, keepdims=True)


def egcn_adapter_forward(x_nth, edge_index, params, ln_gamma, ln_beta,
                         lin_w, lin_b, *, norm="LayerNorm", eps=1e-5):
    """Forward pass matching EGCNAdapter (inference).

    x_nth:      (N, T, H)        node features over time (module-native layout;
                                 the permute/unsqueeze is absorbed because only
                                 the final timestep's features reach the head)
    edge_index: (2, E) int32     static graph, [src; dst]
    params:     (L, 10, H, H)    per layer: [W0, Wz, Uz, Bz, Wr, Ur, Br, Wh, Uh, Bh]
    ln_gamma, ln_beta: (H,)      output LayerNorm affine params
    lin_w:      (O, H)           nn.Linear weight (PyTorch layout)
    lin_b:      (O,)             nn.Linear bias
    returns:    (N,) if O == 1 (mirrors .squeeze(1)), else (N, O)
    """
    N, T, H = x_nth.shape
    L = params.shape[0]
    O = lin_w.shape[0]

    adj = _mean_adjacency(edge_index, N)                              # (N, N)

    # One-time host-side packing: fold Wz@W + Uz@W -> (Wz+Uz)@W and stack the
    # three gate LHS / bias matrices into (3H, H) slabs per layer.
    w0 = params[:, 0].astype(jnp.float32)                             # (L,H,H)
    glhs = jnp.concatenate([params[:, 1] + params[:, 2],              # Wz+Uz
                            params[:, 4] + params[:, 5],              # Wr+Ur
                            params[:, 7]], axis=1).astype(jnp.float32)  # (L,3H,H)
    gbias = jnp.concatenate([params[:, 3], params[:, 6],
                             params[:, 9]], axis=1).astype(jnp.float32)  # (L,3H,H)
    uh = params[:, 8].astype(jnp.float32)                             # (L,H,H)

    gamma2 = ln_gamma.reshape(1, H).astype(jnp.float32)
    beta2 = ln_beta.reshape(1, H).astype(jnp.float32)
    if O == 1:
        wout = lin_w.reshape(1, H).astype(jnp.float32)    # row vector, VPU path
    else:
        wout = jnp.transpose(lin_w).astype(jnp.float32)   # (H, O)
    bout = lin_b.reshape(1, O).astype(jnp.float32)

    # Only x[T-1] feeds the output (weight evolution never reads features).
    x_last = x_nth[:, T - 1, :].astype(jnp.float32)                   # (N, H)

    kern = functools.partial(_egcn_kernel, n_layers=L, n_steps=T, hidden=H,
                             out_dim=O, norm=norm, eps=eps)

    # Single kernel invocation (no grid): every operand fits VMEM at these
    # shapes, so the whole forward (T-step weight evolution, final GCN,
    # LayerNorm, linear head) runs with one launch and one set of DMAs.
    out = pl.pallas_call(
        kern,
        out_shape=jax.ShapeDtypeStruct((N, O), jnp.float32),
    )(x_last, adj, w0, glhs, gbias, uh, gamma2, beta2, wout, bout)

    if O == 1:
        out = out[:, 0]                                    # mirrors .squeeze(1)
    return out


def _reference(x_nth, edge_index, params, ln_gamma, ln_beta, lin_w, lin_b,
               *, norm="LayerNorm", eps=1e-5):
    """Pure-JAX reference with the original (unfused, per-timestep) math."""
    N, T, H = x_nth.shape
    x_tnh = jnp.transpose(x_nth, (1, 0, 2))
    L = params.shape[0]
    adj = _mean_adjacency(edge_index, N)

    def mm(a, b):
        return jnp.dot(a, b, preferred_element_type=jnp.float32)

    weights = [params[l, 0] for l in range(L)]
    h_final = None
    for t in range(T):
        h = x_tnh[t]
        for l in range(L):
            w_prev = weights[l]
            wz, uz, bz = params[l, 1], params[l, 2], params[l, 3]
            wr, ur, br = params[l, 4], params[l, 5], params[l, 6]
            wh, uhm, bh = params[l, 7], params[l, 8], params[l, 9]
            z = jax.nn.sigmoid(mm(wz, w_prev) + mm(uz, w_prev) + bz)
            r = jax.nn.sigmoid(mm(wr, w_prev) + mm(ur, w_prev) + br)
            w_tilde = jnp.tanh(mm(wh, w_prev) + mm(uhm, r * w_prev) + bh)
            w_t = (1.0 - z) * w_prev + z * w_tilde
            weights[l] = w_t
            h = jax.nn.relu(mm(adj, mm(h, w_t)))
        h_final = h

    if norm == "LayerNorm":
        mean = jnp.mean(h_final, axis=-1, keepdims=True)
        var = jnp.mean(jnp.square(h_final - mean), axis=-1, keepdims=True)
        h_final = (h_final - mean) / jnp.sqrt(var + eps)
        h_final = h_final * ln_gamma[None, :] + ln_beta[None, :]

    y = mm(h_final, lin_w.T) + lin_b[None, :]
    if lin_w.shape[0] == 1:
        y = y[:, 0]
    return y


if __name__ == "__main__":
    # Small shapes consistent with the module: hidden_dim=32, output_dim=1,
    # num_spatiotemporal_blocks=2, 8 timesteps, 16 graph nodes, 48 edges.
    T, N, H, O, L, E = 8, 16, 32, 1, 2, 48

    key = jax.random.PRNGKey(0)
    kx, ke1, ke2, kp, kg, kb, kw, kc = jax.random.split(key, 8)

    x = jax.random.normal(kx, (N, T, H), dtype=jnp.float32)   # module-native layout
    src = jax.random.randint(ke1, (E,), 0, N, dtype=jnp.int32)
    dst = jax.random.randint(ke2, (E,), 0, N, dtype=jnp.int32)
    edge_index = jnp.stack([src, dst])

    scale = 1.0 / jnp.sqrt(H)
    params = jax.random.uniform(kp, (L, 10, H, H), jnp.float32, -scale, scale)
    ln_gamma = 1.0 + 0.1 * jax.random.normal(kg, (H,), jnp.float32)
    ln_beta = 0.1 * jax.random.normal(kb, (H,), jnp.float32)
    lin_w = jax.random.uniform(kw, (O, H), jnp.float32, -scale, scale)
    lin_b = jax.random.uniform(kc, (O,), jnp.float32, -scale, scale)

    out = egcn_adapter_forward(x, edge_index, params, ln_gamma, ln_beta,
                               lin_w, lin_b, norm="LayerNorm")
    out = jax.block_until_ready(out)

    ref = _reference(x, edge_index, params, ln_gamma, ln_beta, lin_w, lin_b,
                     norm="LayerNorm")
    assert out.shape == (N,)
    # Loose-ish tolerance: the algebraic gate fold and the 8-step recurrence
    # through matmul chains accumulate small MXU-rounding differences.
    assert jnp.allclose(out, ref, atol=2e-3, rtol=2e-3), "mismatch vs reference"

    print("KERNEL_OK")
</pallas_src>

<mosaic_0001>
module attributes {stable_mosaic.version = 11 : i64} {
  func.func @_egcn_kernel(%arg0: memref<16x32xf32, #tpu.memory_space<vmem>>, %arg1: memref<16x16xf32, #tpu.memory_space<vmem>>, %arg2: memref<2x32x32xf32, #tpu.memory_space<vmem>>, %arg3: memref<2x96x32xf32, #tpu.memory_space<vmem>>, %arg4: memref<2x96x32xf32, #tpu.memory_space<vmem>>, %arg5: memref<2x32x32xf32, #tpu.memory_space<vmem>>, %arg6: memref<1x32xf32, #tpu.memory_space<vmem>>, %arg7: memref<1x32xf32, #tpu.memory_space<vmem>>, %arg8: memref<1x32xf32, #tpu.memory_space<vmem>>, %arg9: memref<1x1xf32, #tpu.memory_space<vmem>>, %arg10: memref<16x1xf32, #tpu.memory_space<vmem>>) attributes {dimension_semantics = [], scalar_prefetch = 0 : i64, scratch_operands = 0 : i64, tpu.core_type = #tpu.core_type<tc>} {
    %c0 = arith.constant 0 : index
    %c0_0 = arith.constant 0 : index
    %c0_1 = arith.constant 0 : index
    %0 = vector.load %arg3[%c0, %c0_0, %c0_1] : memref<2x96x32xf32, #tpu.memory_space<vmem>>, vector<1x96x32xf32>
    %1 = vector.shape_cast %0 : vector<1x96x32xf32> to vector<96x32xf32>
    %c1 = arith.constant 1 : index
    %c0_2 = arith.constant 0 : index
    %c0_3 = arith.constant 0 : index
    %2 = vector.load %arg3[%c1, %c0_2, %c0_3] : memref<2x96x32xf32, #tpu.memory_space<vmem>>, vector<1x96x32xf32>
    %3 = vector.shape_cast %2 : vector<1x96x32xf32> to vector<96x32xf32>
    %c0_4 = arith.constant 0 : index
    %c0_5 = arith.constant 0 : index
    %c0_6 = arith.constant 0 : index
    %4 = vector.load %arg4[%c0_4, %c0_5, %c0_6] : memref<2x96x32xf32, #tpu.memory_space<vmem>>, vector<1x96x32xf32>
    %5 = vector.shape_cast %4 : vector<1x96x32xf32> to vector<96x32xf32>
    %c1_7 = arith.constant 1 : index
    %c0_8 = arith.constant 0 : index
    %c0_9 = arith.constant 0 : index
    %6 = vector.load %arg4[%c1_7, %c0_8, %c0_9] : memref<2x96x32xf32, #tpu.memory_space<vmem>>, vector<1x96x32xf32>
    %7 = vector.shape_cast %6 : vector<1x96x32xf32> to vector<96x32xf32>
    %c0_10 = arith.constant 0 : index
    %c0_11 = arith.constant 0 : index
    %c0_12 = arith.constant 0 : index
    %8 = vector.load %arg5[%c0_10, %c0_11, %c0_12] : memref<2x32x32xf32, #tpu.memory_space<vmem>>, vector<1x32x32xf32>
    %9 = vector.shape_cast %8 : vector<1x32x32xf32> to vector<32x32xf32>
    %c1_13 = arith.constant 1 : index
    %c0_14 = arith.constant 0 : index
    %c0_15 = arith.constant 0 : index
    %10 = vector.load %arg5[%c1_13, %c0_14, %c0_15] : memref<2x32x32xf32, #tpu.memory_space<vmem>>, vector<1x32x32xf32>
    %11 = vector.shape_cast %10 : vector<1x32x32xf32> to vector<32x32xf32>
    %c0_16 = arith.constant 0 : index
    %c0_17 = arith.constant 0 : index
    %c0_18 = arith.constant 0 : index
    %12 = vector.load %arg2[%c0_16, %c0_17, %c0_18] : memref<2x32x32xf32, #tpu.memory_space<vmem>>, vector<1x32x32xf32>
    %13 = vector.shape_cast %12 : vector<1x32x32xf32> to vector<32x32xf32>
    %c1_19 = arith.constant 1 : index
    %c0_20 = arith.constant 0 : index
    %c0_21 = arith.constant 0 : index
    %14 = vector.load %arg2[%c1_19, %c0_20, %c0_21] : memref<2x32x32xf32, #tpu.memory_space<vmem>>, vector<1x32x32xf32>
    %15 = vector.shape_cast %14 : vector<1x32x32xf32> to vector<32x32xf32>
    %c0_i32 = arith.constant 0 : i32
    %cst = arith.constant dense<0.000000e+00> : vector<96x32xf32>
    %16 = tpu.matmul %1, %13, %cst {dimension_numbers = #tpu.dot_dimension_numbers<[1], [0], [0], [1], [0, 0, 1, 1], [], []>} : vector<96x32xf32>, vector<32x32xf32>, vector<96x32xf32> -> vector<96x32xf32>
    %17 = arith.addf %16, %5 : vector<96x32xf32>
    %18 = vector.extract_strided_slice %17 {offsets = [0, 0], sizes = [32, 32], strides = [1, 1]} : vector<96x32xf32> to vector<32x32xf32>
    %19 = arith.negf %18 : vector<32x32xf32>
    %20 = math.exp %19 : vector<32x32xf32>
    %cst_22 = arith.constant 1.000000e+00 : f32
    %21 = vector.broadcast %cst_22 : f32 to vector<32x32xf32>
    %22 = arith.addf %21, %20 : vector<32x32xf32>
    %23 = arith.divf %21, %22 : vector<32x32xf32>
    %24 = vector.extract_strided_slice %17 {offsets = [32, 0], sizes = [32, 32], strides = [1, 1]} : vector<96x32xf32> to vector<32x32xf32>
    %25 = arith.negf %24 : vector<32x32xf32>
    %26 = math.exp %25 : vector<32x32xf32>
    %cst_23 = arith.constant 1.000000e+00 : f32
    %27 = vector.broadcast %cst_23 : f32 to vector<32x32xf32>
    %28 = arith.addf %27, %26 : vector<32x32xf32>
    %29 = arith.divf %27, %28 : vector<32x32xf32>
    %30 = vector.extract_strided_slice %17 {offsets = [64, 0], sizes = [32, 32], strides = [1, 1]} : vector<96x32xf32> to vector<32x32xf32>
    %31 = arith.mulf %29, %13 : vector<32x32xf32>
    %cst_24 = arith.constant dense<0.000000e+00> : vector<32x32xf32>
    %32 = tpu.matmul %9, %31, %cst_24 {dimension_numbers = #tpu.dot_dimension_numbers<[1], [0], [0], [1], [0, 0, 1, 1], [], []>} : vector<32x32xf32>, vector<32x32xf32>, vector<32x32xf32> -> vector<32x32xf32>
    %33 = arith.addf %30, %32 : vector<32x32xf32>
    %34 = math.tanh %33 : vector<32x32xf32>
    %cst_25 = arith.constant 1.000000e+00 : f32
    %35 = vector.broadcast %cst_25 : f32 to vector<32x32xf32>
    %36 = arith.subf %35, %23 : vector<32x32xf32>
    %37 = arith.mulf %36, %13 : vector<32x32xf32>
    %38 = arith.mulf %23, %34 : vector<32x32xf32>
    %39 = arith.addf %37, %38 : vector<32x32xf32>
    %cst_26 = arith.constant dense<0.000000e+00> : vector<96x32xf32>
    %40 = tpu.matmul %3, %15, %cst_26 {dimension_numbers = #tpu.dot_dimension_numbers<[1], [0], [0], [1], [0, 0, 1, 1], [], []>} : vector<96x32xf32>, vector<32x32xf32>, vector<96x32xf32> -> vector<96x32xf32>
    %41 = arith.addf %40, %7 : vector<96x32xf32>
    %42 = vector.extract_strided_slice %41 {offsets = [0, 0], sizes = [32, 32], strides = [1, 1]} : vector<96x32xf32> to vector<32x32xf32>
    %43 = arith.negf %42 : vector<32x32xf32>
    %44 = math.exp %43 : vector<32x32xf32>
    %cst_27 = arith.constant 1.000000e+00 : f32
    %45 = vector.broadcast %cst_27 : f32 to vector<32x32xf32>
    %46 = arith.addf %45, %44 : vector<32x32xf32>
    %47 = arith.divf %45, %46 : vector<32x32xf32>
    %48 = vector.extract_strided_slice %41 {offsets = [32, 0], sizes = [32, 32], strides = [1, 1]} : vector<96x32xf32> to vector<32x32xf32>
    %49 = arith.negf %48 : vector<32x32xf32>
    %50 = math.exp %49 : vector<32x32xf32>
    %cst_28 = arith.constant 1.000000e+00 : f32
    %51 = vector.broadcast %cst_28 : f32 to vector<32x32xf32>
    %52 = arith.addf %51, %50 : vector<32x32xf32>
    %53 = arith.divf %51, %52 : vector<32x32xf32>
    %54 = vector.extract_strided_slice %41 {offsets = [64, 0], sizes = [32, 32], strides = [1, 1]} : vector<96x32xf32> to vector<32x32xf32>
    %55 = arith.mulf %53, %15 : vector<32x32xf32>
    %cst_29 = arith.constant dense<0.000000e+00> : vector<32x32xf32>
    %56 = tpu.matmul %11, %55, %cst_29 {dimension_numbers = #tpu.dot_dimension_numbers<[1], [0], [0], [1], [0, 0, 1, 1], [], []>} : vector<32x32xf32>, vector<32x32xf32>, vector<32x32xf32> -> vector<32x32xf32>
    %57 = arith.addf %54, %56 : vector<32x32xf32>
    %58 = math.tanh %57 : vector<32x32xf32>
    %cst_30 = arith.constant 1.000000e+00 : f32
    %59 = vector.broadcast %cst_30 : f32 to vector<32x32xf32>
    %60 = arith.subf %59, %47 : vector<32x32xf32>
    %61 = arith.mulf %60, %15 : vector<32x32xf32>
    %62 = arith.mulf %47, %58 : vector<32x32xf32>
    %63 = arith.addf %61, %62 : vector<32x32xf32>
    %c1_i32 = arith.constant 1 : i32
    %cst_31 = arith.constant dense<0.000000e+00> : vector<96x32xf32>
    %64 = tpu.matmul %1, %39, %cst_31 {dimension_numbers = #tpu.dot_dimension_numbers<[1], [0], [0], [1], [0, 0, 1, 1], [], []>} : vector<96x32xf32>, vector<32x32xf32>, vector<96x32xf32> -> vector<96x32xf32>
    %65 = arith.addf %64, %5 : vector<96x32xf32>
    %66 = vector.extract_strided_slice %65 {offsets = [0, 0], sizes = [32, 32], strides = [1, 1]} : vector<96x32xf32> to vector<32x32xf32>
    %67 = arith.negf %66 : vector<32x32xf32>
    %68 = math.exp %67 : vector<32x32xf32>
    %cst_32 = arith.constant 1.000000e+00 : f32
    %69 = vector.broadcast %cst_32 : f32 to vector<32x32xf32>
    %70 = arith.addf %69, %68 : vector<32x32xf32>
    %71 = arith.divf %69, %70 : vector<32x32xf32>
    %72 = vector.extract_strided_slice %65 {offsets = [32, 0], sizes = [32, 32], strides = [1, 1]} : vector<96x32xf32> to vector<32x32xf32>
    %73 = arith.negf %72 : vector<32x32xf32>
    %74 = math.exp %73 : vector<32x32xf32>
    %cst_33 = arith.constant 1.000000e+00 : f32
    %75 = vector.broadcast %cst_33 : f32 to vector<32x32xf32>
    %76 = arith.addf %75, %74 : vector<32x32xf32>
    %77 = arith.divf %75, %76 : vector<32x32xf32>
    %78 = vector.extract_strided_slice %65 {offsets = [64, 0], sizes = [32, 32], strides = [1, 1]} : vector<96x32xf32> to vector<32x32xf32>
    %79 = arith.mulf %77, %39 : vector<32x32xf32>
    %cst_34 = arith.constant dense<0.000000e+00> : vector<32x32xf32>
    %80 = tpu.matmul %9, %79, %cst_34 {dimension_numbers = #tpu.dot_dimension_numbers<[1], [0], [0], [1], [0, 0, 1, 1], [], []>} : vector<32x32xf32>, vector<32x32xf32>, vector<32x32xf32> -> vector<32x32xf32>
    %81 = arith.addf %78, %80 : vector<32x32xf32>
    %82 = math.tanh %81 : vector<32x32xf32>
    %cst_35 = arith.constant 1.000000e+00 : f32
    %83 = vector.broadcast %cst_35 : f32 to vector<32x32xf32>
    %84 = arith.subf %83, %71 : vector<32x32xf32>
    %85 = arith.mulf %84, %39 : vector<32x32xf32>
    %86 = arith.mulf %71, %82 : vector<32x32xf32>
    %87 = arith.addf %85, %86 : vector<32x32xf32>
    %cst_36 = arith.constant dense<0.000000e+00> : vector<96x32xf32>
    %88 = tpu.matmul %3, %63, %cst_36 {dimension_numbers = #tpu.dot_dimension_numbers<[1], [0], [0], [1], [0, 0, 1, 1], [], []>} : vector<96x32xf32>, vector<32x32xf32>, vector<96x32xf32> -> vector<96x32xf32>
    %89 = arith.addf %88, %7 : vector<96x32xf32>
    %90 = vector.extract_strided_slice %89 {offsets = [0, 0], sizes = [32, 32], strides = [1, 1]} : vector<96x32xf32> to vector<32x32xf32>
    %91 = arith.negf %90 : vector<32x32xf32>
    %92 = math.exp %91 : vector<32x32xf32>
    %cst_37 = arith.constant 1.000000e+00 : f32
    %93 = vector.broadcast %cst_37 : f32 to vector<32x32xf32>
    %94 = arith.addf %93, %92 : vector<32x32xf32>
    %95 = arith.divf %93, %94 : vector<32x32xf32>
    %96 = vector.extract_strided_slice %89 {offsets = [32, 0], sizes = [32, 32], strides = [1, 1]} : vector<96x32xf32> to vector<32x32xf32>
    %97 = arith.negf %96 : vector<32x32xf32>
    %98 = math.exp %97 : vector<32x32xf32>
    %cst_38 = arith.constant 1.000000e+00 : f32
    %99 = vector.broadcast %cst_38 : f32 to vector<32x32xf32>
    %100 = arith.addf %99, %98 : vector<32x32xf32>
    %101 = arith.divf %99, %100 : vector<32x32xf32>
    %102 = vector.extract_strided_slice %89 {offsets = [64, 0], sizes = [32, 32], strides = [1, 1]} : vector<96x32xf32> to vector<32x32xf32>
    %103 = arith.mulf %101, %63 : vector<32x32xf32>
    %cst_39 = arith.constant dense<0.000000e+00> : vector<32x32xf32>
    %104 = tpu.matmul %11, %103, %cst_39 {dimension_numbers = #tpu.dot_dimension_numbers<[1], [0], [0], [1], [0, 0, 1, 1], [], []>} : vector<32x32xf32>, vector<32x32xf32>, vector<32x32xf32> -> vector<32x32xf32>
    %105 = arith.addf %102, %104 : vector<32x32xf32>
    %106 = math.tanh %105 : vector<32x32xf32>
    %cst_40 = arith.constant 1.000000e+00 : f32
    %107 = vector.broadcast %cst_40 : f32 to vector<32x32xf32>
    %108 = arith.subf %107, %95 : vector<32x32xf32>
    %109 = arith.mulf %108, %63 : vector<32x32xf32>
    %110 = arith.mulf %95, %106 : vector<32x32xf32>
    %111 = arith.addf %109, %110 : vector<32x32xf32>
    %c2_i32 = arith.constant 2 : i32
    %cst_41 = arith.constant dense<0.000000e+00> : vector<96x32xf32>
    %112 = tpu.matmul %1, %87, %cst_41 {dimension_numbers = #tpu.dot_dimension_numbers<[1], [0], [0], [1], [0, 0, 1, 1], [], []>} : vector<96x32xf32>, vector<32x32xf32>, vector<96x32xf32> -> vector<96x32xf32>
    %113 = arith.addf %112, %5 : vector<96x32xf32>
    %114 = vector.extract_strided_slice %113 {offsets = [0, 0], sizes = [32, 32], strides = [1, 1]} : vector<96x32xf32> to vector<32x32xf32>
    %115 = arith.negf %114 : vector<32x32xf32>
    %116 = math.exp %115 : vector<32x32xf32>
    %cst_42 = arith.constant 1.000000e+00 : f32
    %117 = vector.broadcast %cst_42 : f32 to vector<32x32xf32>
    %118 = arith.addf %117, %116 : vector<32x32xf32>
    %119 = arith.divf %117, %118 : vector<32x32xf32>
    %120 = vector.extract_strided_slice %113 {offsets = [32, 0], sizes = [32, 32], strides = [1, 1]} : vector<96x32xf32> to vector<32x32xf32>
    %121 = arith.negf %120 : vector<32x32xf32>
    %122 = math.exp %121 : vector<32x32xf32>
    %cst_43 = arith.constant 1.000000e+00 : f32
    %123 = vector.broadcast %cst_43 : f32 to vector<32x32xf32>
    %124 = arith.addf %123, %122 : vector<32x32xf32>
    %125 = arith.divf %123, %124 : vector<32x32xf32>
    %126 = vector.extract_strided_slice %113 {offsets = [64, 0], sizes = [32, 32], strides = [1, 1]} : vector<96x32xf32> to vector<32x32xf32>
    %127 = arith.mulf %125, %87 : vector<32x32xf32>
    %cst_44 = arith.constant dense<0.000000e+00> : vector<32x32xf32>
    %128 = tpu.matmul %9, %127, %cst_44 {dimension_numbers = #tpu.dot_dimension_numbers<[1], [0], [0], [1], [0, 0, 1, 1], [], []>} : vector<32x32xf32>, vector<32x32xf32>, vector<32x32xf32> -> vector<32x32xf32>
    %129 = arith.addf %126, %128 : vector<32x32xf32>
    %130 = math.tanh %129 : vector<32x32xf32>
    %cst_45 = arith.constant 1.000000e+00 : f32
    %131 = vector.broadcast %cst_45 : f32 to vector<32x32xf32>
    %132 = arith.subf %131, %119 : vector<32x32xf32>
    %133 = arith.mulf %132, %87 : vector<32x32xf32>
    %134 = arith.mulf %119, %130 : vector<32x32xf32>
    %135 = arith.addf %133, %134 : vector<32x32xf32>
    %cst_46 = arith.constant dense<0.000000e+00> : vector<96x32xf32>
    %136 = tpu.matmul %3, %111, %cst_46 {dimension_numbers = #tpu.dot_dimension_numbers<[1], [0], [0], [1], [0, 0, 1, 1], [], []>} : vector<96x32xf32>, vector<32x32xf32>, vector<96x32xf32> -> vector<96x32xf32>
    %137 = arith.addf %136, %7 : vector<96x32xf32>
    %138 = vector.extract_strided_slice %137 {offsets = [0, 0], sizes = [32, 32], strides = [1, 1]} : vector<96x32xf32> to vector<32x32xf32>
    %139 = arith.negf %138 : vector<32x32xf32>
    %140 = math.exp %139 : vector<32x32xf32>
    %cst_47 = arith.constant 1.000000e+00 : f32
    %141 = vector.broadcast %cst_47 : f32 to vector<32x32xf32>
    %142 = arith.addf %141, %140 : vector<32x32xf32>
    %143 = arith.divf %141, %142 : vector<32x32xf32>
    %144 = vector.extract_strided_slice %137 {offsets = [32, 0], sizes = [32, 32], strides = [1, 1]} : vector<96x32xf32> to vector<32x32xf32>
    %145 = arith.negf %144 : vector<32x32xf32>
    %146 = math.exp %145 : vector<32x32xf32>
    %cst_48 = arith.constant 1.000000e+00 : f32
    %147 = vector.broadcast %cst_48 : f32 to vector<32x32xf32>
    %148 = arith.addf %147, %146 : vector<32x32xf32>
    %149 = arith.divf %147, %148 : vector<32x32xf32>
    %150 = vector.extract_strided_slice %137 {offsets = [64, 0], sizes = [32, 32], strides = [1, 1]} : vector<96x32xf32> to vector<32x32xf32>
    %151 = arith.mulf %149, %111 : vector<32x32xf32>
    %cst_49 = arith.constant dense<0.000000e+00> : vector<32x32xf32>
    %152 = tpu.matmul %11, %151, %cst_49 {dimension_numbers = #tpu.dot_dimension_numbers<[1], [0], [0], [1], [0, 0, 1, 1], [], []>} : vector<32x32xf32>, vector<32x32xf32>, vector<32x32xf32> -> vector<32x32xf32>
    %153 = arith.addf %150, %152 : vector<32x32xf32>
    %154 = math.tanh %153 : vector<32x32xf32>
    %cst_50 = arith.constant 1.000000e+00 : f32
    %155 = vector.broadcast %cst_50 : f32 to vector<32x32xf32>
    %156 = arith.subf %155, %143 : vector<32x32xf32>
    %157 = arith.mulf %156, %111 : vector<32x32xf32>
    %158 = arith.mulf %143, %154 : vector<32x32xf32>
    %159 = arith.addf %157, %158 : vector<32x32xf32>
    %c3_i32 = arith.constant 3 : i32
    %cst_51 = arith.constant dense<0.000000e+00> : vector<96x32xf32>
    %160 = tpu.matmul %1, %135, %cst_51 {dimension_numbers = #tpu.dot_dimension_numbers<[1], [0], [0], [1], [0, 0, 1, 1], [], []>} : vector<96x32xf32>, vector<32x32xf32>, vector<96x32xf32> -> vector<96x32xf32>
    %161 = arith.addf %160, %5 : vector<96x32xf32>
    %162 = vector.extract_strided_slice %161 {offsets = [0, 0], sizes = [32, 32], strides = [1, 1]} : vector<96x32xf32> to vector<32x32xf32>
    %163 = arith.negf %162 : vector<32x32xf32>
    %164 = math.exp %163 : vector<32x32xf32>
    %cst_52 = arith.constant 1.000000e+00 : f32
    %165 = vector.broadcast %cst_52 : f32 to vector<32x32xf32>
    %166 = arith.addf %165, %164 : vector<32x32xf32>
    %167 = arith.divf %165, %166 : vector<32x32xf32>
    %168 = vector.extract_strided_slice %161 {offsets = [32, 0], sizes = [32, 32], strides = [1, 1]} : vector<96x32xf32> to vector<32x32xf32>
    %169 = arith.negf %168 : vector<32x32xf32>
    %170 = math.exp %169 : vector<32x32xf32>
    %cst_53 = arith.constant 1.000000e+00 : f32
    %171 = vector.broadcast %cst_53 : f32 to vector<32x32xf32>
    %172 = arith.addf %171, %170 : vector<32x32xf32>
    %173 = arith.divf %171, %172 : vector<32x32xf32>
    %174 = vector.extract_strided_slice %161 {offsets = [64, 0], sizes = [32, 32], strides = [1, 1]} : vector<96x32xf32> to vector<32x32xf32>
    %175 = arith.mulf %173, %135 : vector<32x32xf32>
    %cst_54 = arith.constant dense<0.000000e+00> : vector<32x32xf32>
    %176 = tpu.matmul %9, %175, %cst_54 {dimension_numbers = #tpu.dot_dimension_numbers<[1], [0], [0], [1], [0, 0, 1, 1], [], []>} : vector<32x32xf32>, vector<32x32xf32>, vector<32x32xf32> -> vector<32x32xf32>
    %177 = arith.addf %174, %176 : vector<32x32xf32>
    %178 = math.tanh %177 : vector<32x32xf32>
    %cst_55 = arith.constant 1.000000e+00 : f32
    %179 = vector.broadcast %cst_55 : f32 to vector<32x32xf32>
    %180 = arith.subf %179, %167 : vector<32x32xf32>
    %181 = arith.mulf %180, %135 : vector<32x32xf32>
    %182 = arith.mulf %167, %178 : vector<32x32xf32>
    %183 = arith.addf %181, %182 : vector<32x32xf32>
    %cst_56 = arith.constant dense<0.000000e+00> : vector<96x32xf32>
    %184 = tpu.matmul %3, %159, %cst_56 {dimension_numbers = #tpu.dot_dimension_numbers<[1], [0], [0], [1], [0, 0, 1, 1], [], []>} : vector<96x32xf32>, vector<32x32xf32>, vector<96x32xf32> -> vector<96x32xf32>
    %185 = arith.addf %184, %7 : vector<96x32xf32>
    %186 = vector.extract_strided_slice %185 {offsets = [0, 0], sizes = [32, 32], strides = [1, 1]} : vector<96x32xf32> to vector<32x32xf32>
    %187 = arith.negf %186 : vector<32x32xf32>
    %188 = math.exp %187 : vector<32x32xf32>
    %cst_57 = arith.constant 1.000000e+00 : f32
    %189 = vector.broadcast %cst_57 : f32 to vector<32x32xf32>
    %190 = arith.addf %189, %188 : vector<32x32xf32>
    %191 = arith.divf %189, %190 : vector<32x32xf32>
    %192 = vector.extract_strided_slice %185 {offsets = [32, 0], sizes = [32, 32], strides = [1, 1]} : vector<96x32xf32> to vector<32x32xf32>
    %193 = arith.negf %192 : vector<32x32xf32>
    %194 = math.exp %193 : vector<32x32xf32>
    %cst_58 = arith.constant 1.000000e+00 : f32
    %195 = vector.broadcast %cst_58 : f32 to vector<32x32xf32>
    %196 = arith.addf %195, %194 : vector<32x32xf32>
    %197 = arith.divf %195, %196 : vector<32x32xf32>
    %198 = vector.extract_strided_slice %185 {offsets = [64, 0], sizes = [32, 32], strides = [1, 1]} : vector<96x32xf32> to vector<32x32xf32>
    %199 = arith.mulf %197, %159 : vector<32x32xf32>
    %cst_59 = arith.constant dense<0.000000e+00> : vector<32x32xf32>
    %200 = tpu.matmul %11, %199, %cst_59 {dimension_numbers = #tpu.dot_dimension_numbers<[1], [0], [0], [1], [0, 0, 1, 1], [], []>} : vector<32x32xf32>, vector<32x32xf32>, vector<32x32xf32> -> vector<32x32xf32>
    %201 = arith.addf %198, %200 : vector<32x32xf32>
    %202 = math.tanh %201 : vector<32x32xf32>
    %cst_60 = arith.constant 1.000000e+00 : f32
    %203 = vector.broadcast %cst_60 : f32 to vector<32x32xf32>
    %204 = arith.subf %203, %191 : vector<32x32xf32>
    %205 = arith.mulf %204, %159 : vector<32x32xf32>
    %206 = arith.mulf %191, %202 : vector<32x32xf32>
    %207 = arith.addf %205, %206 : vector<32x32xf32>
    %c4_i32 = arith.constant 4 : i32
    %cst_61 = arith.constant dense<0.000000e+00> : vector<96x32xf32>
    %208 = tpu.matmul %1, %183, %cst_61 {dimension_numbers = #tpu.dot_dimension_numbers<[1], [0], [0], [1], [0, 0, 1, 1], [], []>} : vector<96x32xf32>, vector<32x32xf32>, vector<96x32xf32> -> vector<96x32xf32>
    %209 = arith.addf %208, %5 : vector<96x32xf32>
    %210 = vector.extract_strided_slice %209 {offsets = [0, 0], sizes = [32, 32], strides = [1, 1]} : vector<96x32xf32> to vector<32x32xf32>
    %211 = arith.negf %210 : vector<32x32xf32>
    %212 = math.exp %211 : vector<32x32xf32>
    %cst_62 = arith.constant 1.000000e+00 : f32
    %213 = vector.broadcast %cst_62 : f32 to vector<32x32xf32>
    %214 = arith.addf %213, %212 : vector<32x32xf32>
    %215 = arith.divf %213, %214 : vector<32x32xf32>
    %216 = vector.extract_strided_slice %209 {offsets = [32, 0], sizes = [32, 32], strides = [1, 1]} : vector<96x32xf32> to vector<32x32xf32>
    %217 = arith.negf %216 : vector<32x32xf32>
    %218 = math.exp %217 : vector<32x32xf32>
    %cst_63 = arith.constant 1.000000e+00 : f32
    %219 = vector.broadcast %cst_63 : f32 to vector<32x32xf32>
    %220 = arith.addf %219, %218 : vector<32x32xf32>
    %221 = arith.divf %219, %220 : vector<32x32xf32>
    %222 = vector.extract_strided_slice %209 {offsets = [64, 0], sizes = [32, 32], strides = [1, 1]} : vector<96x32xf32> to vector<32x32xf32>
    %223 = arith.mulf %221, %183 : vector<32x32xf32>
    %cst_64 = arith.constant dense<0.000000e+00> : vector<32x32xf32>
    %224 = tpu.matmul %9, %223, %cst_64 {dimension_numbers = #tpu.dot_dimension_numbers<[1], [0], [0], [1], [0, 0, 1, 1], [], []>} : vector<32x32xf32>, vector<32x32xf32>, vector<32x32xf32> -> vector<32x32xf32>
    %225 = arith.addf %222, %224 : vector<32x32xf32>
    %226 = math.tanh %225 : vector<32x32xf32>
    %cst_65 = arith.constant 1.000000e+00 : f32
    %227 = vector.broadcast %cst_65 : f32 to vector<32x32xf32>
    %228 = arith.subf %227, %215 : vector<32x32xf32>
    %229 = arith.mulf %228, %183 : vector<32x32xf32>
    %230 = arith.mulf %215, %226 : vector<32x32xf32>
    %231 = arith.addf %229, %230 : vector<32x32xf32>
    %cst_66 = arith.constant dense<0.000000e+00> : vector<96x32xf32>
    %232 = tpu.matmul %3, %207, %cst_66 {dimension_numbers = #tpu.dot_dimension_numbers<[1], [0], [0], [1], [0, 0, 1, 1], [], []>} : vector<96x32xf32>, vector<32x32xf32>, vector<96x32xf32> -> vector<96x32xf32>
    %233 = arith.addf %232, %7 : vector<96x32xf32>
    %234 = vector.extract_strided_slice %233 {offsets = [0, 0], sizes = [32, 32], strides = [1, 1]} : vector<96x32xf32> to vector<32x32xf32>
    %235 = arith.negf %234 : vector<32x32xf32>
    %236 = math.exp %235 : vector<32x32xf32>
    %cst_67 = arith.constant 1.000000e+00 : f32
    %237 = vector.broadcast %cst_67 : f32 to vector<32x32xf32>
    %238 = arith.addf %237, %236 : vector<32x32xf32>
    %239 = arith.divf %237, %238 : vector<32x32xf32>
    %240 = vector.extract_strided_slice %233 {offsets = [32, 0], sizes = [32, 32], strides = [1, 1]} : vector<96x32xf32> to vector<32x32xf32>
    %241 = arith.negf %240 : vector<32x32xf32>
    %242 = math.exp %241 : vector<32x32xf32>
    %cst_68 = arith.constant 1.000000e+00 : f32
    %243 = vector.broadcast %cst_68 : f32 to vector<32x32xf32>
    %244 = arith.addf %243, %242 : vector<32x32xf32>
    %245 = arith.divf %243, %244 : vector<32x32xf32>
    %246 = vector.extract_strided_slice %233 {offsets = [64, 0], sizes = [32, 32], strides = [1, 1]} : vector<96x32xf32> to vector<32x32xf32>
    %247 = arith.mulf %245, %207 : vector<32x32xf32>
    %cst_69 = arith.constant dense<0.000000e+00> : vector<32x32xf32>
    %248 = tpu.matmul %11, %247, %cst_69 {dimension_numbers = #tpu.dot_dimension_numbers<[1], [0], [0], [1], [0, 0, 1, 1], [], []>} : vector<32x32xf32>, vector<32x32xf32>, vector<32x32xf32> -> vector<32x32xf32>
    %249 = arith.addf %246, %248 : vector<32x32xf32>
    %250 = math.tanh %249 : vector<32x32xf32>
    %cst_70 = arith.constant 1.000000e+00 : f32
    %251 = vector.broadcast %cst_70 : f32 to vector<32x32xf32>
    %252 = arith.subf %251, %239 : vector<32x32xf32>
    %253 = arith.mulf %252, %207 : vector<32x32xf32>
    %254 = arith.mulf %239, %250 : vector<32x32xf32>
    %255 = arith.addf %253, %254 : vector<32x32xf32>
    %c5_i32 = arith.constant 5 : i32
    %cst_71 = arith.constant dense<0.000000e+00> : vector<96x32xf32>
    %256 = tpu.matmul %1, %231, %cst_71 {dimension_numbers = #tpu.dot_dimension_numbers<[1], [0], [0], [1], [0, 0, 1, 1], [], []>} : vector<96x32xf32>, vector<32x32xf32>, vector<96x32xf32> -> vector<96x32xf32>
    %257 = arith.addf %256, %5 : vector<96x32xf32>
    %258 = vector.extract_strided_slice %257 {offsets = [0, 0], sizes = [32, 32], strides = [1, 1]} : vector<96x32xf32> to vector<32x32xf32>
    %259 = arith.negf %258 : vector<32x32xf32>
    %260 = math.exp %259 : vector<32x32xf32>
    %cst_72 = arith.constant 1.000000e+00 : f32
    %261 = vector.broadcast %cst_72 : f32 to vector<32x32xf32>
    %262 = arith.addf %261, %260 : vector<32x32xf32>
    %263 = arith.divf %261, %262 : vector<32x32xf32>
    %264 = vector.extract_strided_slice %257 {offsets = [32, 0], sizes = [32, 32], strides = [1, 1]} : vector<96x32xf32> to vector<32x32xf32>
    %265 = arith.negf %264 : vector<32x32xf32>
    %266 = math.exp %265 : vector<32x32xf32>
    %cst_73 = arith.constant 1.000000e+00 : f32
    %267 = vector.broadcast %cst_73 : f32 to vector<32x32xf32>
    %268 = arith.addf %267, %266 : vector<32x32xf32>
    %269 = arith.divf %267, %268 : vector<32x32xf32>
    %270 = vector.extract_strided_slice %257 {offsets = [64, 0], sizes = [32, 32], strides = [1, 1]} : vector<96x32xf32> to vector<32x32xf32>
    %271 = arith.mulf %269, %231 : vector<32x32xf32>
    %cst_74 = arith.constant dense<0.000000e+00> : vector<32x32xf32>
    %272 = tpu.matmul %9, %271, %cst_74 {dimension_numbers = #tpu.dot_dimension_numbers<[1], [0], [0], [1], [0, 0, 1, 1], [], []>} : vector<32x32xf32>, vector<32x32xf32>, vector<32x32xf32> -> vector<32x32xf32>
    %273 = arith.addf %270, %272 : vector<32x32xf32>
    %274 = math.tanh %273 : vector<32x32xf32>
    %cst_75 = arith.constant 1.000000e+00 : f32
    %275 = vector.broadcast %cst_75 : f32 to vector<32x32xf32>
    %276 = arith.subf %275, %263 : vector<32x32xf32>
    %277 = arith.mulf %276, %231 : vector<32x32xf32>
    %278 = arith.mulf %263, %274 : vector<32x32xf32>
    %279 = arith.addf %277, %278 : vector<32x32xf32>
    %cst_76 = arith.constant dense<0.000000e+00> : vector<96x32xf32>
    %280 = tpu.matmul %3, %255, %cst_76 {dimension_numbers = #tpu.dot_dimension_numbers<[1], [0], [0], [1], [0, 0, 1, 1], [], []>} : vector<96x32xf32>, vector<32x32xf32>, vector<96x32xf32> -> vector<96x32xf32>
    %281 = arith.addf %280, %7 : vector<96x32xf32>
    %282 = vector.extract_strided_slice %281 {offsets = [0, 0], sizes = [32, 32], strides = [1, 1]} : vector<96x32xf32> to vector<32x32xf32>
    %283 = arith.negf %282 : vector<32x32xf32>
    %284 = math.exp %283 : vector<32x32xf32>
    %cst_77 = arith.constant 1.000000e+00 : f32
    %285 = vector.broadcast %cst_77 : f32 to vector<32x32xf32>
    %286 = arith.addf %285, %284 : vector<32x32xf32>
    %287 = arith.divf %285, %286 : vector<32x32xf32>
    %288 = vector.extract_strided_slice %281 {offsets = [32, 0], sizes = [32, 32], strides = [1, 1]} : vector<96x32xf32> to vector<32x32xf32>
    %289 = arith.negf %288 : vector<32x32xf32>
    %290 = math.exp %289 : vector<32x32xf32>
    %cst_78 = arith.constant 1.000000e+00 : f32
    %291 = vector.broadcast %cst_78 : f32 to vector<32x32xf32>
    %292 = arith.addf %291, %290 : vector<32x32xf32>
    %293 = arith.divf %291, %292 : vector<32x32xf32>
    %294 = vector.extract_strided_slice %281 {offsets = [64, 0], sizes = [32, 32], strides = [1, 1]} : vector<96x32xf32> to vector<32x32xf32>
    %295 = arith.mulf %293, %255 : vector<32x32xf32>
    %cst_79 = arith.constant dense<0.000000e+00> : vector<32x32xf32>
    %296 = tpu.matmul %11, %295, %cst_79 {dimension_numbers = #tpu.dot_dimension_numbers<[1], [0], [0], [1], [0, 0, 1, 1], [], []>} : vector<32x32xf32>, vector<32x32xf32>, vector<32x32xf32> -> vector<32x32xf32>
    %297 = arith.addf %294, %296 : vector<32x32xf32>
    %298 = math.tanh %297 : vector<32x32xf32>
    %cst_80 = arith.constant 1.000000e+00 : f32
    %299 = vector.broadcast %cst_80 : f32 to vector<32x32xf32>
    %300 = arith.subf %299, %287 : vector<32x32xf32>
    %301 = arith.mulf %300, %255 : vector<32x32xf32>
    %302 = arith.mulf %287, %298 : vector<32x32xf32>
    %303 = arith.addf %301, %302 : vector<32x32xf32>
    %c6_i32 = arith.constant 6 : i32
    %cst_81 = arith.constant dense<0.000000e+00> : vector<96x32xf32>
    %304 = tpu.matmul %1, %279, %cst_81 {dimension_numbers = #tpu.dot_dimension_numbers<[1], [0], [0], [1], [0, 0, 1, 1], [], []>} : vector<96x32xf32>, vector<32x32xf32>, vector<96x32xf32> -> vector<96x32xf32>
    %305 = arith.addf %304, %5 : vector<96x32xf32>
    %306 = vector.extract_strided_slice %305 {offsets = [0, 0], sizes = [32, 32], strides = [1, 1]} : vector<96x32xf32> to vector<32x32xf32>
    %307 = arith.negf %306 : vector<32x32xf32>
    %308 = math.exp %307 : vector<32x32xf32>
    %cst_82 = arith.constant 1.000000e+00 : f32
    %309 = vector.broadcast %cst_82 : f32 to vector<32x32xf32>
    %310 = arith.addf %309, %308 : vector<32x32xf32>
    %311 = arith.divf %309, %310 : vector<32x32xf32>
    %312 = vector.extract_strided_slice %305 {offsets = [32, 0], sizes = [32, 32], strides = [1, 1]} : vector<96x32xf32> to vector<32x32xf32>
    %313 = arith.negf %312 : vector<32x32xf32>
    %314 = math.exp %313 : vector<32x32xf32>
    %cst_83 = arith.constant 1.000000e+00 : f32
    %315 = vector.broadcast %cst_83 : f32 to vector<32x32xf32>
    %316 = arith.addf %315, %314 : vector<32x32xf32>
    %317 = arith.divf %315, %316 : vector<32x32xf32>
    %318 = vector.extract_strided_slice %305 {offsets = [64, 0], sizes = [32, 32], strides = [1, 1]} : vector<96x32xf32> to vector<32x32xf32>
    %319 = arith.mulf %317, %279 : vector<32x32xf32>
    %cst_84 = arith.constant dense<0.000000e+00> : vector<32x32xf32>
    %320 = tpu.matmul %9, %319, %cst_84 {dimension_numbers = #tpu.dot_dimension_numbers<[1], [0], [0], [1], [0, 0, 1, 1], [], []>} : vector<32x32xf32>, vector<32x32xf32>, vector<32x32xf32> -> vector<32x32xf32>
    %321 = arith.addf %318, %320 : vector<32x32xf32>
    %322 = math.tanh %321 : vector<32x32xf32>
    %cst_85 = arith.constant 1.000000e+00 : f32
    %323 = vector.broadcast %cst_85 : f32 to vector<32x32xf32>
    %324 = arith.subf %323, %311 : vector<32x32xf32>
    %325 = arith.mulf %324, %279 : vector<32x32xf32>
    %326 = arith.mulf %311, %322 : vector<32x32xf32>
    %327 = arith.addf %325, %326 : vector<32x32xf32>
    %cst_86 = arith.constant dense<0.000000e+00> : vector<96x32xf32>
    %328 = tpu.matmul %3, %303, %cst_86 {dimension_numbers = #tpu.dot_dimension_numbers<[1], [0], [0], [1], [0, 0, 1, 1], [], []>} : vector<96x32xf32>, vector<32x32xf32>, vector<96x32xf32> -> vector<96x32xf32>
    %329 = arith.addf %328, %7 : vector<96x32xf32>
    %330 = vector.extract_strided_slice %329 {offsets = [0, 0], sizes = [32, 32], strides = [1, 1]} : vector<96x32xf32> to vector<32x32xf32>
    %331 = arith.negf %330 : vector<32x32xf32>
    %332 = math.exp %331 : vector<32x32xf32>
    %cst_87 = arith.constant 1.000000e+00 : f32
    %333 = vector.broadcast %cst_87 : f32 to vector<32x32xf32>
    %334 = arith.addf %333, %332 : vector<32x32xf32>
    %335 = arith.divf %333, %334 : vector<32x32xf32>
    %336 = vector.extract_strided_slice %329 {offsets = [32, 0], sizes = [32, 32], strides = [1, 1]} : vector<96x32xf32> to vector<32x32xf32>
    %337 = arith.negf %336 : vector<32x32xf32>
    %338 = math.exp %337 : vector<32x32xf32>
    %cst_88 = arith.constant 1.000000e+00 : f32
    %339 = vector.broadcast %cst_88 : f32 to vector<32x32xf32>
    %340 = arith.addf %339, %338 : vector<32x32xf32>
    %341 = arith.divf %339, %340 : vector<32x32xf32>
    %342 = vector.extract_strided_slice %329 {offsets = [64, 0], sizes = [32, 32], strides = [1, 1]} : vector<96x32xf32> to vector<32x32xf32>
    %343 = arith.mulf %341, %303 : vector<32x32xf32>
    %cst_89 = arith.constant dense<0.000000e+00> : vector<32x32xf32>
    %344 = tpu.matmul %11, %343, %cst_89 {dimension_numbers = #tpu.dot_dimension_numbers<[1], [0], [0], [1], [0, 0, 1, 1], [], []>} : vector<32x32xf32>, vector<32x32xf32>, vector<32x32xf32> -> vector<32x32xf32>
    %345 = arith.addf %342, %344 : vector<32x32xf32>
    %346 = math.tanh %345 : vector<32x32xf32>
    %cst_90 = arith.constant 1.000000e+00 : f32
    %347 = vector.broadcast %cst_90 : f32 to vector<32x32xf32>
    %348 = arith.subf %347, %335 : vector<32x32xf32>
    %349 = arith.mulf %348, %303 : vector<32x32xf32>
    %350 = arith.mulf %335, %346 : vector<32x32xf32>
    %351 = arith.addf %349, %350 : vector<32x32xf32>
    %c7_i32 = arith.constant 7 : i32
    %cst_91 = arith.constant dense<0.000000e+00> : vector<96x32xf32>
    %352 = tpu.matmul %1, %327, %cst_91 {dimension_numbers = #tpu.dot_dimension_numbers<[1], [0], [0], [1], [0, 0, 1, 1], [], []>} : vector<96x32xf32>, vector<32x32xf32>, vector<96x32xf32> -> vector<96x32xf32>
    %353 = arith.addf %352, %5 : vector<96x32xf32>
    %354 = vector.extract_strided_slice %353 {offsets = [0, 0], sizes = [32, 32], strides = [1, 1]} : vector<96x32xf32> to vector<32x32xf32>
    %355 = arith.negf %354 : vector<32x32xf32>
    %356 = math.exp %355 : vector<32x32xf32>
    %cst_92 = arith.constant 1.000000e+00 : f32
    %357 = vector.broadcast %cst_92 : f32 to vector<32x32xf32>
    %358 = arith.addf %357, %356 : vector<32x32xf32>
    %359 = arith.divf %357, %358 : vector<32x32xf32>
    %360 = vector.extract_strided_slice %353 {offsets = [32, 0], sizes = [32, 32], strides = [1, 1]} : vector<96x32xf32> to vector<32x32xf32>
    %361 = arith.negf %360 : vector<32x32xf32>
    %362 = math.exp %361 : vector<32x32xf32>
    %cst_93 = arith.constant 1.000000e+00 : f32
    %363 = vector.broadcast %cst_93 : f32 to vector<32x32xf32>
    %364 = arith.addf %363, %362 : vector<32x32xf32>
    %365 = arith.divf %363, %364 : vector<32x32xf32>
    %366 = vector.extract_strided_slice %353 {offsets = [64, 0], sizes = [32, 32], strides = [1, 1]} : vector<96x32xf32> to vector<32x32xf32>
    %367 = arith.mulf %365, %327 : vector<32x32xf32>
    %cst_94 = arith.constant dense<0.000000e+00> : vector<32x32xf32>
    %368 = tpu.matmul %9, %367, %cst_94 {dimension_numbers = #tpu.dot_dimension_numbers<[1], [0], [0], [1], [0, 0, 1, 1], [], []>} : vector<32x32xf32>, vector<32x32xf32>, vector<32x32xf32> -> vector<32x32xf32>
    %369 = arith.addf %366, %368 : vector<32x32xf32>
    %370 = math.tanh %369 : vector<32x32xf32>
    %cst_95 = arith.constant 1.000000e+00 : f32
    %371 = vector.broadcast %cst_95 : f32 to vector<32x32xf32>
    %372 = arith.subf %371, %359 : vector<32x32xf32>
    %373 = arith.mulf %372, %327 : vector<32x32xf32>
    %374 = arith.mulf %359, %370 : vector<32x32xf32>
    %375 = arith.addf %373, %374 : vector<32x32xf32>
    %cst_96 = arith.constant dense<0.000000e+00> : vector<96x32xf32>
    %376 = tpu.matmul %3, %351, %cst_96 {dimension_numbers = #tpu.dot_dimension_numbers<[1], [0], [0], [1], [0, 0, 1, 1], [], []>} : vector<96x32xf32>, vector<32x32xf32>, vector<96x32xf32> -> vector<96x32xf32>
    %377 = arith.addf %376, %7 : vector<96x32xf32>
    %378 = vector.extract_strided_slice %377 {offsets = [0, 0], sizes = [32, 32], strides = [1, 1]} : vector<96x32xf32> to vector<32x32xf32>
    %379 = arith.negf %378 : vector<32x32xf32>
    %380 = math.exp %379 : vector<32x32xf32>
    %cst_97 = arith.constant 1.000000e+00 : f32
    %381 = vector.broadcast %cst_97 : f32 to vector<32x32xf32>
    %382 = arith.addf %381, %380 : vector<32x32xf32>
    %383 = arith.divf %381, %382 : vector<32x32xf32>
    %384 = vector.extract_strided_slice %377 {offsets = [32, 0], sizes = [32, 32], strides = [1, 1]} : vector<96x32xf32> to vector<32x32xf32>
    %385 = arith.negf %384 : vector<32x32xf32>
    %386 = math.exp %385 : vector<32x32xf32>
    %cst_98 = arith.constant 1.000000e+00 : f32
    %387 = vector.broadcast %cst_98 : f32 to vector<32x32xf32>
    %388 = arith.addf %387, %386 : vector<32x32xf32>
    %389 = arith.divf %387, %388 : vector<32x32xf32>
    %390 = vector.extract_strided_slice %377 {offsets = [64, 0], sizes = [32, 32], strides = [1, 1]} : vector<96x32xf32> to vector<32x32xf32>
    %391 = arith.mulf %389, %351 : vector<32x32xf32>
    %cst_99 = arith.constant dense<0.000000e+00> : vector<32x32xf32>
    %392 = tpu.matmul %11, %391, %cst_99 {dimension_numbers = #tpu.dot_dimension_numbers<[1], [0], [0], [1], [0, 0, 1, 1], [], []>} : vector<32x32xf32>, vector<32x32xf32>, vector<32x32xf32> -> vector<32x32xf32>
    %393 = arith.addf %390, %392 : vector<32x32xf32>
    %394 = math.tanh %393 : vector<32x32xf32>
    %cst_100 = arith.constant 1.000000e+00 : f32
    %395 = vector.broadcast %cst_100 : f32 to vector<32x32xf32>
    %396 = arith.subf %395, %383 : vector<32x32xf32>
    %397 = arith.mulf %396, %351 : vector<32x32xf32>
    %398 = arith.mulf %383, %394 : vector<32x32xf32>
    %399 = arith.addf %397, %398 : vector<32x32xf32>
    %c0_101 = arith.constant 0 : index
    %c0_102 = arith.constant 0 : index
    %400 = vector.load %arg1[%c0_101, %c0_102] : memref<16x16xf32, #tpu.memory_space<vmem>>, vector<16x16xf32>
    %c0_103 = arith.constant 0 : index
    %c0_104 = arith.constant 0 : index
    %401 = vector.load %arg0[%c0_103, %c0_104] : memref<16x32xf32, #tpu.memory_space<vmem>>, vector<16x32xf32>
    %cst_105 = arith.constant dense<0.000000e+00> : vector<16x32xf32>
    %402 = tpu.matmul %401, %375, %cst_105 {dimension_numbers = #tpu.dot_dimension_numbers<[1], [0], [0], [1], [0, 0, 1, 1], [], []>} : vector<16x32xf32>, vector<32x32xf32>, vector<16x32xf32> -> vector<16x32xf32>
    %cst_106 = arith.constant dense<0.000000e+00> : vector<16x32xf32>
    %403 = tpu.matmul %400, %402, %cst_106 {dimension_numbers = #tpu.dot_dimension_numbers<[1], [0], [0], [1], [0, 0, 1, 1], [], []>} : vector<16x16xf32>, vector<16x32xf32>, vector<16x32xf32> -> vector<16x32xf32>
    %cst_107 = arith.constant 0.000000e+00 : f32
    %404 = vector.broadcast %cst_107 : f32 to vector<16x32xf32>
    %405 = arith.maximumf %403, %404 : vector<16x32xf32>
    %cst_108 = arith.constant dense<0.000000e+00> : vector<16x32xf32>
    %406 = tpu.matmul %405, %399, %cst_108 {dimension_numbers = #tpu.dot_dimension_numbers<[1], [0], [0], [1], [0, 0, 1, 1], [], []>} : vector<16x32xf32>, vector<32x32xf32>, vector<16x32xf32> -> vector<16x32xf32>
    %cst_109 = arith.constant dense<0.000000e+00> : vector<16x32xf32>
    %407 = tpu.matmul %400, %406, %cst_109 {dimension_numbers = #tpu.dot_dimension_numbers<[1], [0], [0], [1], [0, 0, 1, 1], [], []>} : vector<16x16xf32>, vector<16x32xf32>, vector<16x32xf32> -> vector<16x32xf32>
    %cst_110 = arith.constant 0.000000e+00 : f32
    %408 = vector.broadcast %cst_110 : f32 to vector<16x32xf32>
    %409 = arith.maximumf %407, %408 : vector<16x32xf32>
    %cst_111 = arith.constant dense<0.000000e+00> : vector<16xf32>
    %410 = vector.multi_reduction <add>, %409, %cst_111 [1] : vector<16x32xf32> to vector<16xf32>
    %411 = vector.shape_cast %410 : vector<16xf32> to vector<16x1xf32>
    %cst_112 = arith.constant 3.200000e+01 : f32
    %412 = vector.broadcast %cst_112 : f32 to vector<16x1xf32>
    %413 = arith.divf %411, %412 : vector<16x1xf32>
    %414 = vector.broadcast %413 : vector<16x1xf32> to vector<16x32xf32>
    %415 = arith.subf %409, %414 : vector<16x32xf32>
    %416 = arith.mulf %415, %415 : vector<16x32xf32>
    %cst_113 = arith.constant dense<0.000000e+00> : vector<16xf32>
    %417 = vector.multi_reduction <add>, %416, %cst_113 [1] : vector<16x32xf32> to vector<16xf32>
    %418 = vector.shape_cast %417 : vector<16xf32> to vector<16x1xf32>
    %cst_114 = arith.constant 3.200000e+01 : f32
    %419 = vector.broadcast %cst_114 : f32 to vector<16x1xf32>
    %420 = arith.divf %418, %419 : vector<16x1xf32>
    %421 = vector.broadcast %413 : vector<16x1xf32> to vector<16x32xf32>
    %422 = arith.subf %409, %421 : vector<16x32xf32>
    %cst_115 = arith.constant 9.99999974E-6 : f32
    %423 = vector.broadcast %cst_115 : f32 to vector<16x1xf32>
    %424 = arith.addf %420, %423 : vector<16x1xf32>
    %425 = math.rsqrt %424 : vector<16x1xf32>
    %426 = vector.broadcast %425 : vector<16x1xf32> to vector<16x32xf32>
    %427 = arith.mulf %422, %426 : vector<16x32xf32>
    %c0_116 = arith.constant 0 : index
    %c0_117 = arith.constant 0 : index
    %428 = vector.load %arg6[%c0_116, %c0_117] : memref<1x32xf32, #tpu.memory_space<vmem>>, vector<1x32xf32>
    %429 = vector.broadcast %428 : vector<1x32xf32> to vector<16x32xf32>
    %430 = arith.mulf %427, %429 : vector<16x32xf32>
    %c0_118 = arith.constant 0 : index
    %c0_119 = arith.constant 0 : index
    %431 = vector.load %arg7[%c0_118, %c0_119] : memref<1x32xf32, #tpu.memory_space<vmem>>, vector<1x32xf32>
    %432 = vector.broadcast %431 : vector<1x32xf32> to vector<16x32xf32>
    %433 = arith.addf %430, %432 : vector<16x32xf32>
    %c0_120 = arith.constant 0 : index
    %c0_121 = arith.constant 0 : index
    %434 = vector.load %arg8[%c0_120, %c0_121] : memref<1x32xf32, #tpu.memory_space<vmem>>, vector<1x32xf32>
    %435 = vector.broadcast %434 : vector<1x32xf32> to vector<16x32xf32>
    %436 = arith.mulf %433, %435 : vector<16x32xf32>
    %cst_122 = arith.constant dense<0.000000e+00> : vector<16xf32>
    %437 = vector.multi_reduction <add>, %436, %cst_122 [1] : vector<16x32xf32> to vector<16xf32>
    %438 = vector.shape_cast %437 : vector<16xf32> to vector<16x1xf32>
    %c0_123 = arith.constant 0 : index
    %c0_124 = arith.constant 0 : index
    %439 = vector.load %arg9[%c0_123, %c0_124] : memref<1x1xf32, #tpu.memory_space<vmem>>, vector<1x1xf32>
    %440 = vector.broadcast %439 : vector<1x1xf32> to vector<16x1xf32>
    %441 = arith.addf %438, %440 : vector<16x1xf32>
    %c0_125 = arith.constant 0 : index
    %c0_126 = arith.constant 0 : index
    %442 = vector.load %arg10[%c0_125, %c0_126] : memref<16x1xf32, #tpu.memory_space<vmem>>, vector<16x1xf32>
    tpu.vector_store %arg10[%c0_125, %c0_126], %441 {strides = array<i32>} : memref<16x1xf32, #tpu.memory_space<vmem>>, vector<16x1xf32>,
    return
  }
}

</mosaic_0001>

<bundles_post_ra>
// kernel: tpu_custom_call.1
= control target key start
LH: loop header
LB: loop body
LE: loop exit
PB: predicated region body
PF: predicated region fallthrough
CT: control target
= control target key end

     0   :  { %vm105_vm0 = vcmask 261120   ;;  %vm4863_vm1 = vcmask 130048   ;;  %vm5174_vm2 = vcmask 7168   ;;  %s10132_s2 = inlined_call_operand.vmem [shape: f32[2,32,32], index: 2, kind: input, shape index: {}]   ;;  %s10133_s3 = inlined_call_operand.vmem [shape: f32[2,96,32], index: 3, kind: input, shape index: {}]   ;;  %s10134_s5 = inlined_call_operand.vmem [shape: f32[2,32,32], index: 5, kind: input, shape index: {}]   ;;  %s10135_s4 = inlined_call_operand.vmem [shape: f32[2,96,32], index: 4, kind: input, shape index: {}]   ;;  %s10136_s0 = inlined_call_operand.vmem [shape: f32[16,32], index: 0, kind: input, shape index: {}]   ;;  %s10137_s1 = inlined_call_operand.vmem [shape: f32[16,16], index: 1, kind: input, shape index: {}]   ;;  %s10138_s9 = inlined_call_operand.<no memory space> [shape: f32[1,1], index: 9, kind: input, shape index: {}]   ;;  %s10139_s6 = inlined_call_operand.vmem [shape: f32[1,32], index: 6, kind: input, shape index: {}]   ;;  %s10140_s7 = inlined_call_operand.vmem [shape: f32[1,32], index: 7, kind: input, shape index: {}]   ;;  %s10141_s8 = inlined_call_operand.vmem [shape: f32[1,32], index: 8, kind: input, shape index: {}]   ;;  %s10142_s10 = inlined_call_operand.vmem [shape: f32[16,1], index: 10, kind: output, shape index: {}]  }
   0x1   :  { %v7559_v0 = vld [vmem:[%s10132_s2 + $0x18] sm:$0xff]  ;;  %v7564_v1 = vld [vmem:[%s10132_s2 + $0x10] sm:$0xff]  ;;  %v7570_v2 = vld [vmem:[%s10133_s3] sm:$0xff] }
   0x2   :  { %6013 = vmatprep.subr.mxu0 %v7559_v0  ;;  %v7576_v3 = vld [vmem:[%s10132_s2 + $0x8] sm:$0xff]  ;;  %6021 = vmatprep.mubr.msk.f32.mxu0 %vm105_vm0, %v7570_v2  ;;  %v7585_v4 = vld [vmem:[%s10132_s2] sm:$0xff]  ;;  %v7598_v6 = vld [vmem:[%s10133_s3 + $0x10] sm:$0xff] }
   0x3   :  { %6014 = vmatpush3.msra.mxu0 %v7559_v0  ;;  %v7592_v5 = vld [vmem:[%s10133_s3 + $0x8] sm:$0xff]  ;;  %v7608_v7 = vld [vmem:[%s10133_s3 + $0x18] sm:$0xff]  ;;  %v7613_v8 = vld [vmem:[%s10133_s3 + $0x20] sm:$0xff] }
   0x4   :  { %6015 = vmatprep.subr.mxu0 %v7564_v1  ;;  %v7622_v9 = vld [vmem:[%s10133_s3 + $0x28] sm:$0xff]  ;;  %v7627_v10 = vld [vmem:[%s10133_s3 + $0x30] sm:$0xff]  ;;  %v7636_v11 = vld [vmem:[%s10133_s3 + $0x38] sm:$0xff] }
   0x5   :  { %6016 = vmatpush3.msra.mxu0 %v7564_v1  ;;  %v7643_v12 = vld [vmem:[%s10133_s3 + $0x40] sm:$0xff]  ;;  %v7650_v13 = vld [vmem:[%s10133_s3 + $0x48] sm:$0xff]  ;;  %v7664_v15 = vld [vmem:[%s10133_s3 + $0x50] sm:$0xff] }
   0x6   :  { %6017 = vmatprep.subr.mxu0 %v7576_v3  ;;  %v7657_v14 = vld [vmem:[%s10134_s5] sm:$0xff]  ;;  %v7671_v16 = vld [vmem:[%s10133_s3 + $0x58] sm:$0xff]  ;;  %v7686_v21 = vld [vmem:[%s10135_s4 + $0x28] sm:$0xff] }
   0x7   :  { %6018 = vmatpush3.msra.mxu0 %v7576_v3  ;;  %10199 = vst [vmem:[#allocation3_spill] sm:$0xff] %v7657_v14  ;;  %6047 = vmatprep.mubr.msk.f32.mxu1 %vm105_vm0, %v7657_v14  ;;  %v7691_v23 = vld [vmem:[%s10135_s4 + $0x20] sm:$0xff]  ;;  %v7697_v26 = vld [vmem:[%s10135_s4 + $0x38] sm:$0xff]  ;;  %v7703_v30 = vld [vmem:[%s10135_s4 + $0x30] sm:$0xff] }
   0x8   :  { %6019 = vmatprep.subr.mxu0 %v7585_v4  ;;  %v7714_v53 = vld [vmem:[%s10134_s5 + $0x8] sm:$0xff]  ;;  %v7719_v54 = vld [vmem:[%s10132_s2 + $0x38] sm:$0xff]  ;;  %v7724_v55 = vld [vmem:[%s10134_s5 + $0x10] sm:$0xff] }
   0x9   :  { %6020 = vmatpush3.msra.mxu0 %v7585_v4  ;;  %v7729_v56 = vld [vmem:[%s10132_s2 + $0x30] sm:$0xff]  ;;  %v7740_v57 = vld [vmem:[%s10134_s5 + $0x18] sm:$0xff]  ;;  %v7745_v58 = vld [vmem:[%s10132_s2 + $0x28] sm:$0xff] }
   0xa   :  { %6022 = vmatmul.mubr.msk.f32.vlgmr.msra.gmra.mxu0 %vm105_vm0, %v7592_v5  ;;  %v7751_v59 = vld [vmem:[%s10133_s3 + $0x60] sm:$0xff]  ;;  %v7768_v61 = vld [vmem:[%s10133_s3 + $0x68] sm:$0xff]  ;;  %v7774_v62 = vld [vmem:[%s10133_s3 + $0x70] sm:$0xff] }
   0xb   :  { %6024 = vmatprep.mubr.msk.f32.mxu0 %vm105_vm0, %v7598_v6  ;;  %v7757_v60 = vld [vmem:[%s10132_s2 + $0x20] sm:$0xff]  ;;  %v7784_v63 = vld [vmem:[%s10133_s3 + $0x78] sm:$0xff] }
   0xe   :  { %6025 = vmatmul.mubr.msk.f32.gmra.mxu0 %vm105_vm0, %v7608_v7 }
   0xf   :  { %6027 = vmatprep.mubr.msk.f32.mxu0 %vm105_vm0, %v7613_v8 }
  0x12   :  { %6028 = vmatmul.mubr.msk.f32.gmra.mxu0 %vm105_vm0, %v7622_v9 }
  0x13   :  { %6030 = vmatprep.mubr.msk.f32.mxu0 %vm105_vm0, %v7627_v10 }
  0x16   :  { %6031 = vmatmul.mubr.msk.f32.gmra.mxu0 %vm105_vm0, %v7636_v11 }
  0x17   :  { %6033 = vmatprep.mubr.msk.f32.mxu0 %vm105_vm0, %v7643_v12 }
  0x1a   :  { %6034 = vmatmul.mubr.msk.f32.gmra.mxu0 %vm105_vm0, %v7650_v13 }
  0x1b   :  { %6036 = vmatprep.mubr.msk.f32.mxu0 %vm105_vm0, %v7664_v15 }
  0x1e   :  { %6037 = vmatmul.mubr.msk.f32.gmra.mxu0 %vm105_vm0, %v7671_v16 }
  0xca   :  { %v7675_v17 = vpop.f32.mrf.mxu0 }
  0xcc   :  { %v7677_v18 = vpop.f32.mrf.mxu0 }
  0xce   :  { %v7679_v19 = vpop.f32.mrf.mxu0 }
  0xd0   :  { %v7681_v20 = vpop.f32.mrf.mxu0 }
  0xd2   :  { %v6029_v22 = vpop.f32.mrf.mxu0 }
  0xd3   :  { %v234_v24 = vadd.f32 %v6029_v22, %v7686_v21  ;;  %v7789_v22 = vld [vmem:[%s10133_s3 + $0x80] sm:$0xff] }
  0xd4   :  { %v228_v25 = vpop.f32.mrf.mxu0 }
  0xd5   :  { %v5230_v27 = vmul.f32 -1.442695, %v234_v24  ;;  %v229_v28 = vadd.f32 %v228_v25, %v7691_v23  ;;  %v7798_v24 = vld [vmem:[%s10133_s3 + $0x88] sm:$0xff]  ;;  %v7803_v25 = vld [vmem:[%s10133_s3 + $0x90] sm:$0xff] }
  0xd6   :  { %v6032_v29 = vpop.f32.mrf.mxu0 }
  0xd7   :  { %v5229_v31 = vmul.f32 -1.442695, %v229_v28  ;;  %v244_v32 = vadd.f32 %v6032_v29, %v7697_v26  ;;  %6689 = vpow2.f32 %v5230_v27  ;;  %v7812_v27 = vld [vmem:[%s10133_s3 + $0x98] sm:$0xff]  ;;  %v7819_v28 = vld [vmem:[%s10133_s3 + $0xa0] sm:$0xff]  ;;  %v7826_v29 = vld [vmem:[%s10133_s3 + $0xa8] sm:$0xff] }
  0xd8   :  { %v238_v33 = vpop.f32.mrf.mxu0  ;;  %10200 = vst [vmem:[#allocation4_spill] sm:$0xff] %v7819_v28  ;;  %10201 = vst [vmem:[#allocation5_spill] sm:$0xff] %v7826_v29 }
  0xd9   :  { %v5232_v34 = vmul.f32 -1.442695, %v244_v32  ;;  %v239_v35 = vadd.f32 %v238_v33, %v7703_v30  ;;  %6691 = vpow2.f32 %v5229_v31  ;;  %v7833_v31 = vld [vmem:[%s10134_s5 + $0x20] sm:$0xff]  ;;  %v7840_v32 = vld [vmem:[%s10133_s3 + $0xb0] sm:$0xff]  ;;  %v7847_v33 = vld [vmem:[%s10133_s3 + $0xb8] sm:$0xff] }
  0xda   :  { %6087 = vmatprep.mubr.msk.f32.mxu0 %vm105_vm0, %v7833_v31  ;;  %10202 = vst [vmem:[#allocation6_spill] sm:$0xff] %v7840_v32  ;;  %10203 = vst [vmem:[#allocation7_spill] sm:$0xff] %v7847_v33 }
  0xdb   :  { %6693 = vpow2.f32 %v5232_v34  ;;  %v5231_v36 = vmul.f32 -1.442695, %v239_v35 }
  0xdd   :  { %6695 = vpow2.f32 %v5231_v36 }
  0xe4   :  { %v6690_v37 = vpop.eup %6689 }
  0xe5   :  { %v304_v40 = vadd.f32 1.0, %v6690_v37  ;;  %v7860_v37 = vld [vmem:[%s10135_s4 + $0x8] sm:$0xff] }
  0xe6   :  { %v6692_v38 = vpop.eup %6691  ;;  %10204 = vst [vmem:[#allocation8_spill] sm:$0xff] %v7860_v37 }
  0xe7   :  { %v303_v43 = vadd.f32 1.0, %v6692_v38 }
  0xe8   :  { %v6694_v39 = vpop.eup %6693 }
  0xe9   :  { %v306_v41 = vadd.f32 1.0, %v6694_v39  ;;  %v7867_v39 = vld [vmem:[%s10135_s4 + $0x18] sm:$0xff] }
  0xea   :  { %v6696_v42 = vpop.eup %6695  ;;  %10205 = vst [vmem:[#allocation9_spill] sm:$0xff] %v7867_v39 }
  0xeb   :  { %6697 = vrcp.f32 %v306_v41  ;;  %v305_v44 = vadd.f32 1.0, %v6696_v42  ;;  %v214_v42 = vadd.f32 %v7675_v17, %v7860_v37  ;;  %v7896_v17 = vld [vmem:[%s10135_s4] sm:$0xff] }
  0xec   :  { %6699 = vrcp.f32 %v304_v40  ;;  %v7872_v40 = vld [vmem:[%s10135_s4 + $0x10] sm:$0xff]  ;;  %10208 = vst [vmem:[#allocation12_spill] sm:$0xff] %v7896_v17 }
  0xed   :  { %6701 = vrcp.f32 %v305_v44  ;;  %10206 = vst [vmem:[#allocation10_spill] sm:$0xff] %v7872_v40 }
  0xee   :  { %6703 = vrcp.f32 %v303_v43  ;;  %v224_v43 = vadd.f32 %v7679_v19, %v7867_v39 }
  0xf8   :  { %v6698_v45 = vpop.eup %6697 }
  0xf9   :  { %v6700_v46 = vpop.eup %6699  ;;  %v318_v47 = vmul.f32 %v6698_v45, %v7559_v0  ;;  %v219_v45 = vadd.f32 %v7681_v20, %v7872_v40  ;;  %v7901_v20 = vld [vmem:[%s10135_s4 + $0x80] sm:$0xff]  ;;  %v7909_v40 = vld [vmem:[%s10135_s4 + $0x98] sm:$0xff] }
  0xfa   :  { %v6702_v48 = vpop.eup %6701  ;;  %v316_v51 = vmul.f32 %v6700_v46, %v7576_v3  ;;  %10209 = vst [vmem:[#allocation13_spill] sm:$0xff] %v7901_v20  ;;  %10210 = vst [vmem:[#allocation14_spill] sm:$0xff] %v7909_v40 }
  0xfb   :  { %6039 = vmatprep.subr.mxu1 %v318_v47  ;;  %v317_v49 = vmul.f32 %v6702_v48, %v7564_v1  ;;  %v6704_v50 = vpop.eup %6703  ;;  %v5228_v48 = vmul.f32 -1.442695, %v224_v43  ;;  %v5227_v19 = vmul.f32 -1.442695, %v219_v45 }
  0xfc   :  { %6040 = vmatpush3.msra.mxu1 %v318_v47  ;;  %v315_v52 = vmul.f32 %v6704_v50, %v7585_v4  ;;  %v5226_v47 = vmul.f32 -1.442695, %v214_v42  ;;  %v7891_v50 = vld [vmem:[%s10135_s4 + $0x88] sm:$0xff]  ;;  %v209_v42 = vadd.f32 %v7677_v18, %v7896_v17 }
  0xfd   :  { %6041 = vmatprep.subr.mxu1 %v317_v49  ;;  %10207 = vst [vmem:[#allocation11_spill] sm:$0xff] %v7891_v50 }
  0xfe   :  { %6042 = vmatpush3.msra.mxu1 %v317_v49  ;;  %6705 = vpow2.f32 %v5226_v47  ;;  %v7915_v47 = vld [vmem:[%s10135_s4 + $0x90] sm:$0xff] }
  0xff   :  { %6043 = vmatprep.subr.mxu1 %v316_v51  ;;  %6707 = vpow2.f32 %v5228_v48  ;;  %10211 = vst [vmem:[#allocation15_spill] sm:$0xff] %v7915_v47  ;;  %v5225_v48 = vmul.f32 -1.442695, %v209_v42 }
 0x100   :  { %6044 = vmatpush3.msra.mxu1 %v316_v51  ;;  %6709 = vpow2.f32 %v5227_v19 }
 0x101   :  { %6045 = vmatprep.subr.mxu1 %v315_v52 }
 0x102   :  { %6046 = vmatpush3.msra.mxu1 %v315_v52 }
 0x103   :  { %6048 = vmatmul.mubr.msk.f32.vlgmr.msra.gmra.mxu1 %vm105_vm0, %v7714_v53  ;;  %6053 = vmatprep.subr.mxu1 %v7719_v54 }
 0x104   :  { %6054 = vmatpush3.msra.mxu1 %v7719_v54  ;;  %6050 = vmatprep.mubr.msk.f32.mxu1 %vm105_vm0, %v7724_v55 }
 0x105   :  { %6055 = vmatprep.subr.mxu1 %v7729_v56 }
 0x106   :  { %6056 = vmatpush3.msra.mxu1 %v7729_v56 }
 0x107   :  { %6051 = vmatmul.mubr.msk.f32.gmra.mxu1 %vm105_vm0, %v7740_v57  ;;  %6057 = vmatprep.subr.mxu1 %v7745_v58 }
 0x108   :  { %6058 = vmatpush3.msra.mxu1 %v7745_v58  ;;  %6061 = vmatprep.mubr.msk.f32.mxu1 %vm105_vm0, %v7751_v59 }
 0x109   :  { %6059 = vmatprep.subr.mxu1 %v7757_v60 }
 0x10a   :  { %6060 = vmatpush3.msra.mxu1 %v7757_v60 }
 0x10b   :  { %6062 = vmatmul.mubr.msk.f32.vlgmr.msra.gmra.mxu1 %vm105_vm0, %v7768_v61 }
 0x10c   :  { %6064 = vmatprep.mubr.msk.f32.mxu1 %vm105_vm0, %v7774_v62 }
 0x10f   :  { %6065 = vmatmul.mubr.msk.f32.gmra.mxu1 %vm105_vm0, %v7784_v63 }
 0x110   :  { %6067 = vmatprep.mubr.msk.f32.mxu1 %vm105_vm0, %v7789_v22 }
 0x113   :  { %6068 = vmatmul.mubr.msk.f32.gmra.mxu1 %vm105_vm0, %v7798_v24 }
 0x114   :  { %6070 = vmatprep.mubr.msk.f32.mxu1 %vm105_vm0, %v7803_v25 }
 0x117   :  { %6071 = vmatmul.mubr.msk.f32.gmra.mxu1 %vm105_vm0, %v7812_v27 }
 0x118   :  { %6073 = vmatprep.mubr.msk.f32.mxu1 %vm105_vm0, %v7819_v28 }
 0x11b   :  { %6074 = vmatmul.mubr.msk.f32.gmra.mxu1 %vm105_vm0, %v7826_v29 }
 0x11c   :  { %6076 = vmatprep.mubr.msk.f32.mxu1 %vm105_vm0, %v7840_v32 }
 0x11f   :  { %6077 = vmatmul.mubr.msk.f32.gmra.mxu1 %vm105_vm0, %v7847_v33 }
 0x120   :  { %6127 = vmatprep.mubr.msk.f32.mxu1 %vm105_vm0, %v7657_v14 }
 0x1c3   :  { %v7853_v34 = vpop.f32.mrf.mxu1 }
 0x1c5   :  { %v7855_v35 = vpop.f32.mrf.mxu1 }
 0x1c7   :  { %v6052_v36 = vpop.f32.mrf.mxu1 }
 0x1c9   :  { %v7862_v38 = vpop.f32.mrf.mxu1 }
 0x1cb   :  { %v7874_v41 = vpop.f32.mrf.mxu1 }
 0x1cd   :  { %v7880_v44 = vpop.f32.mrf.mxu1 }
 0x1cf   :  { %v7884_v46 = vpop.f32.mrf.mxu1 }
 0x1d1   :  { %v7886_v49 = vpop.f32.mrf.mxu1 }
 0x1d3   :  { %v6069_v51 = vpop.f32.mrf.mxu1 }
 0x1d4   :  { %v568_v52 = vadd.f32 %v6069_v51, %v7891_v50  ;;  %v6035_v51 = vpop.f32.mrf.mxu0 }
 0x1d5   :  { %v562_v43 = vpop.f32.mrf.mxu1 }
 0x1d6   :  { %v5254_v45 = vmul.f32 -1.442695, %v568_v52  ;;  %v563_v39 = vadd.f32 %v7901_v20, %v562_v43  ;;  %v248_v19 = vpop.f32.mrf.mxu0  ;;  %v7922_v43 = vld [vmem:[%s10135_s4 + $0x58] sm:$0xff]  ;;  %v6706_v20 = vpop.eup %6705 }
 0x1d7   :  { %v6072_v37 = vpop.f32.mrf.mxu1  ;;  %10212 = vst [vmem:[#allocation16_spill] sm:$0xff] %v7922_v43 }
 0x1d8   :  { %v5253_v50 = vmul.f32 -1.442695, %v563_v39  ;;  %v578_v18 = vadd.f32 %v6072_v37, %v7909_v40  ;;  %6711 = vpow2.f32 %v5254_v45  ;;  %v6038_v39 = vpop.f32.mrf.mxu0  ;;  %v6708_v37 = vpop.eup %6707 }
 0x1d9   :  { %v572_v17 = vpop.f32.mrf.mxu1  ;;  %v6710_v42 = vpop.eup %6709  ;;  %v264_v45 = vadd.f32 %v6038_v39, %v7922_v43  ;;  %v7939_v39 = vld [vmem:[%s10135_s4 + $0x40] sm:$0xff] }
 0x1da   :  { %v5256_v14 = vmul.f32 -1.442695, %v578_v18  ;;  %v573_v33 = vadd.f32 %v7915_v47, %v572_v17  ;;  %6713 = vpow2.f32 %v5253_v50  ;;  %v280_v18 = vadd.f32 1.0, %v6706_v20  ;;  %v258_v40 = vpop.f32.mrf.mxu0 }
 0x1db   :  { %v281_v17 = vadd.f32 1.0, %v6710_v42  ;;  %v419_v47 = vadd.f32 %v6052_v36, %v264_v45  ;;  %v249_v36 = vadd.f32 %v248_v19, %v7939_v39 }
 0x1dc   :  { %6715 = vpow2.f32 %v5256_v14  ;;  %v5255_v52 = vmul.f32 -1.442695, %v573_v33  ;;  %v7928_v14 = vld [vmem:[%s10135_s4 + $0x50] sm:$0xff]  ;;  %v282_v33 = vadd.f32 1.0, %v6708_v37 }
 0x1dd   :  { %6717 = vpow2.f32 %v5225_v48  ;;  %10213 = vst [vmem:[#allocation17_spill] sm:$0xff] %v7928_v14  ;;  %v7933_v48 = vld [vmem:[%s10135_s4 + $0x48] sm:$0xff] }
 0x1de   :  { %6719 = vpow2.f32 %v5255_v52  ;;  %v259_v52 = vadd.f32 %v258_v40, %v7928_v14  ;;  %v254_v42 = vadd.f32 %v6035_v51, %v7933_v48 }
 0x1df   :  { %6721 = vrcp.f32 %v280_v18 }
 0x1e0   :  { %6723 = vrcp.f32 %v282_v33  ;;  %v418_v40 = vadd.f32 %v7862_v38, %v259_v52  ;;  %v417_v14 = vadd.f32 %v7853_v34, %v254_v42 }
 0x1e1   :  { %6725 = vrcp.f32 %v281_v17 }
 0x1e2   :  { %6727 = vtanh.f32 %v419_v47 }
 0x1e5   :  { %v6712_v50 = vpop.eup %6711 }
 0x1e6   :  { %v638_v37 = vadd.f32 1.0, %v6712_v50  ;;  %v416_v50 = vadd.f32 %v7855_v35, %v249_v36 }
 0x1e7   :  { %v6714_v32 = vpop.eup %6713 }
 0x1e8   :  { %v637_v45 = vadd.f32 1.0, %v6714_v32 }
 0x1e9   :  { %v6716_v20 = vpop.eup %6715 }
 0x1ea   :  { %v6718_v43 = vpop.eup %6717  ;;  %v640_v29 = vadd.f32 1.0, %v6716_v20 }
 0x1eb   :  { %v6720_v28 = vpop.eup %6719  ;;  %v279_v33 = vadd.f32 1.0, %v6718_v43 }
 0x1ec   :  { %6729 = vrcp.f32 %v640_v29  ;;  %v639_v18 = vadd.f32 1.0, %v6720_v28  ;;  %v6722_v47 = vpop.eup %6721 }
 0x1ed   :  { %6731 = vrcp.f32 %v638_v37  ;;  %v6724_v51 = vpop.eup %6723 }
 0x1ee   :  { %6733 = vrcp.f32 %v639_v18  ;;  %v6726_v38 = vpop.eup %6725  ;;  %v427_v52 = vsub.f32 1.0, %v6724_v51 }
 0x1ef   :  { %6735 = vtanh.f32 %v418_v40  ;;  %v6728_v17 = vpop.eup %6727  ;;  %v426_v42 = vsub.f32 1.0, %v6726_v38 }
 0x1f0   :  { %6737 = vrcp.f32 %v637_v45  ;;  %v435_v37 = vmul.f32 %v6728_v17, %v6724_v51  ;;  %v431_v45 = vmul.f32 %v427_v52, %v7559_v0  ;;  %v7962_v17 = vld [vmem:[%s10134_s5 + $0x30] sm:$0xff] }
 0x1f1   :  { %6739 = vrcp.f32 %v279_v33  ;;  %v425_v33 = vsub.f32 1.0, %v6722_v47  ;;  %v430_v51 = vmul.f32 %v426_v42, %v7564_v1  ;;  %v7976_v1 = vld [vmem:[%s10134_s5 + $0x38] sm:$0xff] }
 0x1f2   :  { %6741 = vtanh.f32 %v417_v14 }
 0x1f3   :  { %6743 = vtanh.f32 %v416_v50 }
 0x1f9   :  { %v6730_v19 = vpop.eup %6729 }
 0x1fa   :  { %v6732_v32 = vpop.eup %6731  ;;  %v652_v28 = vmul.f32 %v6730_v19, %v7719_v54  ;;  %v7954_v19 = vld [vmem:[%s10134_s5 + $0x28] sm:$0xff] }
 0x1fb   :  { %v6734_v29 = vpop.eup %6733  ;;  %v650_v14 = vmul.f32 %v6732_v32, %v7745_v58  ;;  %v7956_v32 = vadd.f32 %v435_v37, %v431_v45 }
 0x1fc   :  { %v6736_v43 = vpop.eup %6735  ;;  %6079 = vmatprep.subr.mxu0 %v652_v28  ;;  %v651_v34 = vmul.f32 %v6734_v29, %v7729_v56  ;;  %v429_v29 = vmul.f32 %v425_v33, %v7576_v3 }
 0x1fd   :  { %v6738_v20 = vpop.eup %6737  ;;  %6080 = vmatpush3.msra.mxu0 %v652_v28  ;;  %v434_v18 = vmul.f32 %v6736_v43, %v6726_v38 }
 0x1fe   :  { %v6740_v35 = vpop.eup %6739  ;;  %6081 = vmatprep.subr.mxu0 %v651_v34  ;;  %v649_v36 = vmul.f32 %v6738_v20, %v7757_v60 }
 0x1ff   :  { %v6742_v40 = vpop.eup %6741  ;;  %6082 = vmatpush3.msra.mxu0 %v651_v34  ;;  %v424_v38 = vsub.f32 1.0, %v6740_v35  ;;  %v7967_v28 = vadd.f32 %v434_v18, %v430_v51  ;;  %v6075_v18 = vpop.f32.mrf.mxu1 }
 0x200   :  { %6083 = vmatprep.subr.mxu0 %v650_v14  ;;  %v6744_v50 = vpop.eup %6743  ;;  %v433_v0 = vmul.f32 %v6742_v40, %v6722_v47 }
 0x201   :  { %6084 = vmatpush3.msra.mxu0 %v650_v14  ;;  %v432_v43 = vmul.f32 %v6744_v50, %v6740_v35  ;;  %v428_v34 = vmul.f32 %v424_v38, %v7585_v4  ;;  %v8055_v14 = vld [vmem:[%s10135_s4 + $0x60] sm:$0xff] }
 0x202   :  { %6085 = vmatprep.subr.mxu0 %v649_v36  ;;  %v7979_v47 = vadd.f32 %v433_v0, %v429_v29  ;;  %v543_v42 = vadd.f32 %v8055_v14, %v7880_v44  ;;  %v582_v29 = vpop.f32.mrf.mxu1 }
 0x203   :  { %6086 = vmatpush3.msra.mxu0 %v649_v36  ;;  %v7986_v3 = vadd.f32 %v432_v43, %v428_v34 }
 0x204   :  { %6088 = vmatmul.mubr.msk.f32.vlgmr.msra.gmra.mxu0 %vm105_vm0, %v7954_v19  ;;  %6093 = vmatprep.subr.mxu0 %v7956_v32  ;;  %v5249_v51 = vmul.f32 -1.442695, %v543_v42  ;;  %v6078_v43 = vpop.f32.mrf.mxu1 }
 0x205   :  { %6094 = vmatpush3.msra.mxu0 %v7956_v32  ;;  %6090 = vmatprep.mubr.msk.f32.mxu0 %vm105_vm0, %v7962_v17 }
 0x206   :  { %6095 = vmatprep.subr.mxu0 %v7967_v28 }
 0x207   :  { %6096 = vmatpush3.msra.mxu0 %v7967_v28 }
 0x208   :  { %6091 = vmatmul.mubr.msk.f32.gmra.mxu0 %vm105_vm0, %v7976_v1  ;;  %6097 = vmatprep.subr.mxu0 %v7979_v47 }
 0x209   :  { %6098 = vmatpush3.msra.mxu0 %v7979_v47  ;;  %6101 = vmatprep.mubr.msk.f32.mxu0 %vm105_vm0, %v7570_v2 }
 0x20a   :  { %6099 = vmatprep.subr.mxu0 %v7986_v3 }
 0x20b   :  { %6100 = vmatpush3.msra.mxu0 %v7986_v3 }
 0x20c   :  { %6102 = vmatmul.mubr.msk.f32.vlgmr.msra.gmra.mxu0 %vm105_vm0, %v7592_v5 }
 0x20d   :  { %6104 = vmatprep.mubr.msk.f32.mxu0 %vm105_vm0, %v7598_v6  ;;  %v8024_v6 = vld [vmem:[%s10135_s4 + $0x68] sm:$0xff] }
 0x210   :  { %6105 = vmatmul.mubr.msk.f32.gmra.mxu0 %vm105_vm0, %v7608_v7 }
 0x211   :  { %6107 = vmatprep.mubr.msk.f32.mxu0 %vm105_vm0, %v7613_v8  ;;  %v8031_v8 = vld [vmem:[%s10135_s4 + $0x78] sm:$0xff] }
 0x214   :  { %6108 = vmatmul.mubr.msk.f32.gmra.mxu0 %vm105_vm0, %v7622_v9  ;;  %v8036_v9 = vld [vmem:[%s10135_s4 + $0x70] sm:$0xff] }
 0x215   :  { %6110 = vmatprep.mubr.msk.f32.mxu0 %vm105_vm0, %v7627_v10 }
 0x218   :  { %6111 = vmatmul.mubr.msk.f32.gmra.mxu0 %vm105_vm0, %v7636_v11  ;;  %v548_v11 = vadd.f32 %v7874_v41, %v8024_v6 }
 0x219   :  { %6113 = vmatprep.mubr.msk.f32.mxu0 %vm105_vm0, %v7643_v12  ;;  %v558_v12 = vadd.f32 %v7884_v46, %v8031_v8 }
 0x21a   :  { %v5250_v52 = vmul.f32 -1.442695, %v548_v11 }
 0x21b   :  { %v5252_v20 = vmul.f32 -1.442695, %v558_v12 }
 0x21c   :  { %6114 = vmatmul.mubr.msk.f32.gmra.mxu0 %vm105_vm0, %v7650_v13  ;;  %6745 = vpow2.f32 %v5250_v52  ;;  %v592_v52 = vpop.f32.mrf.mxu1 }
 0x21d   :  { %6116 = vmatprep.mubr.msk.f32.mxu0 %vm105_vm0, %v7664_v15  ;;  %v553_v15 = vadd.f32 %v8036_v9, %v7886_v49  ;;  %6747 = vpow2.f32 %v5252_v20 }
 0x21f   :  { %v5251_v41 = vmul.f32 -1.442695, %v553_v15 }
 0x220   :  { %6117 = vmatmul.mubr.msk.f32.gmra.mxu0 %vm105_vm0, %v7671_v16 }
 0x221   :  { %6167 = vmatprep.mubr.msk.f32.mxu0 %vm105_vm0, %v7833_v31  ;;  %6749 = vpow2.f32 %v5251_v41 }
 0x229   :  { %v6746_v34 = vpop.eup %6745 }
 0x22a   :  { %v614_v15 = vadd.f32 1.0, %v6746_v34 }
 0x2c4   :  { %v8017_v2 = vpop.f32.mrf.mxu0 }
 0x2c6   :  { %v8019_v4 = vpop.f32.mrf.mxu0 }
 0x2c8   :  { %v6092_v5 = vpop.f32.mrf.mxu0 }
 0x2ca   :  { %v8026_v7 = vpop.f32.mrf.mxu0 }
 0x2cc   :  { %v8038_v10 = vpop.f32.mrf.mxu0 }
 0x2ce   :  { %v8044_v13 = vpop.f32.mrf.mxu0 }
 0x2d0   :  { %v8048_v16 = vpop.f32.mrf.mxu0 }
 0x2d2   :  { %v8050_v35 = vpop.f32.mrf.mxu0 }
 0x2d4   :  { %v6109_v37 = vpop.f32.mrf.mxu0 }
 0x2d5   :  { %v866_v46 = vadd.f32 %v6109_v37, %v7686_v21 }
 0x2d6   :  { %v860_v49 = vpop.f32.mrf.mxu0 }
 0x2d7   :  { %v5278_v40 = vmul.f32 -1.442695, %v866_v46  ;;  %v861_v36 = vadd.f32 %v860_v49, %v7691_v23  ;;  %v8066_v23 = vld [vmem:[%s10135_s4 + $0xb8] sm:$0xff]  ;;  %v8077_v46 = vld [vmem:[%s10135_s4 + $0xa8] sm:$0xff] }
 0x2d8   :  { %v6112_v45 = vpop.f32.mrf.mxu0  ;;  %v598_v12 = vadd.f32 %v6078_v43, %v8066_v23 }
 0x2d9   :  { %v5277_v33 = vmul.f32 -1.442695, %v861_v36  ;;  %v876_v50 = vadd.f32 %v6112_v45, %v7697_v26  ;;  %6751 = vpow2.f32 %v5278_v40  ;;  %v6748_v26 = vpop.eup %6747  ;;  %v8083_v45 = vld [vmem:[%s10135_s4 + $0xa0] sm:$0xff] }
 0x2da   :  { %v870_v0 = vpop.f32.mrf.mxu0  ;;  %v6750_v11 = vpop.eup %6749  ;;  %v616_v20 = vadd.f32 1.0, %v6748_v26  ;;  %v753_v49 = vadd.f32 %v6092_v5, %v598_v12  ;;  %v583_v5 = vadd.f32 %v8083_v45, %v582_v29 }
 0x2db   :  { %v5280_v38 = vmul.f32 -1.442695, %v876_v50  ;;  %v871_v21 = vadd.f32 %v870_v0, %v7703_v30  ;;  %6753 = vpow2.f32 %v5277_v33  ;;  %v8072_v30 = vld [vmem:[%s10135_s4 + $0xb0] sm:$0xff]  ;;  %v615_v37 = vadd.f32 1.0, %v6750_v11 }
 0x2dc   :  { %v593_v42 = vadd.f32 %v8072_v30, %v592_v52  ;;  %v750_v11 = vadd.f32 %v8019_v4, %v583_v5 }
 0x2dd   :  { %6755 = vpow2.f32 %v5280_v38  ;;  %v5279_v44 = vmul.f32 -1.442695, %v871_v21 }
 0x2de   :  { %6757 = vpow2.f32 %v5249_v51  ;;  %v588_v51 = vadd.f32 %v6075_v18, %v8077_v46  ;;  %v752_v21 = vadd.f32 %v8026_v7, %v593_v42 }
 0x2df   :  { %6759 = vpow2.f32 %v5279_v44 }
 0x2e0   :  { %6761 = vrcp.f32 %v614_v15  ;;  %v751_v26 = vadd.f32 %v8017_v2, %v588_v51 }
 0x2e1   :  { %6763 = vrcp.f32 %v616_v20 }
 0x2e2   :  { %6765 = vrcp.f32 %v615_v37 }
 0x2e3   :  { %6767 = vtanh.f32 %v753_v49 }
 0x2e6   :  { %v6752_v41 = vpop.eup %6751 }
 0x2e7   :  { %v936_v33 = vadd.f32 1.0, %v6752_v41 }
 0x2e8   :  { %v6754_v40 = vpop.eup %6753 }
 0x2e9   :  { %v935_v44 = vadd.f32 1.0, %v6754_v40 }
 0x2ea   :  { %v6756_v36 = vpop.eup %6755 }
 0x2eb   :  { %v6758_v50 = vpop.eup %6757  ;;  %v938_v0 = vadd.f32 1.0, %v6756_v36 }
 0x2ec   :  { %v6760_v38 = vpop.eup %6759  ;;  %v613_v34 = vadd.f32 1.0, %v6758_v50 }
 0x2ed   :  { %6769 = vrcp.f32 %v938_v0  ;;  %v937_v43 = vadd.f32 1.0, %v6760_v38  ;;  %v6762_v18 = vpop.eup %6761 }
 0x2ee   :  { %6771 = vrcp.f32 %v936_v33  ;;  %v6764_v12 = vpop.eup %6763 }
 0x2ef   :  { %6773 = vrcp.f32 %v937_v43  ;;  %v6766_v7 = vpop.eup %6765  ;;  %v761_v42 = vsub.f32 1.0, %v6764_v12 }
 0x2f0   :  { %6775 = vtanh.f32 %v752_v21  ;;  %v6768_v15 = vpop.eup %6767  ;;  %v760_v33 = vsub.f32 1.0, %v6766_v7  ;;  %v759_v21 = vsub.f32 1.0, %v6762_v18 }
 0x2f1   :  { %6777 = vrcp.f32 %v935_v44  ;;  %v769_v36 = vmul.f32 %v6768_v15, %v6764_v12  ;;  %v765_v0 = vmul.f32 %v7719_v54, %v761_v42 }
 0x2f2   :  { %6779 = vrcp.f32 %v613_v34  ;;  %v764_v43 = vmul.f32 %v7729_v56, %v760_v33  ;;  %v763_v54 = vmul.f32 %v7745_v58, %v759_v21  ;;  %v10216_v58 = vld [vmem:[#allocation6_spill] sm:$0xff] }
 0x2f3   :  { %6781 = vtanh.f32 %v751_v26  ;;  %v8095_v44 = vadd.f32 %v769_v36, %v765_v0 }
 0x2f4   :  { %6783 = vtanh.f32 %v750_v11 }
 0x2fa   :  { %v6770_v29 = vpop.eup %6769 }
 0x2fb   :  { %v6772_v52 = vpop.eup %6771  ;;  %v950_v20 = vmul.f32 %v6770_v29, %v7956_v32 }
 0x2fc   :  { %v6774_v41 = vpop.eup %6773  ;;  %v948_v40 = vmul.f32 %v6772_v52, %v7979_v47  ;;  %v10221_v52 = vld [vmem:[#allocation10_spill] sm:$0xff] }
 0x2fd   :  { %v6776_v37 = vpop.eup %6775  ;;  %6119 = vmatprep.subr.mxu1 %v950_v20  ;;  %v949_v2 = vmul.f32 %v6774_v41, %v7967_v28 }
 0x2fe   :  { %v6778_v49 = vpop.eup %6777  ;;  %6120 = vmatpush3.msra.mxu1 %v950_v20  ;;  %v768_v38 = vmul.f32 %v6776_v37, %v6766_v7  ;;  %v10220_v7 = vld [vmem:[#allocation9_spill] sm:$0xff]  ;;  %v851_v20 = vadd.f32 %v8050_v35, %v10221_v52 }
 0x2ff   :  { %v6780_v4 = vpop.eup %6779  ;;  %6121 = vmatprep.subr.mxu1 %v949_v2  ;;  %v947_v51 = vmul.f32 %v6778_v49, %v7986_v3  ;;  %v856_v15 = vadd.f32 %v8048_v16, %v10220_v7 }
 0x300   :  { %v6782_v50 = vpop.eup %6781  ;;  %6122 = vmatpush3.msra.mxu1 %v949_v2  ;;  %v758_v26 = vsub.f32 1.0, %v6780_v4  ;;  %v8101_v11 = vadd.f32 %v768_v38, %v764_v43  ;;  %v5275_v49 = vmul.f32 -1.442695, %v851_v20  ;;  %v6115_v38 = vpop.f32.mrf.mxu0 }
 0x301   :  { %6123 = vmatprep.subr.mxu1 %v948_v40  ;;  %v6784_v5 = vpop.eup %6783  ;;  %v767_v34 = vmul.f32 %v6782_v50, %v6762_v18  ;;  %v5276_v2 = vmul.f32 -1.442695, %v856_v15 }
 0x302   :  { %6124 = vmatpush3.msra.mxu1 %v948_v40  ;;  %v766_v12 = vmul.f32 %v6784_v5, %v6780_v4  ;;  %v762_v18 = vmul.f32 %v7757_v60, %v758_v26  ;;  %v10218_v60 = vld [vmem:[#allocation3_spill] sm:$0xff]  ;;  %v10225_v5 = vld [vmem:[#allocation14_spill] sm:$0xff] }
 0x303   :  { %6125 = vmatprep.subr.mxu1 %v947_v51  ;;  %v8108_v56 = vadd.f32 %v767_v34, %v763_v54  ;;  %v10222_v40 = vld [vmem:[#allocation11_spill] sm:$0xff] }
 0x304   :  { %6126 = vmatpush3.msra.mxu1 %v947_v51  ;;  %v10224_v51 = vld [vmem:[#allocation13_spill] sm:$0xff] }
 0x305   :  { %6128 = vmatmul.mubr.msk.f32.vlgmr.msra.gmra.mxu1 %vm105_vm0, %v7714_v53  ;;  %6133 = vmatprep.subr.mxu1 %v8095_v44  ;;  %v8115_v53 = vadd.f32 %v766_v12, %v762_v18  ;;  %v10226_v12 = vld [vmem:[#allocation15_spill] sm:$0xff] }
 0x306   :  { %6134 = vmatpush3.msra.mxu1 %v8095_v44  ;;  %6130 = vmatprep.mubr.msk.f32.mxu1 %vm105_vm0, %v7724_v55  ;;  %v10214_v55 = vld [vmem:[#allocation4_spill] sm:$0xff] }
 0x307   :  { %6135 = vmatprep.subr.mxu1 %v8101_v11 }
 0x308   :  { %6136 = vmatpush3.msra.mxu1 %v8101_v11 }
 0x309   :  { %6131 = vmatmul.mubr.msk.f32.gmra.mxu1 %vm105_vm0, %v7740_v57  ;;  %6137 = vmatprep.subr.mxu1 %v8108_v56  ;;  %v10215_v57 = vld [vmem:[#allocation5_spill] sm:$0xff] }
 0x30a   :  { %6138 = vmatpush3.msra.mxu1 %v8108_v56  ;;  %6141 = vmatprep.mubr.msk.f32.mxu1 %vm105_vm0, %v7751_v59  ;;  %v10217_v59 = vld [vmem:[#allocation7_spill] sm:$0xff] }
 0x30b   :  { %6139 = vmatprep.subr.mxu1 %v8115_v53 }
 0x30c   :  { %6140 = vmatpush3.msra.mxu1 %v8115_v53 }
 0x30d   :  { %6142 = vmatmul.mubr.msk.f32.vlgmr.msra.gmra.mxu1 %vm105_vm0, %v7768_v61 }
 0x30e   :  { %6144 = vmatprep.mubr.msk.f32.mxu1 %vm105_vm0, %v7774_v62 }
 0x311   :  { %6145 = vmatmul.mubr.msk.f32.gmra.mxu1 %vm105_vm0, %v7784_v63 }
 0x312   :  { %6147 = vmatprep.mubr.msk.f32.mxu1 %vm105_vm0, %v7789_v22 }
 0x315   :  { %6148 = vmatmul.mubr.msk.f32.gmra.mxu1 %vm105_vm0, %v7798_v24 }
 0x316   :  { %6150 = vmatprep.mubr.msk.f32.mxu1 %vm105_vm0, %v7803_v25  ;;  %v10219_v25 = vld [vmem:[#allocation8_spill] sm:$0xff] }
 0x319   :  { %6151 = vmatmul.mubr.msk.f32.gmra.mxu1 %vm105_vm0, %v7812_v27  ;;  %v846_v27 = vadd.f32 %v8038_v10, %v10219_v25  ;;  %v10223_v10 = vld [vmem:[#allocation12_spill] sm:$0xff] }
 0x31a   :  { %6153 = vmatprep.mubr.msk.f32.mxu1 %vm105_vm0, %v10214_v55  ;;  %v841_v33 = vadd.f32 %v8044_v13, %v10223_v10  ;;  %v880_v55 = vpop.f32.mrf.mxu0  ;;  %v10227_v25 = vld [vmem:[#allocation16_spill] sm:$0xff] }
 0x31b   :  { %v5274_v37 = vmul.f32 -1.442695, %v846_v27 }
 0x31c   :  { %v5273_v34 = vmul.f32 -1.442695, %v841_v33 }
 0x31d   :  { %6154 = vmatmul.mubr.msk.f32.gmra.mxu1 %vm105_vm0, %v10215_v57  ;;  %6785 = vpow2.f32 %v5274_v37  ;;  %v6118_v57 = vpop.f32.mrf.mxu0 }
 0x31e   :  { %6156 = vmatprep.mubr.msk.f32.mxu1 %vm105_vm0, %v10216_v58  ;;  %6787 = vpow2.f32 %v5276_v2  ;;  %v896_v27 = vadd.f32 %v6118_v57, %v10227_v25  ;;  %v10228_v2 = vld [vmem:[#allocation17_spill] sm:$0xff] }
 0x31f   :  { %6789 = vpow2.f32 %v5275_v49  ;;  %v890_v15 = vpop.f32.mrf.mxu0 }
 0x320   :  { %v891_v49 = vadd.f32 %v890_v15, %v10228_v2 }
 0x321   :  { %6157 = vmatmul.mubr.msk.f32.gmra.mxu1 %vm105_vm0, %v10217_v59 }
 0x322   :  { %6207 = vmatprep.mubr.msk.f32.mxu1 %vm105_vm0, %v10218_v60 }
 0x32a   :  { %v6786_v58 = vpop.eup %6785 }
 0x32b   :  { %v6788_v59 = vpop.eup %6787  ;;  %v912_v7 = vadd.f32 1.0, %v6786_v58 }
 0x32c   :  { %v6790_v60 = vpop.eup %6789  ;;  %v914_v52 = vadd.f32 1.0, %v6788_v59 }
 0x32d   :  { %v913_v37 = vadd.f32 1.0, %v6790_v60 }
 0x3c5   :  { %v8146_v61 = vpop.f32.mrf.mxu1 }
 0x3c7   :  { %v8148_v62 = vpop.f32.mrf.mxu1 }
 0x3c9   :  { %v6132_v63 = vpop.f32.mrf.mxu1 }
 0x3cb   :  { %v1027_v22 = vpop.f32.mrf.mxu1 }
 0x3cd   :  { %v8150_v24 = vpop.f32.mrf.mxu1 }
 0x3cf   :  { %v8156_v29 = vpop.f32.mrf.mxu1 }
 0x3d1   :  { %v8160_v41 = vpop.f32.mrf.mxu1 }
 0x3d3   :  { %v8162_v42 = vpop.f32.mrf.mxu1 }
 0x3d5   :  { %v6149_v4 = vpop.f32.mrf.mxu1 }
 0x3d6   :  { %v1152_v36 = vadd.f32 %v6149_v4, %v10222_v40  ;;  %v1039_v4 = vadd.f32 %v6132_v63, %v896_v27 }
 0x3d7   :  { %v1146_v16 = vpop.f32.mrf.mxu1 }
 0x3d8   :  { %v5302_v50 = vmul.f32 -1.442695, %v1152_v36  ;;  %v1147_v35 = vadd.f32 %v10224_v51, %v1146_v16  ;;  %v886_v16 = vadd.f32 %v6115_v38, %v7933_v48 }
 0x3d9   :  { %v6152_v0 = vpop.f32.mrf.mxu1 }
 0x3da   :  { %v5301_v21 = vmul.f32 -1.442695, %v1147_v35  ;;  %v1162_v43 = vadd.f32 %v6152_v0, %v10225_v5  ;;  %6791 = vpow2.f32 %v5302_v50  ;;  %v1038_v35 = vadd.f32 %v1027_v22, %v891_v49 }
 0x3db   :  { %v1156_v26 = vpop.f32.mrf.mxu1  ;;  %v881_v0 = vadd.f32 %v880_v55, %v7939_v39  ;;  %v1037_v63 = vadd.f32 %v8146_v61, %v886_v16  ;;  %v8244_v16 = vld [vmem:[%s10133_s3 + $0x28] sm:$0xff] }
 0x3dc   :  { %v5304_v54 = vmul.f32 -1.442695, %v1162_v43  ;;  %v1157_v18 = vadd.f32 %v10226_v12, %v1156_v26  ;;  %6793 = vpow2.f32 %v5301_v21 }
 0x3de   :  { %6795 = vpow2.f32 %v5304_v54  ;;  %v5303_v13 = vmul.f32 -1.442695, %v1157_v18 }
 0x3df   :  { %6797 = vpow2.f32 %v5273_v34  ;;  %v1036_v34 = vadd.f32 %v8148_v62, %v881_v0  ;;  %v8272_v0 = vld [vmem:[%s10133_s3 + $0x48] sm:$0xff] }
 0x3e0   :  { %6799 = vpow2.f32 %v5303_v13 }
 0x3e1   :  { %6801 = vrcp.f32 %v912_v7 }
 0x3e2   :  { %6803 = vrcp.f32 %v914_v52 }
 0x3e3   :  { %6805 = vrcp.f32 %v913_v37 }
 0x3e4   :  { %6807 = vtanh.f32 %v1039_v4 }
 0x3e7   :  { %v6792_v20 = vpop.eup %6791 }
 0x3e8   :  { %v1222_v10 = vadd.f32 1.0, %v6792_v20 }
 0x3e9   :  { %v6794_v40 = vpop.eup %6793 }
 0x3ea   :  { %v1221_v21 = vadd.f32 1.0, %v6794_v40 }
 0x3eb   :  { %v6796_v36 = vpop.eup %6795 }
 0x3ec   :  { %v6798_v33 = vpop.eup %6797  ;;  %v1224_v50 = vadd.f32 1.0, %v6796_v36 }
 0x3ed   :  { %v6800_v51 = vpop.eup %6799  ;;  %v911_v43 = vadd.f32 1.0, %v6798_v33  ;;  %v8237_v33 = vld [vmem:[%s10133_s3 + $0x20] sm:$0xff] }
 0x3ee   :  { %6809 = vrcp.f32 %v1224_v50  ;;  %v1223_v5 = vadd.f32 1.0, %v6800_v51  ;;  %v6802_v48 = vpop.eup %6801  ;;  %v8251_v50 = vld [vmem:[%s10133_s3 + $0x30] sm:$0xff]  ;;  %v8258_v51 = vld [vmem:[%s10133_s3 + $0x38] sm:$0xff] }
 0x3ef   :  { %6811 = vrcp.f32 %v1222_v10  ;;  %v6804_v38 = vpop.eup %6803  ;;  %v1045_v52 = vsub.f32 1.0, %v6802_v48 }
 0x3f0   :  { %6813 = vrcp.f32 %v1223_v5  ;;  %v6806_v22 = vpop.eup %6805  ;;  %v1047_v13 = vsub.f32 1.0, %v6804_v38  ;;  %v8286_v5 = vld [vmem:[%s10133_s3 + $0x58] sm:$0xff] }
 0x3f1   :  { %6815 = vtanh.f32 %v1038_v35  ;;  %v6808_v26 = vpop.eup %6807  ;;  %v1046_v60 = vsub.f32 1.0, %v6806_v22  ;;  %v8265_v35 = vld [vmem:[%s10133_s3 + $0x40] sm:$0xff] }
 0x3f2   :  { %6817 = vrcp.f32 %v1221_v21  ;;  %v1055_v59 = vmul.f32 %v6808_v26, %v6804_v38  ;;  %v1051_v7 = vmul.f32 %v1047_v13, %v7956_v32  ;;  %v1049_v32 = vmul.f32 %v1045_v52, %v7979_v47  ;;  %v8223_v47 = vld [vmem:[%s10133_s3 + $0x10] sm:$0xff] }
 0x3f3   :  { %6819 = vrcp.f32 %v911_v43  ;;  %v1050_v2 = vmul.f32 %v1046_v60, %v7967_v28  ;;  %v8279_v21 = vld [vmem:[%s10133_s3 + $0x50] sm:$0xff]  ;;  %v1142_v26 = vadd.f32 %v8160_v41, %v8031_v8  ;;  %v8327_v60 = vld [vmem:[%s10135_s4 + $0x38] sm:$0xff] }
 0x3f4   :  { %6821 = vtanh.f32 %v1037_v63  ;;  %v8181_v37 = vadd.f32 %v1055_v59, %v1051_v7  ;;  %v8333_v7 = vld [vmem:[%s10135_s4 + $0x30] sm:$0xff] }
 0x3f5   :  { %6823 = vtanh.f32 %v1036_v34 }
 0x3fb   :  { %v6810_v39 = vpop.eup %6809 }
 0x3fc   :  { %v6812_v54 = vpop.eup %6811  ;;  %v1236_v12 = vmul.f32 %v6810_v39, %v8095_v44 }
 0x3fd   :  { %v6814_v18 = vpop.eup %6813  ;;  %v1234_v58 = vmul.f32 %v6812_v54, %v8108_v56  ;;  %v1137_v54 = vadd.f32 %v8036_v9, %v8162_v42  ;;  %v8321_v42 = vld [vmem:[%s10135_s4 + $0x20] sm:$0xff] }
 0x3fe   :  { %v6816_v55 = vpop.eup %6815  ;;  %6159 = vmatprep.subr.mxu0 %v1236_v12  ;;  %v1235_v61 = vmul.f32 %v6814_v18, %v8101_v11  ;;  %v5300_v18 = vmul.f32 -1.442695, %v1142_v26 }
 0x3ff   :  { %v6818_v57 = vpop.eup %6817  ;;  %6160 = vmatpush3.msra.mxu0 %v1236_v12  ;;  %v1054_v15 = vmul.f32 %v6816_v55, %v6806_v22  ;;  %v1132_v22 = vadd.f32 %v8150_v24, %v8024_v6  ;;  %v8313_v6 = vld [vmem:[%s10135_s4 + $0x28] sm:$0xff]  ;;  %v1127_v24 = vadd.f32 %v8055_v14, %v8156_v29 }
 0x400   :  { %v6820_v62 = vpop.eup %6819  ;;  %6161 = vmatprep.subr.mxu0 %v1235_v61  ;;  %v1233_v27 = vmul.f32 %v6818_v57, %v8115_v53 }
 0x401   :  { %v6822_v25 = vpop.eup %6821  ;;  %6162 = vmatpush3.msra.mxu0 %v1235_v61  ;;  %v1044_v4 = vsub.f32 1.0, %v6820_v62  ;;  %v8187_v40 = vadd.f32 %v1054_v15, %v1050_v2  ;;  %v5298_v12 = vmul.f32 -1.442695, %v1132_v22  ;;  %v5299_v61 = vmul.f32 -1.442695, %v1137_v54 }
 0x402   :  { %6163 = vmatprep.subr.mxu0 %v1234_v58  ;;  %v6824_v20 = vpop.eup %6823  ;;  %v1053_v49 = vmul.f32 %v6822_v25, %v6802_v48  ;;  %v5297_v29 = vmul.f32 -1.442695, %v1127_v24 }
 0x403   :  { %6164 = vmatpush3.msra.mxu0 %v1234_v58  ;;  %v1052_v36 = vmul.f32 %v6824_v20, %v6820_v62  ;;  %v1048_v10 = vmul.f32 %v1044_v4, %v7986_v3  ;;  %v8230_v3 = vld [vmem:[%s10133_s3 + $0x18] sm:$0xff]  ;;  %6825 = vpow2.f32 %v5298_v12  ;;  %v6155_v58 = vpop.f32.mrf.mxu1 }
 0x404   :  { %6165 = vmatprep.subr.mxu0 %v1233_v27  ;;  %v8194_v28 = vadd.f32 %v1053_v49, %v1049_v32  ;;  %6827 = vpow2.f32 %v5300_v18 }
 0x405   :  { %6166 = vmatpush3.msra.mxu0 %v1233_v27  ;;  %6829 = vpow2.f32 %v5299_v61  ;;  %v1166_v52 = vpop.f32.mrf.mxu1 }
 0x406   :  { %6168 = vmatmul.mubr.msk.f32.vlgmr.msra.gmra.mxu0 %vm105_vm0, %v7954_v19  ;;  %6173 = vmatprep.subr.mxu0 %v8181_v37  ;;  %v8201_v19 = vadd.f32 %v1052_v36, %v1048_v10 }
 0x407   :  { %6174 = vmatpush3.msra.mxu0 %v8181_v37  ;;  %6170 = vmatprep.mubr.msk.f32.mxu0 %vm105_vm0, %v7962_v17  ;;  %v8207_v17 = vld [vmem:[%s10133_s3] sm:$0xff]  ;;  %v6158_v2 = vpop.f32.mrf.mxu1 }
 0x408   :  { %6175 = vmatprep.subr.mxu0 %v8187_v40  ;;  %v1182_v36 = vadd.f32 %v6158_v2, %v8066_v23 }
 0x409   :  { %6176 = vmatpush3.msra.mxu0 %v8187_v40  ;;  %v1176_v22 = vpop.f32.mrf.mxu1 }
 0x40a   :  { %6171 = vmatmul.mubr.msk.f32.gmra.mxu0 %vm105_vm0, %v7976_v1  ;;  %6177 = vmatprep.subr.mxu0 %v8194_v28  ;;  %v8216_v1 = vld [vmem:[%s10133_s3 + $0x8] sm:$0xff]  ;;  %v1177_v18 = vadd.f32 %v8072_v30, %v1176_v22 }
 0x40b   :  { %6178 = vmatpush3.msra.mxu0 %v8194_v28  ;;  %6181 = vmatprep.mubr.msk.f32.mxu0 %vm105_vm0, %v8207_v17 }
 0x40c   :  { %6179 = vmatprep.subr.mxu0 %v8201_v19 }
 0x40d   :  { %6180 = vmatpush3.msra.mxu0 %v8201_v19 }
 0x40e   :  { %6182 = vmatmul.mubr.msk.f32.vlgmr.msra.gmra.mxu0 %vm105_vm0, %v8216_v1 }
 0x40f   :  { %6184 = vmatprep.mubr.msk.f32.mxu0 %vm105_vm0, %v8223_v47 }
 0x410   :  { %v6826_v49 = vpop.eup %6825 }
 0x411   :  { %v6828_v4 = vpop.eup %6827  ;;  %v1198_v10 = vadd.f32 1.0, %v6826_v49 }
 0x412   :  { %6185 = vmatmul.mubr.msk.f32.gmra.mxu0 %vm105_vm0, %v8230_v3  ;;  %v6830_v32 = vpop.eup %6829  ;;  %v1200_v26 = vadd.f32 1.0, %v6828_v4 }
 0x413   :  { %6187 = vmatprep.mubr.msk.f32.mxu0 %vm105_vm0, %v8237_v33  ;;  %v1199_v12 = vadd.f32 1.0, %v6830_v32 }
 0x416   :  { %6188 = vmatmul.mubr.msk.f32.gmra.mxu0 %vm105_vm0, %v8244_v16 }
 0x417   :  { %6190 = vmatprep.mubr.msk.f32.mxu0 %vm105_vm0, %v8251_v50 }
 0x41a   :  { %6191 = vmatmul.mubr.msk.f32.gmra.mxu0 %vm105_vm0, %v8258_v51 }
 0x41b   :  { %6193 = vmatprep.mubr.msk.f32.mxu0 %vm105_vm0, %v8265_v35 }
 0x41e   :  { %6194 = vmatmul.mubr.msk.f32.gmra.mxu0 %vm105_vm0, %v8272_v0 }
 0x41f   :  { %6196 = vmatprep.mubr.msk.f32.mxu0 %vm105_vm0, %v8279_v21 }
 0x422   :  { %6197 = vmatmul.mubr.msk.f32.gmra.mxu0 %vm105_vm0, %v8286_v5 }
 0x423   :  { %6247 = vmatprep.mubr.msk.f32.mxu0 %vm105_vm0, %v7833_v31 }
 0x4c6   :  { %v8292_v43 = vpop.f32.mrf.mxu0 }
 0x4c8   :  { %v8294_v63 = vpop.f32.mrf.mxu0 }
 0x4ca   :  { %v6172_v34 = vpop.f32.mrf.mxu0 }
 0x4cb   :  { %v1325_v61 = vadd.f32 %v6172_v34, %v1182_v36 }
 0x4cc   :  { %v1313_v48 = vpop.f32.mrf.mxu0 }
 0x4cd   :  { %v1324_v23 = vadd.f32 %v1313_v48, %v1177_v18 }
 0x4ce   :  { %v8296_v38 = vpop.f32.mrf.mxu0 }
 0x4d0   :  { %v8302_v39 = vpop.f32.mrf.mxu0 }
 0x4d2   :  { %v8306_v31 = vpop.f32.mrf.mxu0 }
 0x4d4   :  { %v8308_v55 = vpop.f32.mrf.mxu0 }
 0x4d6   :  { %v6189_v13 = vpop.f32.mrf.mxu0 }
 0x4d7   :  { %v1438_v8 = vadd.f32 %v8313_v6, %v6189_v13 }
 0x4d8   :  { %v1432_v9 = vpop.f32.mrf.mxu0 }
 0x4d9   :  { %v5326_v41 = vmul.f32 -1.442695, %v1438_v8  ;;  %v1433_v57 = vadd.f32 %v8321_v42, %v1432_v9 }
 0x4da   :  { %v6192_v62 = vpop.f32.mrf.mxu0 }
 0x4db   :  { %v5325_v59 = vmul.f32 -1.442695, %v1433_v57  ;;  %v1448_v14 = vadd.f32 %v8327_v60, %v6192_v62  ;;  %6831 = vpow2.f32 %v5326_v41  ;;  %v1172_v41 = vadd.f32 %v6155_v58, %v8077_v46 }
 0x4dc   :  { %v1442_v25 = vpop.f32.mrf.mxu0 }
 0x4dd   :  { %v5328_v27 = vmul.f32 -1.442695, %v1448_v14  ;;  %v1443_v15 = vadd.f32 %v8333_v7, %v1442_v25  ;;  %6833 = vpow2.f32 %v5325_v59  ;;  %v1167_v59 = vadd.f32 %v8083_v45, %v1166_v52 }
 0x4de   :  { %v1323_v34 = vadd.f32 %v8292_v43, %v1172_v41  ;;  %v8353_v41 = vld [vmem:[%s10134_s5 + $0x8] sm:$0xff] }
 0x4df   :  { %6835 = vpow2.f32 %v5328_v27  ;;  %v5327_v20 = vmul.f32 -1.442695, %v1443_v15  ;;  %v1322_v25 = vadd.f32 %v8294_v63, %v1167_v59 }
 0x4e0   :  { %6837 = vpow2.f32 %v5297_v29 }
 0x4e1   :  { %6839 = vpow2.f32 %v5327_v20 }
 0x4e2   :  { %6841 = vrcp.f32 %v1198_v10 }
 0x4e3   :  { %6843 = vrcp.f32 %v1200_v26 }
 0x4e4   :  { %6845 = vrcp.f32 %v1199_v12 }
 0x4e5   :  { %6847 = vtanh.f32 %v1325_v61 }
 0x4e8   :  { %v6832_v54 = vpop.eup %6831 }
 0x4e9   :  { %v1508_v24 = vadd.f32 1.0, %v6832_v54 }
 0x4ea   :  { %v6834_v13 = vpop.eup %6833 }
 0x4eb   :  { %v1507_v14 = vadd.f32 1.0, %v6834_v13 }
 0x4ec   :  { %v6836_v8 = vpop.eup %6835 }
 0x4ed   :  { %v6838_v9 = vpop.eup %6837  ;;  %v1510_v57 = vadd.f32 1.0, %v6836_v8 }
 0x4ee   :  { %v6840_v62 = vpop.eup %6839  ;;  %v1197_v30 = vadd.f32 1.0, %v6838_v9 }
 0x4ef   :  { %6849 = vrcp.f32 %v1510_v57  ;;  %v1509_v29 = vadd.f32 1.0, %v6840_v62  ;;  %v6842_v46 = vpop.eup %6841 }
 0x4f0   :  { %6851 = vrcp.f32 %v1508_v24  ;;  %v6844_v58 = vpop.eup %6843  ;;  %v1331_v18 = vsub.f32 1.0, %v6842_v46 }
 0x4f1   :  { %6853 = vrcp.f32 %v1509_v29  ;;  %v6846_v48 = vpop.eup %6845  ;;  %v1333_v49 = vsub.f32 1.0, %v6844_v58  ;;  %v8397_v29 = vld [vmem:[%s10133_s3 + $0x68] sm:$0xff] }
 0x4f2   :  { %6855 = vtanh.f32 %v1324_v23  ;;  %v6848_v27 = vpop.eup %6847  ;;  %v1332_v10 = vsub.f32 1.0, %v6846_v48  ;;  %v1335_v57 = vmul.f32 %v1331_v18, %v8108_v56  ;;  %v8377_v56 = vld [vmem:[%s10134_s5 + $0x18] sm:$0xff] }
 0x4f3   :  { %6857 = vrcp.f32 %v1507_v14  ;;  %v1341_v36 = vmul.f32 %v6848_v27, %v6844_v58  ;;  %v1337_v54 = vmul.f32 %v1333_v49, %v8095_v44  ;;  %v8432_v58 = vld [vmem:[%s10133_s3 + $0x90] sm:$0xff]  ;;  %v8446_v27 = vld [vmem:[%s10133_s3 + $0xa0] sm:$0xff] }
 0x4f4   :  { %6859 = vrcp.f32 %v1197_v30  ;;  %v1336_v8 = vmul.f32 %v1332_v10, %v8101_v11  ;;  %v8365_v11 = vld [vmem:[%s10134_s5 + $0x10] sm:$0xff]  ;;  %v8496_v10 = vld [vmem:[%s10135_s4 + $0x18] sm:$0xff] }
 0x4f5   :  { %6861 = vtanh.f32 %v1323_v34  ;;  %v8347_v13 = vadd.f32 %v1341_v36, %v1337_v54  ;;  %v8404_v30 = vld [vmem:[%s10133_s3 + $0x70] sm:$0xff]  ;;  %v8411_v34 = vld [vmem:[%s10133_s3 + $0x78] sm:$0xff]  ;;  %10234 = vst [vmem:[#allocation8_spill] sm:$0xff] %v8496_v10 }
 0x4f6   :  { %6863 = vtanh.f32 %v1322_v25  ;;  %v8418_v25 = vld [vmem:[%s10133_s3 + $0x80] sm:$0xff]  ;;  %v8505_v54 = vld [vmem:[%s10135_s4 + $0x10] sm:$0xff] }
 0x4f7   :  { %10235 = vst [vmem:[#allocation9_spill] sm:$0xff] %v8505_v54 }
 0x4fc   :  { %v6850_v45 = vpop.eup %6849 }
 0x4fd   :  { %v6852_v15 = vpop.eup %6851  ;;  %v1522_v52 = vmul.f32 %v6850_v45, %v8181_v37  ;;  %v8453_v45 = vld [vmem:[%s10133_s3 + $0xa8] sm:$0xff] }
 0x4fe   :  { %v6854_v20 = vpop.eup %6853  ;;  %v1520_v32 = vmul.f32 %v6852_v15, %v8194_v28  ;;  %10229 = vst [vmem:[#allocation4_spill] sm:$0xff] %v8453_v45  ;;  %v8460_v15 = vld [vmem:[%s10133_s3 + $0xb0] sm:$0xff] }
 0x4ff   :  { %v6856_v2 = vpop.eup %6855  ;;  %6199 = vmatprep.subr.mxu1 %v1522_v52  ;;  %v1521_v43 = vmul.f32 %v6854_v20, %v8187_v40  ;;  %10230 = vst [vmem:[#allocation5_spill] sm:$0xff] %v8460_v15  ;;  %v8474_v20 = vld [vmem:[%s10134_s5] sm:$0xff] }
 0x500   :  { %v6858_v4 = vpop.eup %6857  ;;  %6200 = vmatpush3.msra.mxu1 %v1522_v52  ;;  %v1340_v12 = vmul.f32 %v6856_v2, %v6846_v48  ;;  %v8439_v48 = vld [vmem:[%s10133_s3 + $0x98] sm:$0xff]  ;;  %10232 = vst [vmem:[#allocation7_spill] sm:$0xff] %v8474_v20 }
 0x501   :  { %v6860_v63 = vpop.eup %6859  ;;  %6201 = vmatprep.subr.mxu1 %v1521_v43  ;;  %v1519_v26 = vmul.f32 %v6858_v4, %v8201_v19  ;;  %v8467_v52 = vld [vmem:[%s10133_s3 + $0xb8] sm:$0xff] }
 0x502   :  { %v6862_v22 = vpop.eup %6861  ;;  %6202 = vmatpush3.msra.mxu1 %v1521_v43  ;;  %v1330_v9 = vsub.f32 1.0, %v6860_v63  ;;  %v8358_v44 = vadd.f32 %v1340_v12, %v1336_v8  ;;  %10231 = vst [vmem:[#allocation6_spill] sm:$0xff] %v8467_v52  ;;  %v1423_v12 = vadd.f32 %v8505_v54, %v8308_v55  ;;  %v8522_v55 = vld [vmem:[%s10135_s4] sm:$0xff]  ;;  %v8535_v54 = vld [vmem:[%s10135_s4 + $0x98] sm:$0xff] }
 0x503   :  { %6203 = vmatprep.subr.mxu1 %v1520_v32  ;;  %v6864_v61 = vpop.eup %6863  ;;  %v1339_v24 = vmul.f32 %v6862_v22, %v6842_v46  ;;  %v8425_v46 = vld [vmem:[%s10133_s3 + $0x88] sm:$0xff]  ;;  %v1428_v22 = vadd.f32 %v8496_v10, %v8306_v31  ;;  %10237 = vst [vmem:[#allocation11_spill] sm:$0xff] %v8522_v55  ;;  %10239 = vst [vmem:[#allocation13_spill] sm:$0xff] %v8535_v54 }
 0x504   :  { %6204 = vmatpush3.msra.mxu1 %v1520_v32  ;;  %v1338_v62 = vmul.f32 %v6864_v61, %v6860_v63  ;;  %v1334_v59 = vmul.f32 %v1330_v9, %v8115_v53  ;;  %v8388_v53 = vld [vmem:[%s10133_s3 + $0x60] sm:$0xff]  ;;  %v8489_v32 = vld [vmem:[%s10135_s4 + $0x8] sm:$0xff] }
 0x505   :  { %6205 = vmatprep.subr.mxu1 %v1519_v26  ;;  %v8370_v23 = vadd.f32 %v1339_v24, %v1335_v57  ;;  %10233 = vst [vmem:[#allocation3_spill] sm:$0xff] %v8489_v32  ;;  %v1418_v36 = vadd.f32 %v8489_v32, %v8296_v38  ;;  %v5324_v61 = vmul.f32 -1.442695, %v1428_v22  ;;  %v5323_v24 = vmul.f32 -1.442695, %v1423_v12  ;;  %v8516_v31 = vld [vmem:[%s10135_s4 + $0x88] sm:$0xff] }
 0x506   :  { %6206 = vmatpush3.msra.mxu1 %v1519_v26  ;;  %v8382_v14 = vadd.f32 %v1338_v62, %v1334_v59  ;;  %10236 = vst [vmem:[#allocation10_spill] sm:$0xff] %v8516_v31  ;;  %v1413_v62 = vadd.f32 %v8522_v55, %v8302_v39  ;;  %v8529_v22 = vld [vmem:[%s10135_s4 + $0x80] sm:$0xff]  ;;  %v8541_v55 = vld [vmem:[%s10135_s4 + $0x90] sm:$0xff] }
 0x507   :  { %6208 = vmatmul.mubr.msk.f32.vlgmr.msra.gmra.mxu1 %vm105_vm0, %v8353_v41  ;;  %6213 = vmatprep.subr.mxu1 %v8347_v13  ;;  %v5322_v38 = vmul.f32 -1.442695, %v1418_v36  ;;  %10238 = vst [vmem:[#allocation12_spill] sm:$0xff] %v8529_v22  ;;  %10240 = vst [vmem:[#allocation14_spill] sm:$0xff] %v8541_v55 }
 0x508   :  { %6214 = vmatpush3.msra.mxu1 %v8347_v13  ;;  %6210 = vmatprep.mubr.msk.f32.mxu1 %vm105_vm0, %v8365_v11 }
 0x509   :  { %6215 = vmatprep.subr.mxu1 %v8358_v44  ;;  %6865 = vpow2.f32 %v5322_v38 }
 0x50a   :  { %6216 = vmatpush3.msra.mxu1 %v8358_v44  ;;  %6867 = vpow2.f32 %v5324_v61  ;;  %v5321_v61 = vmul.f32 -1.442695, %v1413_v62 }
 0x50b   :  { %6211 = vmatmul.mubr.msk.f32.gmra.mxu1 %vm105_vm0, %v8377_v56  ;;  %6217 = vmatprep.subr.mxu1 %v8370_v23  ;;  %6869 = vpow2.f32 %v5323_v24 }
 0x50c   :  { %6218 = vmatpush3.msra.mxu1 %v8370_v23  ;;  %6221 = vmatprep.mubr.msk.f32.mxu1 %vm105_vm0, %v8388_v53 }
 0x50d   :  { %6219 = vmatprep.subr.mxu1 %v8382_v14 }
 0x50e   :  { %6220 = vmatpush3.msra.mxu1 %v8382_v14 }
 0x50f   :  { %6222 = vmatmul.mubr.msk.f32.vlgmr.msra.gmra.mxu1 %vm105_vm0, %v8397_v29 }
 0x510   :  { %6224 = vmatprep.mubr.msk.f32.mxu1 %vm105_vm0, %v8404_v30 }
 0x513   :  { %6225 = vmatmul.mubr.msk.f32.gmra.mxu1 %vm105_vm0, %v8411_v34 }
 0x514   :  { %6227 = vmatprep.mubr.msk.f32.mxu1 %vm105_vm0, %v8418_v25 }
 0x516   :  { %v6866_v32 = vpop.eup %6865 }
 0x517   :  { %6228 = vmatmul.mubr.msk.f32.gmra.mxu1 %vm105_vm0, %v8425_v46 }
 0x518   :  { %6230 = vmatprep.mubr.msk.f32.mxu1 %vm105_vm0, %v8432_v58 }
 0x51b   :  { %6231 = vmatmul.mubr.msk.f32.gmra.mxu1 %vm105_vm0, %v8439_v48 }
 0x51c   :  { %6233 = vmatprep.mubr.msk.f32.mxu1 %vm105_vm0, %v8446_v27 }
 0x51f   :  { %6234 = vmatmul.mubr.msk.f32.gmra.mxu1 %vm105_vm0, %v8453_v45 }
 0x520   :  { %6236 = vmatprep.mubr.msk.f32.mxu1 %vm105_vm0, %v8460_v15 }
 0x523   :  { %6237 = vmatmul.mubr.msk.f32.gmra.mxu1 %vm105_vm0, %v8467_v52 }
 0x524   :  { %6287 = vmatprep.mubr.msk.f32.mxu1 %vm105_vm0, %v8474_v20 }
 0x5c7   :  { %v8478_v2 = vpop.f32.mrf.mxu1 }
 0x5c9   :  { %v8480_v43 = vpop.f32.mrf.mxu1 }
 0x5cb   :  { %v6212_v49 = vpop.f32.mrf.mxu1 }
 0x5cd   :  { %v8482_v4 = vpop.f32.mrf.mxu1 }
 0x5cf   :  { %v8484_v63 = vpop.f32.mrf.mxu1 }
 0x5d1   :  { %v8500_v26 = vpop.f32.mrf.mxu1 }
 0x5d3   :  { %v8509_v18 = vpop.f32.mrf.mxu1 }
 0x5d5   :  { %v8511_v8 = vpop.f32.mrf.mxu1 }
 0x5d7   :  { %v6229_v9 = vpop.f32.mrf.mxu1 }
 0x5d8   :  { %v1724_v57 = vadd.f32 %v8516_v31, %v6229_v9  ;;  %v6195_v9 = vpop.f32.mrf.mxu0 }
 0x5d9   :  { %v1718_v59 = vpop.f32.mrf.mxu1 }
 0x5da   :  { %v5350_v36 = vmul.f32 -1.442695, %v1724_v57  ;;  %v1719_v12 = vadd.f32 %v8529_v22, %v1718_v59 }
 0x5db   :  { %v6232_v38 = vpop.f32.mrf.mxu1 }
 0x5dc   :  { %v5349_v31 = vmul.f32 -1.442695, %v1719_v12  ;;  %v1734_v39 = vadd.f32 %v8535_v54, %v6232_v38  ;;  %6871 = vpow2.f32 %v5350_v36  ;;  %v1452_v12 = vpop.f32.mrf.mxu0  ;;  %v6868_v38 = vpop.eup %6867  ;;  %v8547_v36 = vld [vmem:[%s10135_s4 + $0x58] sm:$0xff]  ;;  %v1484_v54 = vadd.f32 1.0, %v6866_v32  ;;  %v8559_v32 = vld [vmem:[%s10135_s4 + $0x48] sm:$0xff] }
 0x5dd   :  { %v1728_v24 = vpop.f32.mrf.mxu1  ;;  %v6870_v62 = vpop.eup %6869  ;;  %10241 = vst [vmem:[#allocation15_spill] sm:$0xff] %v8559_v32 }
 0x5de   :  { %v5352_v57 = vmul.f32 -1.442695, %v1734_v39  ;;  %v1729_v59 = vadd.f32 %v8541_v55, %v1728_v24  ;;  %6873 = vpow2.f32 %v5349_v31  ;;  %v6198_v10 = vpop.f32.mrf.mxu0  ;;  %v1486_v24 = vadd.f32 1.0, %v6868_v38 }
 0x5df   :  { %v1468_v39 = vadd.f32 %v8547_v36, %v6198_v10  ;;  %v1485_v55 = vadd.f32 1.0, %v6870_v62  ;;  %v1458_v10 = vadd.f32 %v8559_v32, %v6195_v9 }
 0x5e0   :  { %6875 = vpow2.f32 %v5352_v57  ;;  %v5351_v22 = vmul.f32 -1.442695, %v1729_v59  ;;  %v1462_v20 = vpop.f32.mrf.mxu0 }
 0x5e1   :  { %6877 = vpow2.f32 %v5321_v61  ;;  %v1611_v57 = vadd.f32 %v6212_v49, %v1468_v39  ;;  %v8566_v49 = vld [vmem:[%s10135_s4 + $0x40] sm:$0xff] }
 0x5e2   :  { %6879 = vpow2.f32 %v5351_v22  ;;  %v8553_v22 = vld [vmem:[%s10135_s4 + $0x50] sm:$0xff]  ;;  %10242 = vst [vmem:[#allocation16_spill] sm:$0xff] %v8566_v49 }
 0x5e3   :  { %v1463_v61 = vadd.f32 %v8553_v22, %v1462_v20  ;;  %6881 = vrcp.f32 %v1484_v54  ;;  %v1453_v54 = vadd.f32 %v8566_v49, %v1452_v12 }
 0x5e4   :  { %6883 = vrcp.f32 %v1486_v24 }
 0x5e5   :  { %6885 = vrcp.f32 %v1485_v55  ;;  %v1610_v20 = vadd.f32 %v8482_v4, %v1463_v61 }
 0x5e6   :  { %6887 = vtanh.f32 %v1611_v57 }
 0x5e9   :  { %v6872_v31 = vpop.eup %6871 }
 0x5ea   :  { %v1794_v15 = vadd.f32 1.0, %v6872_v31  ;;  %v1609_v31 = vadd.f32 %v8478_v2, %v1458_v10 }
 0x5eb   :  { %v6874_v59 = vpop.eup %6873 }
 0x5ec   :  { %v1793_v55 = vadd.f32 1.0, %v6874_v59 }
 0x5ed   :  { %v6876_v52 = vpop.eup %6875 }
 0x5ee   :  { %v6878_v45 = vpop.eup %6877  ;;  %v1796_v38 = vadd.f32 1.0, %v6876_v52  ;;  %v1608_v52 = vadd.f32 %v8480_v43, %v1453_v54 }
 0x5ef   :  { %v6880_v62 = vpop.eup %6879  ;;  %v1483_v24 = vadd.f32 1.0, %v6878_v45 }
 0x5f0   :  { %6889 = vrcp.f32 %v1796_v38  ;;  %v1795_v39 = vadd.f32 1.0, %v6880_v62  ;;  %v6882_v4 = vpop.eup %6881 }
 0x5f1   :  { %6891 = vrcp.f32 %v1794_v15  ;;  %v6884_v9 = vpop.eup %6883 }
 0x5f2   :  { %6893 = vrcp.f32 %v1795_v39  ;;  %v6886_v61 = vpop.eup %6885  ;;  %v1619_v10 = vsub.f32 1.0, %v6884_v9 }
 0x5f3   :  { %6895 = vtanh.f32 %v1610_v20  ;;  %v6888_v57 = vpop.eup %6887 }
 0x5f4   :  { %6897 = vrcp.f32 %v1793_v55  ;;  %v1627_v54 = vmul.f32 %v6888_v57, %v6884_v9  ;;  %v1618_v55 = vsub.f32 1.0, %v6886_v61  ;;  %v8582_v9 = vld [vmem:[%s10134_s5 + $0x28] sm:$0xff] }
 0x5f5   :  { %6899 = vrcp.f32 %v1483_v24 }
 0x5f6   :  { %6901 = vtanh.f32 %v1609_v31  ;;  %v1623_v31 = vmul.f32 %v1619_v10, %v8181_v37 }
 0x5f7   :  { %6903 = vtanh.f32 %v1608_v52 }
 0x5fd   :  { %v6890_v12 = vpop.eup %6889 }
 0x5fe   :  { %v6892_v59 = vpop.eup %6891  ;;  %v1808_v38 = vmul.f32 %v6890_v12, %v8347_v13  ;;  %v1617_v12 = vsub.f32 1.0, %v6882_v4 }
 0x5ff   :  { %v6894_v45 = vpop.eup %6893  ;;  %v1806_v20 = vmul.f32 %v6892_v59, %v8370_v23 }
 0x600   :  { %v6896_v15 = vpop.eup %6895  ;;  %6239 = vmatprep.subr.mxu0 %v1808_v38  ;;  %v1807_v2 = vmul.f32 %v6894_v45, %v8358_v44  ;;  %v8576_v45 = vadd.f32 %v1627_v54, %v1623_v31  ;;  %v6235_v31 = vpop.f32.mrf.mxu1 }
 0x601   :  { %v6898_v62 = vpop.eup %6897  ;;  %6240 = vmatpush3.msra.mxu0 %v1808_v38  ;;  %v1626_v52 = vmul.f32 %v6896_v15, %v6886_v61  ;;  %v1622_v38 = vmul.f32 %v1618_v55, %v8187_v40  ;;  %v1621_v61 = vmul.f32 %v1617_v12, %v8194_v28  ;;  %v8594_v40 = vld [vmem:[%s10134_s5 + $0x30] sm:$0xff]  ;;  %v8606_v28 = vld [vmem:[%s10134_s5 + $0x38] sm:$0xff] }
 0x602   :  { %v6900_v43 = vpop.eup %6899  ;;  %6241 = vmatprep.subr.mxu0 %v1807_v2  ;;  %v1805_v24 = vmul.f32 %v6898_v62, %v8382_v14 }
 0x603   :  { %v6902_v39 = vpop.eup %6901  ;;  %6242 = vmatpush3.msra.mxu0 %v1807_v2  ;;  %v1616_v59 = vsub.f32 1.0, %v6900_v43  ;;  %v8587_v37 = vadd.f32 %v1626_v52, %v1622_v38 }
 0x604   :  { %6243 = vmatprep.subr.mxu0 %v1806_v20  ;;  %v6904_v49 = vpop.eup %6903  ;;  %v1625_v32 = vmul.f32 %v6902_v39, %v6882_v4 }
 0x605   :  { %6244 = vmatpush3.msra.mxu0 %v1806_v20  ;;  %v1624_v57 = vmul.f32 %v6904_v49, %v6900_v43  ;;  %v1620_v15 = vmul.f32 %v1616_v59, %v8201_v19  ;;  %v8643_v19 = vld [vmem:[%s10134_s5 + $0x20] sm:$0xff] }
 0x606   :  { %6245 = vmatprep.subr.mxu0 %v1805_v24  ;;  %v8599_v4 = vadd.f32 %v1625_v32, %v1621_v61  ;;  %v8686_v20 = vld [vmem:[%s10135_s4 + $0x60] sm:$0xff] }
 0x607   :  { %6246 = vmatpush3.msra.mxu0 %v1805_v24  ;;  %v8611_v49 = vadd.f32 %v1624_v57, %v1620_v15  ;;  %v1699_v54 = vadd.f32 %v8686_v20, %v8500_v26  ;;  %v1738_v57 = vpop.f32.mrf.mxu1 }
 0x608   :  { %6248 = vmatmul.mubr.msk.f32.vlgmr.msra.gmra.mxu0 %vm105_vm0, %v8582_v9  ;;  %6253 = vmatprep.subr.mxu0 %v8576_v45 }
 0x609   :  { %6254 = vmatpush3.msra.mxu0 %v8576_v45  ;;  %6250 = vmatprep.mubr.msk.f32.mxu0 %vm105_vm0, %v8594_v40  ;;  %v6238_v15 = vpop.f32.mrf.mxu1 }
 0x60a   :  { %6255 = vmatprep.subr.mxu0 %v8587_v37 }
 0x60b   :  { %6256 = vmatpush3.msra.mxu0 %v8587_v37 }
 0x60c   :  { %6251 = vmatmul.mubr.msk.f32.gmra.mxu0 %vm105_vm0, %v8606_v28  ;;  %6257 = vmatprep.subr.mxu0 %v8599_v4 }
 0x60d   :  { %6258 = vmatpush3.msra.mxu0 %v8599_v4  ;;  %6261 = vmatprep.mubr.msk.f32.mxu0 %vm105_vm0, %v8207_v17 }
 0x60e   :  { %6259 = vmatprep.subr.mxu0 %v8611_v49 }
 0x60f   :  { %6260 = vmatpush3.msra.mxu0 %v8611_v49 }
 0x610   :  { %6262 = vmatmul.mubr.msk.f32.vlgmr.msra.gmra.mxu0 %vm105_vm0, %v8216_v1 }
 0x611   :  { %6264 = vmatprep.mubr.msk.f32.mxu0 %vm105_vm0, %v8223_v47 }
 0x614   :  { %6265 = vmatmul.mubr.msk.f32.gmra.mxu0 %vm105_vm0, %v8230_v3 }
 0x615   :  { %6267 = vmatprep.mubr.msk.f32.mxu0 %vm105_vm0, %v8237_v33 }
 0x618   :  { %6268 = vmatmul.mubr.msk.f32.gmra.mxu0 %vm105_vm0, %v8244_v16  ;;  %v8658_v16 = vld [vmem:[%s10135_s4 + $0x68] sm:$0xff] }
 0x619   :  { %6270 = vmatprep.mubr.msk.f32.mxu0 %vm105_vm0, %v8251_v50  ;;  %v1704_v50 = vadd.f32 %v8658_v16, %v8484_v63 }
 0x61b   :  { %v5346_v63 = vmul.f32 -1.442695, %v1704_v50 }
 0x61c   :  { %6271 = vmatmul.mubr.msk.f32.gmra.mxu0 %vm105_vm0, %v8258_v51  ;;  %v8665_v51 = vld [vmem:[%s10135_s4 + $0x78] sm:$0xff] }
 0x61d   :  { %6273 = vmatprep.mubr.msk.f32.mxu0 %vm105_vm0, %v8265_v35  ;;  %v1714_v35 = vadd.f32 %v8665_v51, %v8509_v18  ;;  %6905 = vpow2.f32 %v5346_v63 }
 0x61f   :  { %v5348_v2 = vmul.f32 -1.442695, %v1714_v35 }
 0x620   :  { %6274 = vmatmul.mubr.msk.f32.gmra.mxu0 %vm105_vm0, %v8272_v0 }
 0x621   :  { %6276 = vmatprep.mubr.msk.f32.mxu0 %vm105_vm0, %v8279_v21  ;;  %v8674_v21 = vld [vmem:[%s10135_s4 + $0x70] sm:$0xff]  ;;  %6907 = vpow2.f32 %v5348_v2  ;;  %v1748_v2 = vpop.f32.mrf.mxu1 }
 0x624   :  { %6277 = vmatmul.mubr.msk.f32.gmra.mxu0 %vm105_vm0, %v8286_v5  ;;  %v1709_v5 = vadd.f32 %v8674_v21, %v8511_v8 }
 0x625   :  { %6327 = vmatprep.mubr.msk.f32.mxu0 %vm105_vm0, %v8643_v19 }
 0x626   :  { %v5347_v62 = vmul.f32 -1.442695, %v1709_v5 }
 0x628   :  { %6909 = vpow2.f32 %v5347_v62 }
 0x62a   :  { %v6906_v50 = vpop.eup %6905 }
 0x62b   :  { %v1770_v63 = vadd.f32 1.0, %v6906_v50 }
 0x6c8   :  { %v8647_v17 = vpop.f32.mrf.mxu0 }
 0x6ca   :  { %v8649_v1 = vpop.f32.mrf.mxu0 }
 0x6cc   :  { %v6252_v47 = vpop.f32.mrf.mxu0 }
 0x6ce   :  { %v8651_v3 = vpop.f32.mrf.mxu0 }
 0x6d0   :  { %v8653_v33 = vpop.f32.mrf.mxu0 }
 0x6d2   :  { %v8669_v0 = vpop.f32.mrf.mxu0 }
 0x6d4   :  { %v8678_v32 = vpop.f32.mrf.mxu0 }
 0x6d6   :  { %v8680_v10 = vpop.f32.mrf.mxu0 }
 0x6d8   :  { %v6269_v43 = vpop.f32.mrf.mxu0 }
 0x6d9   :  { %v2010_v18 = vadd.f32 %v8313_v6, %v6269_v43  ;;  %v5345_v6 = vmul.f32 -1.442695, %v1699_v54 }
 0x6da   :  { %v2004_v8 = vpop.f32.mrf.mxu0 }
 0x6db   :  { %v5374_v55 = vmul.f32 -1.442695, %v2010_v18  ;;  %v2005_v39 = vadd.f32 %v8321_v42, %v2004_v8  ;;  %v6908_v42 = vpop.eup %6907  ;;  %v8702_v18 = vld [vmem:[%s10135_s4 + $0xb0] sm:$0xff] }
 0x6dc   :  { %v6272_v24 = vpop.f32.mrf.mxu0  ;;  %v6910_v35 = vpop.eup %6909  ;;  %v1749_v54 = vadd.f32 %v8702_v18, %v1748_v2 }
 0x6dd   :  { %v5373_v52 = vmul.f32 -1.442695, %v2005_v39  ;;  %v2020_v12 = vadd.f32 %v8327_v60, %v6272_v24  ;;  %6911 = vpow2.f32 %v5374_v55  ;;  %v8696_v60 = vld [vmem:[%s10135_s4 + $0xb8] sm:$0xff]  ;;  %v1771_v43 = vadd.f32 1.0, %v6910_v35 }
 0x6de   :  { %v2014_v38 = vpop.f32.mrf.mxu0  ;;  %v1754_v5 = vadd.f32 %v8696_v60, %v6238_v15 }
 0x6df   :  { %v5376_v59 = vmul.f32 -1.442695, %v2020_v12  ;;  %v2015_v61 = vadd.f32 %v8333_v7, %v2014_v38  ;;  %6913 = vpow2.f32 %v5373_v52  ;;  %v1772_v7 = vadd.f32 1.0, %v6908_v42  ;;  %v8708_v12 = vld [vmem:[%s10135_s4 + $0xa8] sm:$0xff] }
 0x6e0   :  { %v1897_v8 = vadd.f32 %v6252_v47, %v1754_v5  ;;  %v8715_v47 = vld [vmem:[%s10135_s4 + $0xa0] sm:$0xff] }
 0x6e1   :  { %6915 = vpow2.f32 %v5376_v59  ;;  %v5375_v26 = vmul.f32 -1.442695, %v2015_v61  ;;  %v1896_v61 = vadd.f32 %v8651_v3, %v1749_v54 }
 0x6e2   :  { %6917 = vpow2.f32 %v5345_v6  ;;  %v1744_v6 = vadd.f32 %v8708_v12, %v6235_v31 }
 0x6e3   :  { %6919 = vpow2.f32 %v5375_v26  ;;  %v1739_v26 = vadd.f32 %v8715_v47, %v1738_v57 }
 0x6e4   :  { %6921 = vrcp.f32 %v1770_v63  ;;  %v1895_v35 = vadd.f32 %v8647_v17, %v1744_v6 }
 0x6e5   :  { %6923 = vrcp.f32 %v1772_v7  ;;  %v1894_v31 = vadd.f32 %v8649_v1, %v1739_v26 }
 0x6e6   :  { %6925 = vrcp.f32 %v1771_v43 }
 0x6e7   :  { %6927 = vtanh.f32 %v1897_v8 }
 0x6ea   :  { %v6912_v62 = vpop.eup %6911 }
 0x6eb   :  { %v2080_v24 = vadd.f32 1.0, %v6912_v62 }
 0x6ec   :  { %v6914_v55 = vpop.eup %6913 }
 0x6ed   :  { %v2079_v15 = vadd.f32 1.0, %v6914_v55 }
 0x6ee   :  { %v6916_v39 = vpop.eup %6915 }
 0x6ef   :  { %v6918_v52 = vpop.eup %6917  ;;  %v2082_v38 = vadd.f32 1.0, %v6916_v39 }
 0x6f0   :  { %v6920_v59 = vpop.eup %6919  ;;  %v1769_v42 = vadd.f32 1.0, %v6918_v52 }
 0x6f1   :  { %6929 = vrcp.f32 %v2082_v38  ;;  %v2081_v50 = vadd.f32 1.0, %v6920_v59  ;;  %v6922_v3 = vpop.eup %6921 }
 0x6f2   :  { %6931 = vrcp.f32 %v2080_v24  ;;  %v6924_v5 = vpop.eup %6923  ;;  %v1903_v26 = vsub.f32 1.0, %v6922_v3 }
 0x6f3   :  { %6933 = vrcp.f32 %v2081_v50  ;;  %v6926_v63 = vpop.eup %6925  ;;  %v1905_v8 = vsub.f32 1.0, %v6924_v5 }
 0x6f4   :  { %6935 = vtanh.f32 %v1896_v61  ;;  %v6928_v2 = vpop.eup %6927  ;;  %v1904_v52 = vsub.f32 1.0, %v6926_v63 }
 0x6f5   :  { %6937 = vrcp.f32 %v2079_v15  ;;  %v1913_v24 = vmul.f32 %v6928_v2, %v6924_v5  ;;  %v1909_v59 = vmul.f32 %v1905_v8, %v8347_v13  ;;  %v1907_v13 = vmul.f32 %v1903_v26, %v8370_v23  ;;  %v10244_v23 = vld [vmem:[#allocation5_spill] sm:$0xff] }
 0x6f6   :  { %6939 = vrcp.f32 %v1769_v42  ;;  %v1908_v42 = vmul.f32 %v1904_v52, %v8358_v44  ;;  %v10253_v26 = vld [vmem:[#allocation13_spill] sm:$0xff] }
 0x6f7   :  { %6941 = vtanh.f32 %v1895_v35  ;;  %v8725_v50 = vadd.f32 %v1913_v24, %v1909_v59  ;;  %v6275_v59 = vpop.f32.mrf.mxu0 }
 0x6f8   :  { %6943 = vtanh.f32 %v1894_v31 }
 0x6fe   :  { %v6930_v57 = vpop.eup %6929 }
 0x6ff   :  { %v6932_v7 = vpop.eup %6931  ;;  %v2094_v62 = vmul.f32 %v6930_v57, %v8576_v45  ;;  %v10249_v57 = vld [vmem:[#allocation9_spill] sm:$0xff] }
 0x700   :  { %v6934_v43 = vpop.eup %6933  ;;  %v2092_v39 = vmul.f32 %v6932_v7, %v8599_v4  ;;  %v1995_v7 = vadd.f32 %v10249_v57, %v8680_v10 }
 0x701   :  { %v6936_v54 = vpop.eup %6935  ;;  %6279 = vmatprep.subr.mxu1 %v2094_v62  ;;  %v2093_v17 = vmul.f32 %v6934_v43, %v8587_v37 }
 0x702   :  { %v6938_v55 = vpop.eup %6937  ;;  %6280 = vmatpush3.msra.mxu1 %v2094_v62  ;;  %v1912_v61 = vmul.f32 %v6936_v54, %v6926_v63  ;;  %v5371_v8 = vmul.f32 -1.442695, %v1995_v7 }
 0x703   :  { %v6940_v1 = vpop.eup %6939  ;;  %6281 = vmatprep.subr.mxu1 %v2093_v17  ;;  %v2091_v38 = vmul.f32 %v6938_v55, %v8611_v49 }
 0x704   :  { %v6942_v6 = vpop.eup %6941  ;;  %6282 = vmatpush3.msra.mxu1 %v2093_v17  ;;  %v1902_v31 = vsub.f32 1.0, %v6940_v1  ;;  %v8731_v5 = vadd.f32 %v1912_v61, %v1908_v42 }
 0x705   :  { %6283 = vmatprep.subr.mxu1 %v2092_v39  ;;  %v6944_v15 = vpop.eup %6943  ;;  %v1911_v35 = vmul.f32 %v6942_v6, %v6922_v3  ;;  %v10252_v6 = vld [vmem:[#allocation12_spill] sm:$0xff] }
 0x706   :  { %6284 = vmatpush3.msra.mxu1 %v2092_v39  ;;  %v1910_v63 = vmul.f32 %v6944_v15, %v6940_v1  ;;  %v1906_v3 = vmul.f32 %v1902_v31, %v8382_v14  ;;  %v10246_v14 = vld [vmem:[#allocation7_spill] sm:$0xff]  ;;  %v10250_v1 = vld [vmem:[#allocation10_spill] sm:$0xff] }
 0x707   :  { %6285 = vmatprep.subr.mxu1 %v2091_v38  ;;  %v8738_v44 = vadd.f32 %v1911_v35, %v1907_v13  ;;  %v10254_v13 = vld [vmem:[#allocation14_spill] sm:$0xff] }
 0x708   :  { %6286 = vmatpush3.msra.mxu1 %v2091_v38 }
 0x709   :  { %6288 = vmatmul.mubr.msk.f32.vlgmr.msra.gmra.mxu1 %vm105_vm0, %v8353_v41  ;;  %6293 = vmatprep.subr.mxu1 %v8725_v50  ;;  %v8745_v41 = vadd.f32 %v1910_v63, %v1906_v3  ;;  %v2024_v3 = vpop.f32.mrf.mxu0 }
 0x70a   :  { %6294 = vmatpush3.msra.mxu1 %v8725_v50  ;;  %6290 = vmatprep.mubr.msk.f32.mxu1 %vm105_vm0, %v8365_v11  ;;  %v10243_v11 = vld [vmem:[#allocation4_spill] sm:$0xff] }
 0x70b   :  { %6295 = vmatprep.subr.mxu1 %v8731_v5 }
 0x70c   :  { %6296 = vmatpush3.msra.mxu1 %v8731_v5 }
 0x70d   :  { %6291 = vmatmul.mubr.msk.f32.gmra.mxu1 %vm105_vm0, %v8377_v56  ;;  %6297 = vmatprep.subr.mxu1 %v8738_v44  ;;  %v10245_v56 = vld [vmem:[#allocation6_spill] sm:$0xff] }
 0x70e   :  { %6298 = vmatpush3.msra.mxu1 %v8738_v44  ;;  %6301 = vmatprep.mubr.msk.f32.mxu1 %vm105_vm0, %v8388_v53 }
 0x70f   :  { %6299 = vmatprep.subr.mxu1 %v8745_v41 }
 0x710   :  { %6300 = vmatpush3.msra.mxu1 %v8745_v41 }
 0x711   :  { %6302 = vmatmul.mubr.msk.f32.vlgmr.msra.gmra.mxu1 %vm105_vm0, %v8397_v29 }
 0x712   :  { %6304 = vmatprep.mubr.msk.f32.mxu1 %vm105_vm0, %v8404_v30 }
 0x715   :  { %6305 = vmatmul.mubr.msk.f32.gmra.mxu1 %vm105_vm0, %v8411_v34 }
 0x716   :  { %6307 = vmatprep.mubr.msk.f32.mxu1 %vm105_vm0, %v8418_v25 }
 0x719   :  { %6308 = vmatmul.mubr.msk.f32.gmra.mxu1 %vm105_vm0, %v8425_v46  ;;  %v10247_v46 = vld [vmem:[#allocation3_spill] sm:$0xff] }
 0x71a   :  { %6310 = vmatprep.mubr.msk.f32.mxu1 %vm105_vm0, %v8432_v58  ;;  %v1990_v58 = vadd.f32 %v10247_v46, %v8653_v33  ;;  %v10251_v33 = vld [vmem:[#allocation11_spill] sm:$0xff] }
 0x71b   :  { %v1985_v24 = vadd.f32 %v10251_v33, %v8669_v0  ;;  %v10255_v33 = vld [vmem:[#allocation15_spill] sm:$0xff] }
 0x71c   :  { %v5370_v43 = vmul.f32 -1.442695, %v1990_v58 }
 0x71d   :  { %6311 = vmatmul.mubr.msk.f32.gmra.mxu1 %vm105_vm0, %v8439_v48  ;;  %v10248_v48 = vld [vmem:[#allocation8_spill] sm:$0xff]  ;;  %v5369_v42 = vmul.f32 -1.442695, %v1985_v24  ;;  %v2030_v24 = vadd.f32 %v10255_v33, %v6275_v59 }
 0x71e   :  { %6313 = vmatprep.mubr.msk.f32.mxu1 %vm105_vm0, %v8446_v27  ;;  %v2000_v27 = vadd.f32 %v10248_v48, %v8678_v32  ;;  %6945 = vpow2.f32 %v5370_v43 }
 0x720   :  { %v5372_v54 = vmul.f32 -1.442695, %v2000_v27 }
 0x721   :  { %6314 = vmatmul.mubr.msk.f32.gmra.mxu1 %vm105_vm0, %v10243_v11  ;;  %v6278_v11 = vpop.f32.mrf.mxu0 }
 0x722   :  { %6316 = vmatprep.mubr.msk.f32.mxu1 %vm105_vm0, %v10244_v23  ;;  %6947 = vpow2.f32 %v5372_v54  ;;  %v2040_v46 = vadd.f32 %v8547_v36, %v6278_v11 }
 0x723   :  { %6949 = vpow2.f32 %v5371_v8  ;;  %v2034_v48 = vpop.f32.mrf.mxu0 }
 0x724   :  { %v2035_v43 = vadd.f32 %v8553_v22, %v2034_v48 }
 0x725   :  { %6317 = vmatmul.mubr.msk.f32.gmra.mxu1 %vm105_vm0, %v10245_v56 }
 0x726   :  { %6367 = vmatprep.mubr.msk.f32.mxu1 %vm105_vm0, %v10246_v14 }
 0x72b   :  { %v6946_v23 = vpop.eup %6945 }
 0x72c   :  { %v2056_v58 = vadd.f32 1.0, %v6946_v23 }
 0x72f   :  { %v6948_v56 = vpop.eup %6947 }
 0x730   :  { %v6950_v14 = vpop.eup %6949  ;;  %v2058_v27 = vadd.f32 1.0, %v6948_v56 }
 0x731   :  { %v2057_v7 = vadd.f32 1.0, %v6950_v14 }
 0x7c9   :  { %v8776_v53 = vpop.f32.mrf.mxu1 }
 0x7cb   :  { %v8778_v29 = vpop.f32.mrf.mxu1 }
 0x7cd   :  { %v6292_v30 = vpop.f32.mrf.mxu1 }
 0x7ce   :  { %v2183_v54 = vadd.f32 %v6292_v30, %v2040_v46  ;;  %v2181_v30 = vadd.f32 %v8776_v53, %v2030_v24  ;;  %v8867_v24 = vld [vmem:[%s10133_s3 + $0x20] sm:$0xff] }
 0x7cf   :  { %v2171_v34 = vpop.f32.mrf.mxu1 }
 0x7d0   :  { %v2182_v36 = vadd.f32 %v2171_v34, %v2035_v43 }
 0x7d1   :  { %v8780_v25 = vpop.f32.mrf.mxu1 }
 0x7d3   :  { %v8786_v2 = vpop.f32.mrf.mxu1 }
 0x7d5   :  { %v8790_v62 = vpop.f32.mrf.mxu1 }
 0x7d7   :  { %v8792_v17 = vpop.f32.mrf.mxu1 }
 0x7d9   :  { %v6309_v55 = vpop.f32.mrf.mxu1 }
 0x7da   :  { %v2296_v39 = vadd.f32 %v10250_v1, %v6309_v55 }
 0x7db   :  { %v2290_v32 = vpop.f32.mrf.mxu1 }
 0x7dc   :  { %v5398_v52 = vmul.f32 -1.442695, %v2296_v39  ;;  %v2291_v10 = vadd.f32 %v10252_v6, %v2290_v32  ;;  %v10256_v6 = vld [vmem:[#allocation16_spill] sm:$0xff] }
 0x7dd   :  { %v6312_v38 = vpop.f32.mrf.mxu1 }
 0x7de   :  { %v5397_v61 = vmul.f32 -1.442695, %v2291_v10  ;;  %v2306_v15 = vadd.f32 %v10253_v26, %v6312_v38  ;;  %6951 = vpow2.f32 %v5398_v52  ;;  %v2025_v10 = vadd.f32 %v10256_v6, %v2024_v3  ;;  %v8895_v6 = vld [vmem:[%s10133_s3 + $0x40] sm:$0xff] }
 0x7df   :  { %v2300_v35 = vpop.f32.mrf.mxu1 }
 0x7e0   :  { %v5400_v31 = vmul.f32 -1.442695, %v2306_v15  ;;  %v2301_v63 = vadd.f32 %v10254_v13, %v2300_v35  ;;  %6953 = vpow2.f32 %v5397_v61  ;;  %v2180_v26 = vadd.f32 %v8778_v29, %v2025_v10  ;;  %v8902_v10 = vld [vmem:[%s10133_s3 + $0x48] sm:$0xff] }
 0x7e2   :  { %6955 = vpow2.f32 %v5400_v31  ;;  %v5399_v0 = vmul.f32 -1.442695, %v2301_v63 }
 0x7e3   :  { %6957 = vpow2.f32 %v5369_v42 }
 0x7e4   :  { %6959 = vpow2.f32 %v5399_v0 }
 0x7e5   :  { %6961 = vrcp.f32 %v2056_v58 }
 0x7e6   :  { %6963 = vrcp.f32 %v2058_v27 }
 0x7e7   :  { %6965 = vrcp.f32 %v2057_v7 }
 0x7e8   :  { %6967 = vtanh.f32 %v2183_v54 }
 0x7eb   :  { %v6952_v57 = vpop.eup %6951 }
 0x7ec   :  { %v2366_v1 = vadd.f32 1.0, %v6952_v57 }
 0x7ed   :  { %v6954_v8 = vpop.eup %6953 }
 0x7ee   :  { %v2365_v38 = vadd.f32 1.0, %v6954_v8 }
 0x7ef   :  { %v6956_v55 = vpop.eup %6955 }
 0x7f0   :  { %v6958_v39 = vpop.eup %6957  ;;  %v2368_v32 = vadd.f32 1.0, %v6956_v55 }
 0x7f1   :  { %v6960_v52 = vpop.eup %6959  ;;  %v2055_v22 = vadd.f32 1.0, %v6958_v39 }
 0x7f2   :  { %6969 = vrcp.f32 %v2368_v32  ;;  %v2367_v61 = vadd.f32 1.0, %v6960_v52  ;;  %v6962_v59 = vpop.eup %6961  ;;  %v8874_v32 = vld [vmem:[%s10133_s3 + $0x28] sm:$0xff]  ;;  %v8881_v52 = vld [vmem:[%s10133_s3 + $0x30] sm:$0xff] }
 0x7f3   :  { %6971 = vrcp.f32 %v2366_v1  ;;  %v6964_v15 = vpop.eup %6963  ;;  %v2189_v57 = vsub.f32 1.0, %v6962_v59 }
 0x7f4   :  { %6973 = vrcp.f32 %v2367_v61  ;;  %v6966_v34 = vpop.eup %6965  ;;  %v2191_v0 = vsub.f32 1.0, %v6964_v15  ;;  %v8916_v61 = vld [vmem:[%s10133_s3 + $0x58] sm:$0xff] }
 0x7f5   :  { %6975 = vtanh.f32 %v2182_v36  ;;  %v6968_v42 = vpop.eup %6967  ;;  %v2190_v14 = vsub.f32 1.0, %v6966_v34  ;;  %v8888_v36 = vld [vmem:[%s10133_s3 + $0x38] sm:$0xff] }
 0x7f6   :  { %6977 = vrcp.f32 %v2365_v38  ;;  %v2199_v56 = vmul.f32 %v6968_v42, %v6964_v15  ;;  %v2195_v48 = vmul.f32 %v2191_v0, %v8576_v45  ;;  %v2193_v45 = vmul.f32 %v2189_v57, %v8599_v4  ;;  %v8846_v4 = vld [vmem:[%s10133_s3 + $0x8] sm:$0xff]  ;;  %v8909_v38 = vld [vmem:[%s10133_s3 + $0x50] sm:$0xff] }
 0x7f7   :  { %6979 = vrcp.f32 %v2055_v22  ;;  %v2194_v54 = vmul.f32 %v2190_v14, %v8587_v37  ;;  %v2286_v42 = vadd.f32 %v8665_v51, %v8790_v62  ;;  %v8957_v14 = vld [vmem:[%s10135_s4 + $0x38] sm:$0xff] }
 0x7f8   :  { %6981 = vtanh.f32 %v2181_v30  ;;  %v8811_v43 = vadd.f32 %v2199_v56, %v2195_v48  ;;  %v8963_v48 = vld [vmem:[%s10135_s4 + $0x30] sm:$0xff] }
 0x7f9   :  { %6983 = vtanh.f32 %v2180_v26 }
 0x7ff   :  { %v6970_v35 = vpop.eup %6969 }
 0x800   :  { %v6972_v31 = vpop.eup %6971  ;;  %v2380_v13 = vmul.f32 %v6970_v35, %v8725_v50 }
 0x801   :  { %v6974_v63 = vpop.eup %6973  ;;  %v2378_v23 = vmul.f32 %v6972_v31, %v8738_v44  ;;  %v2281_v31 = vadd.f32 %v8674_v21, %v8792_v17  ;;  %v8951_v17 = vld [vmem:[%s10135_s4 + $0x20] sm:$0xff] }
 0x802   :  { %v6976_v3 = vpop.eup %6975  ;;  %6319 = vmatprep.subr.mxu0 %v2380_v13  ;;  %v2379_v53 = vmul.f32 %v6974_v63, %v8731_v5  ;;  %v5396_v63 = vmul.f32 -1.442695, %v2286_v42 }
 0x803   :  { %v6978_v11 = vpop.eup %6977  ;;  %6320 = vmatpush3.msra.mxu0 %v2380_v13  ;;  %v2198_v27 = vmul.f32 %v6976_v3, %v6966_v34  ;;  %v2276_v34 = vadd.f32 %v8658_v16, %v8780_v25  ;;  %v8943_v16 = vld [vmem:[%s10135_s4 + $0x28] sm:$0xff]  ;;  %v2271_v25 = vadd.f32 %v8686_v20, %v8786_v2 }
 0x804   :  { %v6980_v29 = vpop.eup %6979  ;;  %6321 = vmatprep.subr.mxu0 %v2379_v53  ;;  %v2377_v58 = vmul.f32 %v6978_v11, %v8745_v41 }
 0x805   :  { %v6982_v46 = vpop.eup %6981  ;;  %6322 = vmatpush3.msra.mxu0 %v2379_v53  ;;  %v2188_v55 = vsub.f32 1.0, %v6980_v29  ;;  %v8817_v1 = vadd.f32 %v2198_v27, %v2194_v54  ;;  %v5394_v13 = vmul.f32 -1.442695, %v2276_v34  ;;  %v5395_v53 = vmul.f32 -1.442695, %v2281_v31 }
 0x806   :  { %6323 = vmatprep.subr.mxu0 %v2378_v23  ;;  %v6984_v7 = vpop.eup %6983  ;;  %v2197_v8 = vmul.f32 %v6982_v46, %v6962_v59  ;;  %v5393_v2 = vmul.f32 -1.442695, %v2271_v25 }
 0x807   :  { %6324 = vmatpush3.msra.mxu0 %v2378_v23  ;;  %v2196_v39 = vmul.f32 %v6984_v7, %v6980_v29  ;;  %v2192_v33 = vmul.f32 %v2188_v55, %v8611_v49  ;;  %v8860_v49 = vld [vmem:[%s10133_s3 + $0x18] sm:$0xff]  ;;  %6985 = vpow2.f32 %v5394_v13  ;;  %v6315_v23 = vpop.f32.mrf.mxu1 }
 0x808   :  { %6325 = vmatprep.subr.mxu0 %v2377_v58  ;;  %v8824_v37 = vadd.f32 %v2197_v8, %v2193_v45  ;;  %6987 = vpow2.f32 %v5396_v63 }
 0x809   :  { %6326 = vmatpush3.msra.mxu0 %v2377_v58  ;;  %6989 = vpow2.f32 %v5395_v53  ;;  %v2310_v57 = vpop.f32.mrf.mxu1 }
 0x80a   :  { %6328 = vmatmul.mubr.msk.f32.vlgmr.msra.gmra.mxu0 %vm105_vm0, %v8582_v9  ;;  %6333 = vmatprep.subr.mxu0 %v8811_v43  ;;  %v8831_v9 = vadd.f32 %v2196_v39, %v2192_v33 }
 0x80b   :  { %6334 = vmatpush3.msra.mxu0 %v8811_v43  ;;  %6330 = vmatprep.mubr.msk.f32.mxu0 %vm105_vm0, %v8594_v40  ;;  %v8837_v40 = vld [vmem:[%s10133_s3] sm:$0xff]  ;;  %v6318_v54 = vpop.f32.mrf.mxu1 }
 0x80c   :  { %6335 = vmatprep.subr.mxu0 %v8817_v1  ;;  %v2326_v39 = vadd.f32 %v8696_v60, %v6318_v54 }
 0x80d   :  { %6336 = vmatpush3.msra.mxu0 %v8817_v1  ;;  %v2320_v34 = vpop.f32.mrf.mxu1 }
 0x80e   :  { %6331 = vmatmul.mubr.msk.f32.gmra.mxu0 %vm105_vm0, %v8606_v28  ;;  %6337 = vmatprep.subr.mxu0 %v8824_v37  ;;  %v8853_v28 = vld [vmem:[%s10133_s3 + $0x10] sm:$0xff]  ;;  %v2321_v63 = vadd.f32 %v8702_v18, %v2320_v34 }
 0x80f   :  { %6338 = vmatpush3.msra.mxu0 %v8824_v37  ;;  %6341 = vmatprep.mubr.msk.f32.mxu0 %vm105_vm0, %v8837_v40 }
 0x810   :  { %6339 = vmatprep.subr.mxu0 %v8831_v9 }
 0x811   :  { %6340 = vmatpush3.msra.mxu0 %v8831_v9 }
 0x812   :  { %6342 = vmatmul.mubr.msk.f32.vlgmr.msra.gmra.mxu0 %vm105_vm0, %v8846_v4 }
 0x813   :  { %6344 = vmatprep.mubr.msk.f32.mxu0 %vm105_vm0, %v8853_v28 }
 0x814   :  { %v6986_v8 = vpop.eup %6985 }
 0x815   :  { %v6988_v55 = vpop.eup %6987  ;;  %v2342_v33 = vadd.f32 1.0, %v6986_v8 }
 0x816   :  { %6345 = vmatmul.mubr.msk.f32.gmra.mxu0 %vm105_vm0, %v8860_v49  ;;  %v6990_v45 = vpop.eup %6989  ;;  %v2344_v42 = vadd.f32 1.0, %v6988_v55 }
 0x817   :  { %6347 = vmatprep.mubr.msk.f32.mxu0 %vm105_vm0, %v8867_v24  ;;  %v2343_v13 = vadd.f32 1.0, %v6990_v45 }
 0x81a   :  { %6348 = vmatmul.mubr.msk.f32.gmra.mxu0 %vm105_vm0, %v8874_v32 }
 0x81b   :  { %6350 = vmatprep.mubr.msk.f32.mxu0 %vm105_vm0, %v8881_v52 }
 0x81e   :  { %6351 = vmatmul.mubr.msk.f32.gmra.mxu0 %vm105_vm0, %v8888_v36 }
 0x81f   :  { %6353 = vmatprep.mubr.msk.f32.mxu0 %vm105_vm0, %v8895_v6 }
 0x822   :  { %6354 = vmatmul.mubr.msk.f32.gmra.mxu0 %vm105_vm0, %v8902_v10 }
 0x823   :  { %6356 = vmatprep.mubr.msk.f32.mxu0 %vm105_vm0, %v8909_v38 }
 0x826   :  { %6357 = vmatmul.mubr.msk.f32.gmra.mxu0 %vm105_vm0, %v8916_v61 }
 0x827   :  { %6407 = vmatprep.mubr.msk.f32.mxu0 %vm105_vm0, %v8643_v19 }
 0x8ca   :  { %v8922_v22 = vpop.f32.mrf.mxu0 }
 0x8cc   :  { %v8924_v30 = vpop.f32.mrf.mxu0 }
 0x8ce   :  { %v6332_v26 = vpop.f32.mrf.mxu0 }
 0x8cf   :  { %v2469_v53 = vadd.f32 %v6332_v26, %v2326_v39 }
 0x8d0   :  { %v2457_v59 = vpop.f32.mrf.mxu0 }
 0x8d1   :  { %v2468_v60 = vadd.f32 %v2457_v59, %v2321_v63 }
 0x8d2   :  { %v8926_v15 = vpop.f32.mrf.mxu0 }
 0x8d4   :  { %v8932_v35 = vpop.f32.mrf.mxu0 }
 0x8d6   :  { %v8936_v19 = vpop.f32.mrf.mxu0 }
 0x8d8   :  { %v8938_v3 = vpop.f32.mrf.mxu0 }
 0x8da   :  { %v6349_v0 = vpop.f32.mrf.mxu0 }
 0x8db   :  { %v2582_v51 = vadd.f32 %v8943_v16, %v6349_v0 }
 0x8dc   :  { %v2576_v21 = vpop.f32.mrf.mxu0 }
 0x8dd   :  { %v5422_v62 = vmul.f32 -1.442695, %v2582_v51  ;;  %v2577_v11 = vadd.f32 %v8951_v17, %v2576_v21 }
 0x8de   :  { %v6352_v29 = vpop.f32.mrf.mxu0 }
 0x8df   :  { %v5421_v56 = vmul.f32 -1.442695, %v2577_v11  ;;  %v2592_v20 = vadd.f32 %v8957_v14, %v6352_v29  ;;  %6991 = vpow2.f32 %v5422_v62  ;;  %v2316_v62 = vadd.f32 %v8708_v12, %v6315_v23 }
 0x8e0   :  { %v2586_v46 = vpop.f32.mrf.mxu0 }
 0x8e1   :  { %v5424_v58 = vmul.f32 -1.442695, %v2592_v20  ;;  %v2587_v27 = vadd.f32 %v8963_v48, %v2586_v46  ;;  %6993 = vpow2.f32 %v5421_v56  ;;  %v2311_v56 = vadd.f32 %v8715_v47, %v2310_v57 }
 0x8e2   :  { %v2467_v26 = vadd.f32 %v8922_v22, %v2316_v62  ;;  %v8983_v62 = vld [vmem:[%s10134_s5 + $0x8] sm:$0xff] }
 0x8e3   :  { %6995 = vpow2.f32 %v5424_v58  ;;  %v5423_v7 = vmul.f32 -1.442695, %v2587_v27  ;;  %v2466_v46 = vadd.f32 %v8924_v30, %v2311_v56 }
 0x8e4   :  { %6997 = vpow2.f32 %v5393_v2 }
 0x8e5   :  { %6999 = vpow2.f32 %v5423_v7 }
 0x8e6   :  { %7001 = vrcp.f32 %v2342_v33 }
 0x8e7   :  { %7003 = vrcp.f32 %v2344_v42 }
 0x8e8   :  { %7005 = vrcp.f32 %v2343_v13 }
 0x8e9   :  { %7007 = vtanh.f32 %v2469_v53 }
 0x8ec   :  { %v6992_v31 = vpop.eup %6991 }
 0x8ed   :  { %v2652_v25 = vadd.f32 1.0, %v6992_v31 }
 0x8ee   :  { %v6994_v0 = vpop.eup %6993 }
 0x8ef   :  { %v2651_v20 = vadd.f32 1.0, %v6994_v0 }
 0x8f0   :  { %v6996_v51 = vpop.eup %6995 }
 0x8f1   :  { %v6998_v21 = vpop.eup %6997  ;;  %v2654_v11 = vadd.f32 1.0, %v6996_v51 }
 0x8f2   :  { %v7000_v29 = vpop.eup %6999  ;;  %v2341_v18 = vadd.f32 1.0, %v6998_v21 }
 0x8f3   :  { %7009 = vrcp.f32 %v2654_v11  ;;  %v2653_v2 = vadd.f32 1.0, %v7000_v29  ;;  %v7002_v12 = vpop.eup %7001 }
 0x8f4   :  { %7011 = vrcp.f32 %v2652_v25  ;;  %v7004_v23 = vpop.eup %7003  ;;  %v2475_v63 = vsub.f32 1.0, %v7002_v12 }
 0x8f5   :  { %7013 = vrcp.f32 %v2653_v2  ;;  %v7006_v59 = vpop.eup %7005  ;;  %v2477_v8 = vsub.f32 1.0, %v7004_v23  ;;  %v9027_v2 = vld [vmem:[%s10133_s3 + $0x68] sm:$0xff] }
 0x8f6   :  { %7015 = vtanh.f32 %v2468_v60  ;;  %v7008_v58 = vpop.eup %7007  ;;  %v2476_v33 = vsub.f32 1.0, %v7006_v59  ;;  %v2479_v11 = vmul.f32 %v2475_v63, %v8738_v44  ;;  %v9007_v44 = vld [vmem:[%s10134_s5 + $0x18] sm:$0xff] }
 0x8f7   :  { %7017 = vrcp.f32 %v2651_v20  ;;  %v2485_v39 = vmul.f32 %v7008_v58, %v7004_v23  ;;  %v2481_v31 = vmul.f32 %v2477_v8, %v8725_v50  ;;  %v9062_v23 = vld [vmem:[%s10133_s3 + $0x90] sm:$0xff]  ;;  %v9076_v58 = vld [vmem:[%s10133_s3 + $0xa0] sm:$0xff] }
 0x8f8   :  { %7019 = vrcp.f32 %v2341_v18  ;;  %v2480_v51 = vmul.f32 %v2476_v33, %v8731_v5  ;;  %v8995_v5 = vld [vmem:[%s10134_s5 + $0x10] sm:$0xff]  ;;  %v9126_v33 = vld [vmem:[%s10135_s4 + $0x18] sm:$0xff] }
 0x8f9   :  { %7021 = vtanh.f32 %v2467_v26  ;;  %v8977_v0 = vadd.f32 %v2485_v39, %v2481_v31  ;;  %v9034_v18 = vld [vmem:[%s10133_s3 + $0x70] sm:$0xff]  ;;  %v9041_v26 = vld [vmem:[%s10133_s3 + $0x78] sm:$0xff]  ;;  %10262 = vst [vmem:[#allocation3_spill] sm:$0xff] %v9126_v33 }
 0x8fa   :  { %7023 = vtanh.f32 %v2466_v46  ;;  %v9048_v46 = vld [vmem:[%s10133_s3 + $0x80] sm:$0xff]  ;;  %v9135_v31 = vld [vmem:[%s10135_s4 + $0x10] sm:$0xff] }
 0x8fb   :  { %10263 = vst [vmem:[#allocation8_spill] sm:$0xff] %v9135_v31 }
 0x900   :  { %v7010_v47 = vpop.eup %7009 }
 0x901   :  { %v7012_v27 = vpop.eup %7011  ;;  %v2666_v57 = vmul.f32 %v7010_v47, %v8811_v43  ;;  %v9083_v47 = vld [vmem:[%s10133_s3 + $0xa8] sm:$0xff] }
 0x902   :  { %v7014_v7 = vpop.eup %7013  ;;  %v2664_v45 = vmul.f32 %v7012_v27, %v8824_v37  ;;  %10257 = vst [vmem:[#allocation17_spill] sm:$0xff] %v9083_v47  ;;  %v9090_v27 = vld [vmem:[%s10133_s3 + $0xb0] sm:$0xff] }
 0x903   :  { %v7016_v54 = vpop.eup %7015  ;;  %6359 = vmatprep.subr.mxu1 %v2666_v57  ;;  %v2665_v22 = vmul.f32 %v7014_v7, %v8817_v1  ;;  %10258 = vst [vmem:[#allocation4_spill] sm:$0xff] %v9090_v27  ;;  %v9104_v7 = vld [vmem:[%s10134_s5] sm:$0xff] }
 0x904   :  { %v7018_v55 = vpop.eup %7017  ;;  %6360 = vmatpush3.msra.mxu1 %v2666_v57  ;;  %v2484_v13 = vmul.f32 %v7016_v54, %v7006_v59  ;;  %v9069_v59 = vld [vmem:[%s10133_s3 + $0x98] sm:$0xff]  ;;  %10260 = vst [vmem:[#allocation6_spill] sm:$0xff] %v9104_v7 }
 0x905   :  { %v7020_v30 = vpop.eup %7019  ;;  %6361 = vmatprep.subr.mxu1 %v2665_v22  ;;  %v2663_v42 = vmul.f32 %v7018_v55, %v8831_v9  ;;  %v9097_v57 = vld [vmem:[%s10133_s3 + $0xb8] sm:$0xff] }
 0x906   :  { %v7022_v34 = vpop.eup %7021  ;;  %6362 = vmatpush3.msra.mxu1 %v2665_v22  ;;  %v2474_v21 = vsub.f32 1.0, %v7020_v30  ;;  %v8988_v50 = vadd.f32 %v2484_v13, %v2480_v51  ;;  %10259 = vst [vmem:[#allocation5_spill] sm:$0xff] %v9097_v57  ;;  %v2567_v13 = vadd.f32 %v9135_v31, %v8938_v3  ;;  %v9152_v3 = vld [vmem:[%s10135_s4] sm:$0xff]  ;;  %v9165_v31 = vld [vmem:[%s10135_s4 + $0x98] sm:$0xff] }
 0x907   :  { %6363 = vmatprep.subr.mxu1 %v2664_v45  ;;  %v7024_v53 = vpop.eup %7023  ;;  %v2483_v25 = vmul.f32 %v7022_v34, %v7002_v12  ;;  %v9055_v12 = vld [vmem:[%s10133_s3 + $0x88] sm:$0xff]  ;;  %v2572_v34 = vadd.f32 %v9126_v33, %v8936_v19  ;;  %10265 = vst [vmem:[#allocation10_spill] sm:$0xff] %v9152_v3  ;;  %10267 = vst [vmem:[#allocation12_spill] sm:$0xff] %v9165_v31 }
 0x908   :  { %6364 = vmatpush3.msra.mxu1 %v2664_v45  ;;  %v2482_v29 = vmul.f32 %v7024_v53, %v7020_v30  ;;  %v2478_v56 = vmul.f32 %v2474_v21, %v8745_v41  ;;  %v9018_v41 = vld [vmem:[%s10133_s3 + $0x60] sm:$0xff]  ;;  %v9119_v45 = vld [vmem:[%s10135_s4 + $0x8] sm:$0xff] }
 0x909   :  { %6365 = vmatprep.subr.mxu1 %v2663_v42  ;;  %v9000_v60 = vadd.f32 %v2483_v25, %v2479_v11  ;;  %10261 = vst [vmem:[#allocation7_spill] sm:$0xff] %v9119_v45  ;;  %v2562_v39 = vadd.f32 %v9119_v45, %v8926_v15  ;;  %v5420_v53 = vmul.f32 -1.442695, %v2572_v34  ;;  %v5419_v25 = vmul.f32 -1.442695, %v2567_v13  ;;  %v9146_v19 = vld [vmem:[%s10135_s4 + $0x88] sm:$0xff] }
 0x90a   :  { %6366 = vmatpush3.msra.mxu1 %v2663_v42  ;;  %v9012_v20 = vadd.f32 %v2482_v29, %v2478_v56  ;;  %10264 = vst [vmem:[#allocation9_spill] sm:$0xff] %v9146_v19  ;;  %v2557_v29 = vadd.f32 %v9152_v3, %v8932_v35  ;;  %v9159_v34 = vld [vmem:[%s10135_s4 + $0x80] sm:$0xff]  ;;  %v9171_v3 = vld [vmem:[%s10135_s4 + $0x90] sm:$0xff] }
 0x90b   :  { %6368 = vmatmul.mubr.msk.f32.vlgmr.msra.gmra.mxu1 %vm105_vm0, %v8983_v62  ;;  %6373 = vmatprep.subr.mxu1 %v8977_v0  ;;  %v5418_v15 = vmul.f32 -1.442695, %v2562_v39  ;;  %10266 = vst [vmem:[#allocation11_spill] sm:$0xff] %v9159_v34  ;;  %10268 = vst [vmem:[#allocation13_spill] sm:$0xff] %v9171_v3 }
 0x90c   :  { %6374 = vmatpush3.msra.mxu1 %v8977_v0  ;;  %6370 = vmatprep.mubr.msk.f32.mxu1 %vm105_vm0, %v8995_v5 }
 0x90d   :  { %6375 = vmatprep.subr.mxu1 %v8988_v50  ;;  %7025 = vpow2.f32 %v5418_v15 }
 0x90e   :  { %6376 = vmatpush3.msra.mxu1 %v8988_v50  ;;  %7027 = vpow2.f32 %v5420_v53  ;;  %v5417_v53 = vmul.f32 -1.442695, %v2557_v29 }
 0x90f   :  { %6371 = vmatmul.mubr.msk.f32.gmra.mxu1 %vm105_vm0, %v9007_v44  ;;  %6377 = vmatprep.subr.mxu1 %v9000_v60  ;;  %7029 = vpow2.f32 %v5419_v25 }
 0x910   :  { %6378 = vmatpush3.msra.mxu1 %v9000_v60  ;;  %6381 = vmatprep.mubr.msk.f32.mxu1 %vm105_vm0, %v9018_v41 }
 0x911   :  { %6379 = vmatprep.subr.mxu1 %v9012_v20 }
 0x912   :  { %6380 = vmatpush3.msra.mxu1 %v9012_v20 }
 0x913   :  { %6382 = vmatmul.mubr.msk.f32.vlgmr.msra.gmra.mxu1 %vm105_vm0, %v9027_v2 }
 0x914   :  { %6384 = vmatprep.mubr.msk.f32.mxu1 %vm105_vm0, %v9034_v18 }
 0x917   :  { %6385 = vmatmul.mubr.msk.f32.gmra.mxu1 %vm105_vm0, %v9041_v26 }
 0x918   :  { %6387 = vmatprep.mubr.msk.f32.mxu1 %vm105_vm0, %v9048_v46 }
 0x91a   :  { %v7026_v45 = vpop.eup %7025 }
 0x91b   :  { %6388 = vmatmul.mubr.msk.f32.gmra.mxu1 %vm105_vm0, %v9055_v12 }
 0x91c   :  { %6390 = vmatprep.mubr.msk.f32.mxu1 %vm105_vm0, %v9062_v23 }
 0x91f   :  { %6391 = vmatmul.mubr.msk.f32.gmra.mxu1 %vm105_vm0, %v9069_v59 }
 0x920   :  { %6393 = vmatprep.mubr.msk.f32.mxu1 %vm105_vm0, %v9076_v58 }
 0x923   :  { %6394 = vmatmul.mubr.msk.f32.gmra.mxu1 %vm105_vm0, %v9083_v47 }
 0x924   :  { %6396 = vmatprep.mubr.msk.f32.mxu1 %vm105_vm0, %v9090_v27 }
 0x927   :  { %6397 = vmatmul.mubr.msk.f32.gmra.mxu1 %vm105_vm0, %v9097_v57 }
 0x928   :  { %6447 = vmatprep.mubr.msk.f32.mxu1 %vm105_vm0, %v9104_v7 }
 0x9cb   :  { %v9108_v54 = vpop.f32.mrf.mxu1 }
 0x9cd   :  { %v9110_v22 = vpop.f32.mrf.mxu1 }
 0x9cf   :  { %v6372_v8 = vpop.f32.mrf.mxu1 }
 0x9d1   :  { %v9112_v55 = vpop.f32.mrf.mxu1 }
 0x9d3   :  { %v9114_v30 = vpop.f32.mrf.mxu1 }
 0x9d5   :  { %v9130_v42 = vpop.f32.mrf.mxu1 }
 0x9d7   :  { %v9139_v63 = vpop.f32.mrf.mxu1 }
 0x9d9   :  { %v9141_v51 = vpop.f32.mrf.mxu1 }
 0x9db   :  { %v6389_v21 = vpop.f32.mrf.mxu1 }
 0x9dc   :  { %v2868_v11 = vadd.f32 %v9146_v19, %v6389_v21  ;;  %v6355_v21 = vpop.f32.mrf.mxu0 }
 0x9dd   :  { %v2862_v56 = vpop.f32.mrf.mxu1 }
 0x9de   :  { %v5446_v39 = vmul.f32 -1.442695, %v2868_v11  ;;  %v2863_v13 = vadd.f32 %v9159_v34, %v2862_v56 }
 0x9df   :  { %v6392_v15 = vpop.f32.mrf.mxu1 }
 0x9e0   :  { %v5445_v19 = vmul.f32 -1.442695, %v2863_v13  ;;  %v2878_v35 = vadd.f32 %v9165_v31, %v6392_v15  ;;  %7031 = vpow2.f32 %v5446_v39  ;;  %v2596_v13 = vpop.f32.mrf.mxu0  ;;  %v7028_v15 = vpop.eup %7027  ;;  %v9177_v39 = vld [vmem:[%s10135_s4 + $0x58] sm:$0xff]  ;;  %v2628_v31 = vadd.f32 1.0, %v7026_v45  ;;  %v9189_v45 = vld [vmem:[%s10135_s4 + $0x48] sm:$0xff] }
 0x9e1   :  { %v2872_v25 = vpop.f32.mrf.mxu1  ;;  %v7030_v29 = vpop.eup %7029  ;;  %10269 = vst [vmem:[#allocation14_spill] sm:$0xff] %v9189_v45 }
 0x9e2   :  { %v5448_v11 = vmul.f32 -1.442695, %v2878_v35  ;;  %v2873_v56 = vadd.f32 %v9171_v3, %v2872_v25  ;;  %7033 = vpow2.f32 %v5445_v19  ;;  %v6358_v33 = vpop.f32.mrf.mxu0  ;;  %v2630_v25 = vadd.f32 1.0, %v7028_v15 }
 0x9e3   :  { %v2612_v35 = vadd.f32 %v9177_v39, %v6358_v33  ;;  %v2629_v3 = vadd.f32 1.0, %v7030_v29  ;;  %v2602_v33 = vadd.f32 %v9189_v45, %v6355_v21 }
 0x9e4   :  { %7035 = vpow2.f32 %v5448_v11  ;;  %v5447_v34 = vmul.f32 -1.442695, %v2873_v56  ;;  %v2606_v7 = vpop.f32.mrf.mxu0 }
 0x9e5   :  { %7037 = vpow2.f32 %v5417_v53  ;;  %v2755_v11 = vadd.f32 %v6372_v8, %v2612_v35  ;;  %v9196_v8 = vld [vmem:[%s10135_s4 + $0x40] sm:$0xff] }
 0x9e6   :  { %7039 = vpow2.f32 %v5447_v34  ;;  %v9183_v34 = vld [vmem:[%s10135_s4 + $0x50] sm:$0xff]  ;;  %10270 = vst [vmem:[#allocation15_spill] sm:$0xff] %v9196_v8 }
 0x9e7   :  { %v2607_v53 = vadd.f32 %v9183_v34, %v2606_v7  ;;  %7041 = vrcp.f32 %v2628_v31  ;;  %v2597_v31 = vadd.f32 %v9196_v8, %v2596_v13 }
 0x9e8   :  { %7043 = vrcp.f32 %v2630_v25 }
 0x9e9   :  { %7045 = vrcp.f32 %v2629_v3  ;;  %v2754_v7 = vadd.f32 %v9112_v55, %v2607_v53 }
 0x9ea   :  { %7047 = vtanh.f32 %v2755_v11 }
 0x9ed   :  { %v7032_v19 = vpop.eup %7031 }
 0x9ee   :  { %v2938_v27 = vadd.f32 1.0, %v7032_v19  ;;  %v2753_v19 = vadd.f32 %v9108_v54, %v2602_v33 }
 0x9ef   :  { %v7034_v56 = vpop.eup %7033 }
 0x9f0   :  { %v2937_v3 = vadd.f32 1.0, %v7034_v56 }
 0x9f1   :  { %v7036_v57 = vpop.eup %7035 }
 0x9f2   :  { %v7038_v47 = vpop.eup %7037  ;;  %v2940_v15 = vadd.f32 1.0, %v7036_v57  ;;  %v2752_v57 = vadd.f32 %v9110_v22, %v2597_v31 }
 0x9f3   :  { %v7040_v29 = vpop.eup %7039  ;;  %v2627_v25 = vadd.f32 1.0, %v7038_v47 }
 0x9f4   :  { %7049 = vrcp.f32 %v2940_v15  ;;  %v2939_v35 = vadd.f32 1.0, %v7040_v29  ;;  %v7042_v55 = vpop.eup %7041 }
 0x9f5   :  { %7051 = vrcp.f32 %v2938_v27  ;;  %v7044_v21 = vpop.eup %7043 }
 0x9f6   :  { %7053 = vrcp.f32 %v2939_v35  ;;  %v7046_v53 = vpop.eup %7045  ;;  %v2763_v33 = vsub.f32 1.0, %v7044_v21 }
 0x9f7   :  { %7055 = vtanh.f32 %v2754_v7  ;;  %v7048_v11 = vpop.eup %7047 }
 0x9f8   :  { %7057 = vrcp.f32 %v2937_v3  ;;  %v2771_v31 = vmul.f32 %v7048_v11, %v7044_v21  ;;  %v2762_v3 = vsub.f32 1.0, %v7046_v53  ;;  %v9212_v21 = vld [vmem:[%s10134_s5 + $0x28] sm:$0xff] }
 0x9f9   :  { %7059 = vrcp.f32 %v2627_v25 }
 0x9fa   :  { %7061 = vtanh.f32 %v2753_v19  ;;  %v2767_v19 = vmul.f32 %v2763_v33, %v8811_v43 }
 0x9fb   :  { %7063 = vtanh.f32 %v2752_v57 }
 0xa01   :  { %v7050_v13 = vpop.eup %7049 }
 0xa02   :  { %v7052_v56 = vpop.eup %7051  ;;  %v2952_v15 = vmul.f32 %v7050_v13, %v8977_v0  ;;  %v2761_v13 = vsub.f32 1.0, %v7042_v55 }
 0xa03   :  { %v7054_v47 = vpop.eup %7053  ;;  %v2950_v7 = vmul.f32 %v7052_v56, %v9000_v60 }
 0xa04   :  { %v7056_v27 = vpop.eup %7055  ;;  %6399 = vmatprep.subr.mxu0 %v2952_v15  ;;  %v2951_v54 = vmul.f32 %v7054_v47, %v8988_v50  ;;  %v9206_v47 = vadd.f32 %v2771_v31, %v2767_v19  ;;  %v6395_v19 = vpop.f32.mrf.mxu1 }
 0xa05   :  { %v7058_v29 = vpop.eup %7057  ;;  %6400 = vmatpush3.msra.mxu0 %v2952_v15  ;;  %v2770_v57 = vmul.f32 %v7056_v27, %v7046_v53  ;;  %v2766_v15 = vmul.f32 %v2762_v3, %v8817_v1  ;;  %v2765_v53 = vmul.f32 %v2761_v13, %v8824_v37  ;;  %v9224_v1 = vld [vmem:[%s10134_s5 + $0x30] sm:$0xff]  ;;  %v9236_v37 = vld [vmem:[%s10134_s5 + $0x38] sm:$0xff] }
 0xa06   :  { %v7060_v22 = vpop.eup %7059  ;;  %6401 = vmatprep.subr.mxu0 %v2951_v54  ;;  %v2949_v25 = vmul.f32 %v7058_v29, %v9012_v20 }
 0xa07   :  { %v7062_v35 = vpop.eup %7061  ;;  %6402 = vmatpush3.msra.mxu0 %v2951_v54  ;;  %v2760_v56 = vsub.f32 1.0, %v7060_v22  ;;  %v9217_v43 = vadd.f32 %v2770_v57, %v2766_v15 }
 0xa08   :  { %6403 = vmatprep.subr.mxu0 %v2950_v7  ;;  %v7064_v8 = vpop.eup %7063  ;;  %v2769_v45 = vmul.f32 %v7062_v35, %v7042_v55 }
 0xa09   :  { %6404 = vmatpush3.msra.mxu0 %v2950_v7  ;;  %v2768_v11 = vmul.f32 %v7064_v8, %v7060_v22  ;;  %v2764_v27 = vmul.f32 %v2760_v56, %v8831_v9  ;;  %v9273_v9 = vld [vmem:[%s10134_s5 + $0x20] sm:$0xff] }
 0xa0a   :  { %6405 = vmatprep.subr.mxu0 %v2949_v25  ;;  %v9229_v55 = vadd.f32 %v2769_v45, %v2765_v53  ;;  %v9316_v7 = vld [vmem:[%s10135_s4 + $0x60] sm:$0xff] }
 0xa0b   :  { %6406 = vmatpush3.msra.mxu0 %v2949_v25  ;;  %v9241_v8 = vadd.f32 %v2768_v11, %v2764_v27  ;;  %v2843_v31 = vadd.f32 %v9316_v7, %v9130_v42  ;;  %v2882_v11 = vpop.f32.mrf.mxu1 }
 0xa0c   :  { %6408 = vmatmul.mubr.msk.f32.vlgmr.msra.gmra.mxu0 %vm105_vm0, %v9212_v21  ;;  %6413 = vmatprep.subr.mxu0 %v9206_v47 }
 0xa0d   :  { %6414 = vmatpush3.msra.mxu0 %v9206_v47  ;;  %6410 = vmatprep.mubr.msk.f32.mxu0 %vm105_vm0, %v9224_v1  ;;  %v6398_v27 = vpop.f32.mrf.mxu1 }
 0xa0e   :  { %6415 = vmatprep.subr.mxu0 %v9217_v43 }
 0xa0f   :  { %6416 = vmatpush3.msra.mxu0 %v9217_v43 }
 0xa10   :  { %6411 = vmatmul.mubr.msk.f32.gmra.mxu0 %vm105_vm0, %v9236_v37  ;;  %6417 = vmatprep.subr.mxu0 %v9229_v55 }
 0xa11   :  { %6418 = vmatpush3.msra.mxu0 %v9229_v55  ;;  %6421 = vmatprep.mubr.msk.f32.mxu0 %vm105_vm0, %v8837_v40 }
 0xa12   :  { %6419 = vmatprep.subr.mxu0 %v9241_v8 }
 0xa13   :  { %6420 = vmatpush3.msra.mxu0 %v9241_v8 }
 0xa14   :  { %6422 = vmatmul.mubr.msk.f32.vlgmr.msra.gmra.mxu0 %vm105_vm0, %v8846_v4 }
 0xa15   :  { %6424 = vmatprep.mubr.msk.f32.mxu0 %vm105_vm0, %v8853_v28 }
 0xa18   :  { %6425 = vmatmul.mubr.msk.f32.gmra.mxu0 %vm105_vm0, %v8860_v49 }
 0xa19   :  { %6427 = vmatprep.mubr.msk.f32.mxu0 %vm105_vm0, %v8867_v24 }
 0xa1c   :  { %6428 = vmatmul.mubr.msk.f32.gmra.mxu0 %vm105_vm0, %v8874_v32  ;;  %v9288_v32 = vld [vmem:[%s10135_s4 + $0x68] sm:$0xff] }
 0xa1d   :  { %6430 = vmatprep.mubr.msk.f32.mxu0 %vm105_vm0, %v8881_v52  ;;  %v2848_v52 = vadd.f32 %v9288_v32, %v9114_v30 }
 0xa1f   :  { %v5442_v30 = vmul.f32 -1.442695, %v2848_v52 }
 0xa20   :  { %6431 = vmatmul.mubr.msk.f32.gmra.mxu0 %vm105_vm0, %v8888_v36  ;;  %v9295_v36 = vld [vmem:[%s10135_s4 + $0x78] sm:$0xff] }
 0xa21   :  { %6433 = vmatprep.mubr.msk.f32.mxu0 %vm105_vm0, %v8895_v6  ;;  %v2858_v6 = vadd.f32 %v9295_v36, %v9139_v63  ;;  %7065 = vpow2.f32 %v5442_v30 }
 0xa23   :  { %v5444_v54 = vmul.f32 -1.442695, %v2858_v6 }
 0xa24   :  { %6434 = vmatmul.mubr.msk.f32.gmra.mxu0 %vm105_vm0, %v8902_v10 }
 0xa25   :  { %6436 = vmatprep.mubr.msk.f32.mxu0 %vm105_vm0, %v8909_v38  ;;  %v9304_v38 = vld [vmem:[%s10135_s4 + $0x70] sm:$0xff]  ;;  %7067 = vpow2.f32 %v5444_v54  ;;  %v2892_v54 = vpop.f32.mrf.mxu1 }
 0xa28   :  { %6437 = vmatmul.mubr.msk.f32.gmra.mxu0 %vm105_vm0, %v8916_v61  ;;  %v2853_v61 = vadd.f32 %v9304_v38, %v9141_v51 }
 0xa29   :  { %6487 = vmatprep.mubr.msk.f32.mxu0 %vm105_vm0, %v9273_v9 }
 0xa2a   :  { %v5443_v29 = vmul.f32 -1.442695, %v2853_v61 }
 0xa2c   :  { %7069 = vpow2.f32 %v5443_v29 }
 0xa2e   :  { %v7066_v52 = vpop.eup %7065 }
 0xa2f   :  { %v2914_v30 = vadd.f32 1.0, %v7066_v52 }
 0xacc   :  { %v9277_v40 = vpop.f32.mrf.mxu0 }
 0xace   :  { %v9279_v4 = vpop.f32.mrf.mxu0 }
 0xad0   :  { %v6412_v28 = vpop.f32.mrf.mxu0 }
 0xad2   :  { %v9281_v49 = vpop.f32.mrf.mxu0 }
 0xad4   :  { %v9283_v24 = vpop.f32.mrf.mxu0 }
 0xad6   :  { %v9299_v10 = vpop.f32.mrf.mxu0 }
 0xad8   :  { %v9308_v45 = vpop.f32.mrf.mxu0 }
 0xada   :  { %v9310_v33 = vpop.f32.mrf.mxu0 }
 0xadc   :  { %v6429_v22 = vpop.f32.mrf.mxu0 }
 0xadd   :  { %v3154_v63 = vadd.f32 %v8943_v16, %v6429_v22  ;;  %v5441_v16 = vmul.f32 -1.442695, %v2843_v31 }
 0xade   :  { %v3148_v51 = vpop.f32.mrf.mxu0 }
 0xadf   :  { %v5470_v3 = vmul.f32 -1.442695, %v3154_v63  ;;  %v3149_v35 = vadd.f32 %v8951_v17, %v3148_v51  ;;  %v7068_v17 = vpop.eup %7067  ;;  %v9332_v63 = vld [vmem:[%s10135_s4 + $0xb0] sm:$0xff] }
 0xae0   :  { %v6432_v25 = vpop.f32.mrf.mxu0  ;;  %v7070_v6 = vpop.eup %7069  ;;  %v2893_v31 = vadd.f32 %v9332_v63, %v2892_v54 }
 0xae1   :  { %v5469_v57 = vmul.f32 -1.442695, %v3149_v35  ;;  %v3164_v13 = vadd.f32 %v8957_v14, %v6432_v25  ;;  %7071 = vpow2.f32 %v5470_v3  ;;  %v9326_v14 = vld [vmem:[%s10135_s4 + $0xb8] sm:$0xff]  ;;  %v2915_v22 = vadd.f32 1.0, %v7070_v6 }
 0xae2   :  { %v3158_v15 = vpop.f32.mrf.mxu0  ;;  %v2898_v61 = vadd.f32 %v9326_v14, %v6398_v27 }
 0xae3   :  { %v5472_v56 = vmul.f32 -1.442695, %v3164_v13  ;;  %v3159_v53 = vadd.f32 %v8963_v48, %v3158_v15  ;;  %7073 = vpow2.f32 %v5469_v57  ;;  %v2916_v48 = vadd.f32 1.0, %v7068_v17  ;;  %v9338_v13 = vld [vmem:[%s10135_s4 + $0xa8] sm:$0xff] }
 0xae4   :  { %v3041_v51 = vadd.f32 %v6412_v28, %v2898_v61  ;;  %v9345_v28 = vld [vmem:[%s10135_s4 + $0xa0] sm:$0xff] }
 0xae5   :  { %7075 = vpow2.f32 %v5472_v56  ;;  %v5471_v42 = vmul.f32 -1.442695, %v3159_v53  ;;  %v3040_v53 = vadd.f32 %v9281_v49, %v2893_v31 }
 0xae6   :  { %7077 = vpow2.f32 %v5441_v16  ;;  %v2888_v16 = vadd.f32 %v9338_v13, %v6395_v19 }
 0xae7   :  { %7079 = vpow2.f32 %v5471_v42  ;;  %v2883_v42 = vadd.f32 %v9345_v28, %v2882_v11 }
 0xae8   :  { %7081 = vrcp.f32 %v2914_v30  ;;  %v3039_v6 = vadd.f32 %v9277_v40, %v2888_v16 }
 0xae9   :  { %7083 = vrcp.f32 %v2916_v48  ;;  %v3038_v19 = vadd.f32 %v9279_v4, %v2883_v42 }
 0xaea   :  { %7085 = vrcp.f32 %v2915_v22 }
 0xaeb   :  { %7087 = vtanh.f32 %v3041_v51 }
 0xaee   :  { %v7072_v29 = vpop.eup %7071 }
 0xaef   :  { %v3224_v25 = vadd.f32 1.0, %v7072_v29 }
 0xaf0   :  { %v7074_v3 = vpop.eup %7073 }
 0xaf1   :  { %v3223_v27 = vadd.f32 1.0, %v7074_v3 }
 0xaf2   :  { %v7076_v35 = vpop.eup %7075 }
 0xaf3   :  { %v7078_v57 = vpop.eup %7077  ;;  %v3226_v15 = vadd.f32 1.0, %v7076_v35 }
 0xaf4   :  { %v7080_v56 = vpop.eup %7079  ;;  %v2913_v17 = vadd.f32 1.0, %v7078_v57 }
 0xaf5   :  { %7089 = vrcp.f32 %v3226_v15  ;;  %v3225_v52 = vadd.f32 1.0, %v7080_v56  ;;  %v7082_v49 = vpop.eup %7081 }
 0xaf6   :  { %7091 = vrcp.f32 %v3224_v25  ;;  %v7084_v61 = vpop.eup %7083  ;;  %v3047_v42 = vsub.f32 1.0, %v7082_v49 }
 0xaf7   :  { %7093 = vrcp.f32 %v3225_v52  ;;  %v7086_v30 = vpop.eup %7085  ;;  %v3049_v51 = vsub.f32 1.0, %v7084_v61 }
 0xaf8   :  { %7095 = vtanh.f32 %v3040_v53  ;;  %v7088_v54 = vpop.eup %7087  ;;  %v3048_v57 = vsub.f32 1.0, %v7086_v30 }
 0xaf9   :  { %7097 = vrcp.f32 %v3223_v27  ;;  %v3057_v25 = vmul.f32 %v7088_v54, %v7084_v61  ;;  %v3053_v56 = vmul.f32 %v3049_v51, %v8977_v0  ;;  %v3051_v0 = vmul.f32 %v3047_v42, %v9000_v60  ;;  %v10272_v60 = vld [vmem:[#allocation4_spill] sm:$0xff] }
 0xafa   :  { %7099 = vrcp.f32 %v2913_v17  ;;  %v3052_v17 = vmul.f32 %v3048_v57, %v8988_v50  ;;  %v10281_v42 = vld [vmem:[#allocation12_spill] sm:$0xff] }
 0xafb   :  { %7101 = vtanh.f32 %v3039_v6  ;;  %v9355_v52 = vadd.f32 %v3057_v25, %v3053_v56  ;;  %v6435_v56 = vpop.f32.mrf.mxu0 }
 0xafc   :  { %7103 = vtanh.f32 %v3038_v19 }
 0xb02   :  { %v7090_v11 = vpop.eup %7089 }
 0xb03   :  { %v7092_v48 = vpop.eup %7091  ;;  %v3238_v29 = vmul.f32 %v7090_v11, %v9206_v47  ;;  %v10277_v11 = vld [vmem:[#allocation8_spill] sm:$0xff] }
 0xb04   :  { %v7094_v22 = vpop.eup %7093  ;;  %v3236_v35 = vmul.f32 %v7092_v48, %v9229_v55  ;;  %v3139_v48 = vadd.f32 %v10277_v11, %v9310_v33 }
 0xb05   :  { %v7096_v31 = vpop.eup %7095  ;;  %6439 = vmatprep.subr.mxu1 %v3238_v29  ;;  %v3237_v40 = vmul.f32 %v7094_v22, %v9217_v43 }
 0xb06   :  { %v7098_v3 = vpop.eup %7097  ;;  %6440 = vmatpush3.msra.mxu1 %v3238_v29  ;;  %v3056_v53 = vmul.f32 %v7096_v31, %v7086_v30  ;;  %v5467_v51 = vmul.f32 -1.442695, %v3139_v48 }
 0xb07   :  { %v7100_v4 = vpop.eup %7099  ;;  %6441 = vmatprep.subr.mxu1 %v3237_v40  ;;  %v3235_v15 = vmul.f32 %v7098_v3, %v9241_v8 }
 0xb08   :  { %v7102_v16 = vpop.eup %7101  ;;  %6442 = vmatpush3.msra.mxu1 %v3237_v40  ;;  %v3046_v19 = vsub.f32 1.0, %v7100_v4  ;;  %v9361_v61 = vadd.f32 %v3056_v53, %v3052_v17 }
 0xb09   :  { %6443 = vmatprep.subr.mxu1 %v3236_v35  ;;  %v7104_v27 = vpop.eup %7103  ;;  %v3055_v6 = vmul.f32 %v7102_v16, %v7082_v49  ;;  %v10280_v16 = vld [vmem:[#allocation11_spill] sm:$0xff] }
 0xb0a   :  { %6444 = vmatpush3.msra.mxu1 %v3236_v35  ;;  %v3054_v30 = vmul.f32 %v7104_v27, %v7100_v4  ;;  %v3050_v49 = vmul.f32 %v3046_v19, %v9012_v20  ;;  %v10274_v20 = vld [vmem:[#allocation6_spill] sm:$0xff]  ;;  %v10278_v4 = vld [vmem:[#allocation9_spill] sm:$0xff] }
 0xb0b   :  { %6445 = vmatprep.subr.mxu1 %v3235_v15  ;;  %v9368_v50 = vadd.f32 %v3055_v6, %v3051_v0  ;;  %v10282_v0 = vld [vmem:[#allocation13_spill] sm:$0xff] }
 0xb0c   :  { %6446 = vmatpush3.msra.mxu1 %v3235_v15 }
 0xb0d   :  { %6448 = vmatmul.mubr.msk.f32.vlgmr.msra.gmra.mxu1 %vm105_vm0, %v8983_v62  ;;  %6453 = vmatprep.subr.mxu1 %v9355_v52  ;;  %v9375_v62 = vadd.f32 %v3054_v30, %v3050_v49  ;;  %v3168_v49 = vpop.f32.mrf.mxu0 }
 0xb0e   :  { %6454 = vmatpush3.msra.mxu1 %v9355_v52  ;;  %6450 = vmatprep.mubr.msk.f32.mxu1 %vm105_vm0, %v8995_v5  ;;  %v10271_v5 = vld [vmem:[#allocation17_spill] sm:$0xff] }
 0xb0f   :  { %6455 = vmatprep.subr.mxu1 %v9361_v61 }
 0xb10   :  { %6456 = vmatpush3.msra.mxu1 %v9361_v61 }
 0xb11   :  { %6451 = vmatmul.mubr.msk.f32.gmra.mxu1 %vm105_vm0, %v9007_v44  ;;  %6457 = vmatprep.subr.mxu1 %v9368_v50  ;;  %v10273_v44 = vld [vmem:[#allocation5_spill] sm:$0xff] }
 0xb12   :  { %6458 = vmatpush3.msra.mxu1 %v9368_v50  ;;  %6461 = vmatprep.mubr.msk.f32.mxu1 %vm105_vm0, %v9018_v41 }
 0xb13   :  { %6459 = vmatprep.subr.mxu1 %v9375_v62 }
 0xb14   :  { %6460 = vmatpush3.msra.mxu1 %v9375_v62 }
 0xb15   :  { %6462 = vmatmul.mubr.msk.f32.vlgmr.msra.gmra.mxu1 %vm105_vm0, %v9027_v2 }
 0xb16   :  { %6464 = vmatprep.mubr.msk.f32.mxu1 %vm105_vm0, %v9034_v18 }
 0xb19   :  { %6465 = vmatmul.mubr.msk.f32.gmra.mxu1 %vm105_vm0, %v9041_v26 }
 0xb1a   :  { %6467 = vmatprep.mubr.msk.f32.mxu1 %vm105_vm0, %v9048_v46 }
 0xb1d   :  { %6468 = vmatmul.mubr.msk.f32.gmra.mxu1 %vm105_vm0, %v9055_v12  ;;  %v10275_v12 = vld [vmem:[#allocation7_spill] sm:$0xff] }
 0xb1e   :  { %6470 = vmatprep.mubr.msk.f32.mxu1 %vm105_vm0, %v9062_v23  ;;  %v3134_v23 = vadd.f32 %v10275_v12, %v9283_v24  ;;  %v10279_v24 = vld [vmem:[#allocation10_spill] sm:$0xff] }
 0xb1f   :  { %v3129_v25 = vadd.f32 %v10279_v24, %v9299_v10  ;;  %v10283_v24 = vld [vmem:[#allocation14_spill] sm:$0xff] }
 0xb20   :  { %v5466_v22 = vmul.f32 -1.442695, %v3134_v23 }
 0xb21   :  { %6471 = vmatmul.mubr.msk.f32.gmra.mxu1 %vm105_vm0, %v9069_v59  ;;  %v10276_v59 = vld [vmem:[#allocation3_spill] sm:$0xff]  ;;  %v5465_v17 = vmul.f32 -1.442695, %v3129_v25  ;;  %v3174_v25 = vadd.f32 %v10283_v24, %v6435_v56 }
 0xb22   :  { %6473 = vmatprep.mubr.msk.f32.mxu1 %vm105_vm0, %v9076_v58  ;;  %v3144_v58 = vadd.f32 %v10276_v59, %v9308_v45  ;;  %7105 = vpow2.f32 %v5466_v22 }
 0xb24   :  { %v5468_v31 = vmul.f32 -1.442695, %v3144_v58 }
 0xb25   :  { %6474 = vmatmul.mubr.msk.f32.gmra.mxu1 %vm105_vm0, %v10271_v5  ;;  %v6438_v5 = vpop.f32.mrf.mxu0 }
 0xb26   :  { %6476 = vmatprep.mubr.msk.f32.mxu1 %vm105_vm0, %v10272_v60  ;;  %7107 = vpow2.f32 %v5468_v31  ;;  %v3184_v12 = vadd.f32 %v9177_v39, %v6438_v5 }
 0xb27   :  { %7109 = vpow2.f32 %v5467_v51  ;;  %v3178_v59 = vpop.f32.mrf.mxu0 }
 0xb28   :  { %v3179_v22 = vadd.f32 %v9183_v34, %v3178_v59 }
 0xb29   :  { %6477 = vmatmul.mubr.msk.f32.gmra.mxu1 %vm105_vm0, %v10273_v44 }
 0xb2a   :  { %6527 = vmatprep.mubr.msk.f32.mxu1 %vm105_vm0, %v10274_v20 }
 0xb2f   :  { %v7106_v60 = vpop.eup %7105 }
 0xb30   :  { %v3200_v23 = vadd.f32 1.0, %v7106_v60 }
 0xb33   :  { %v7108_v44 = vpop.eup %7107 }
 0xb34   :  { %v7110_v20 = vpop.eup %7109  ;;  %v3202_v58 = vadd.f32 1.0, %v7108_v44 }
 0xb35   :  { %v3201_v48 = vadd.f32 1.0, %v7110_v20 }
 0xbcd   :  { %v9406_v41 = vpop.f32.mrf.mxu1 }
 0xbcf   :  { %v9408_v2 = vpop.f32.mrf.mxu1 }
 0xbd1   :  { %v6452_v18 = vpop.f32.mrf.mxu1 }
 0xbd2   :  { %v3327_v31 = vadd.f32 %v6452_v18, %v3184_v12  ;;  %v3325_v18 = vadd.f32 %v9406_v41, %v3174_v25  ;;  %v9497_v25 = vld [vmem:[%s10133_s3 + $0x20] sm:$0xff] }
 0xbd3   :  { %v3315_v26 = vpop.f32.mrf.mxu1 }
 0xbd4   :  { %v3326_v39 = vadd.f32 %v3315_v26, %v3179_v22 }
 0xbd5   :  { %v9410_v46 = vpop.f32.mrf.mxu1 }
 0xbd7   :  { %v9416_v54 = vpop.f32.mrf.mxu1 }
 0xbd9   :  { %v9420_v29 = vpop.f32.mrf.mxu1 }
 0xbdb   :  { %v9422_v40 = vpop.f32.mrf.mxu1 }
 0xbdd   :  { %v6469_v3 = vpop.f32.mrf.mxu1 }
 0xbde   :  { %v3440_v35 = vadd.f32 %v10278_v4, %v6469_v3 }
 0xbdf   :  { %v3434_v45 = vpop.f32.mrf.mxu1 }
 0xbe0   :  { %v5494_v57 = vmul.f32 -1.442695, %v3440_v35  ;;  %v3435_v33 = vadd.f32 %v10280_v16, %v3434_v45  ;;  %v10284_v16 = vld [vmem:[#allocation15_spill] sm:$0xff] }
 0xbe1   :  { %v6472_v15 = vpop.f32.mrf.mxu1 }
 0xbe2   :  { %v5493_v53 = vmul.f32 -1.442695, %v3435_v33  ;;  %v3450_v27 = vadd.f32 %v10281_v42, %v6472_v15  ;;  %7111 = vpow2.f32 %v5494_v57  ;;  %v3169_v33 = vadd.f32 %v10284_v16, %v3168_v49  ;;  %v9525_v16 = vld [vmem:[%s10133_s3 + $0x40] sm:$0xff] }
 0xbe3   :  { %v3444_v6 = vpop.f32.mrf.mxu1 }
 0xbe4   :  { %v5496_v19 = vmul.f32 -1.442695, %v3450_v27  ;;  %v3445_v30 = vadd.f32 %v10282_v0, %v3444_v6  ;;  %7113 = vpow2.f32 %v5493_v53  ;;  %v3324_v42 = vadd.f32 %v9408_v2, %v3169_v33  ;;  %v9532_v33 = vld [vmem:[%s10133_s3 + $0x48] sm:$0xff] }
 0xbe6   :  { %7115 = vpow2.f32 %v5496_v19  ;;  %v5495_v10 = vmul.f32 -1.442695, %v3445_v30 }
 0xbe7   :  { %7117 = vpow2.f32 %v5465_v17 }
 0xbe8   :  { %7119 = vpow2.f32 %v5495_v10 }
 0xbe9   :  { %7121 = vrcp.f32 %v3200_v23 }
 0xbea   :  { %7123 = vrcp.f32 %v3202_v58 }
 0xbeb   :  { %7125 = vrcp.f32 %v3201_v48 }
 0xbec   :  { %7127 = vtanh.f32 %v3327_v31 }
 0xbef   :  { %v7112_v11 = vpop.eup %7111 }
 0xbf0   :  { %v3510_v4 = vadd.f32 1.0, %v7112_v11 }
 0xbf1   :  { %v7114_v51 = vpop.eup %7113 }
 0xbf2   :  { %v3509_v15 = vadd.f32 1.0, %v7114_v51 }
 0xbf3   :  { %v7116_v3 = vpop.eup %7115 }
 0xbf4   :  { %v7118_v35 = vpop.eup %7117  ;;  %v3512_v45 = vadd.f32 1.0, %v7116_v3 }
 0xbf5   :  { %v7120_v57 = vpop.eup %7119  ;;  %v3199_v34 = vadd.f32 1.0, %v7118_v35 }
 0xbf6   :  { %7129 = vrcp.f32 %v3512_v45  ;;  %v3511_v53 = vadd.f32 1.0, %v7120_v57  ;;  %v7122_v56 = vpop.eup %7121  ;;  %v9504_v45 = vld [vmem:[%s10133_s3 + $0x28] sm:$0xff]  ;;  %v9511_v57 = vld [vmem:[%s10133_s3 + $0x30] sm:$0xff] }
 0xbf7   :  { %7131 = vrcp.f32 %v3510_v4  ;;  %v7124_v27 = vpop.eup %7123  ;;  %v3333_v11 = vsub.f32 1.0, %v7122_v56 }
 0xbf8   :  { %7133 = vrcp.f32 %v3511_v53  ;;  %v7126_v26 = vpop.eup %7125  ;;  %v3335_v10 = vsub.f32 1.0, %v7124_v27  ;;  %v9546_v53 = vld [vmem:[%s10133_s3 + $0x58] sm:$0xff] }
 0xbf9   :  { %7135 = vtanh.f32 %v3326_v39  ;;  %v7128_v17 = vpop.eup %7127  ;;  %v3334_v20 = vsub.f32 1.0, %v7126_v26  ;;  %v9518_v39 = vld [vmem:[%s10133_s3 + $0x38] sm:$0xff] }
 0xbfa   :  { %7137 = vrcp.f32 %v3509_v15  ;;  %v3343_v44 = vmul.f32 %v7128_v17, %v7124_v27  ;;  %v3339_v59 = vmul.f32 %v3335_v10, %v9206_v47  ;;  %v3337_v47 = vmul.f32 %v3333_v11, %v9229_v55  ;;  %v9476_v55 = vld [vmem:[%s10133_s3 + $0x8] sm:$0xff]  ;;  %v9539_v15 = vld [vmem:[%s10133_s3 + $0x50] sm:$0xff] }
 0xbfb   :  { %7139 = vrcp.f32 %v3199_v34  ;;  %v3338_v31 = vmul.f32 %v3334_v20, %v9217_v43  ;;  %v3430_v17 = vadd.f32 %v9295_v36, %v9420_v29  ;;  %v9587_v20 = vld [vmem:[%s10135_s4 + $0x38] sm:$0xff] }
 0xbfc   :  { %7141 = vtanh.f32 %v3325_v18  ;;  %v9441_v22 = vadd.f32 %v3343_v44, %v3339_v59  ;;  %v9593_v59 = vld [vmem:[%s10135_s4 + $0x30] sm:$0xff] }
 0xbfd   :  { %7143 = vtanh.f32 %v3324_v42 }
 0xc03   :  { %v7130_v6 = vpop.eup %7129 }
 0xc04   :  { %v7132_v19 = vpop.eup %7131  ;;  %v3524_v0 = vmul.f32 %v7130_v6, %v9355_v52 }
 0xc05   :  { %v7134_v30 = vpop.eup %7133  ;;  %v3522_v60 = vmul.f32 %v7132_v19, %v9368_v50  ;;  %v3425_v19 = vadd.f32 %v9304_v38, %v9422_v40  ;;  %v9581_v40 = vld [vmem:[%s10135_s4 + $0x20] sm:$0xff] }
 0xc06   :  { %v7136_v49 = vpop.eup %7135  ;;  %6479 = vmatprep.subr.mxu0 %v3524_v0  ;;  %v3523_v41 = vmul.f32 %v7134_v30, %v9361_v61  ;;  %v5492_v30 = vmul.f32 -1.442695, %v3430_v17 }
 0xc07   :  { %v7138_v5 = vpop.eup %7137  ;;  %6480 = vmatpush3.msra.mxu0 %v3524_v0  ;;  %v3342_v58 = vmul.f32 %v7136_v49, %v7126_v26  ;;  %v3420_v26 = vadd.f32 %v9288_v32, %v9410_v46  ;;  %v9573_v32 = vld [vmem:[%s10135_s4 + $0x28] sm:$0xff]  ;;  %v3415_v46 = vadd.f32 %v9316_v7, %v9416_v54 }
 0xc08   :  { %v7140_v2 = vpop.eup %7139  ;;  %6481 = vmatprep.subr.mxu0 %v3523_v41  ;;  %v3521_v23 = vmul.f32 %v7138_v5, %v9375_v62 }
 0xc09   :  { %v7142_v12 = vpop.eup %7141  ;;  %6482 = vmatpush3.msra.mxu0 %v3523_v41  ;;  %v3332_v3 = vsub.f32 1.0, %v7140_v2  ;;  %v9447_v4 = vadd.f32 %v3342_v58, %v3338_v31  ;;  %v5490_v0 = vmul.f32 -1.442695, %v3420_v26  ;;  %v5491_v41 = vmul.f32 -1.442695, %v3425_v19 }
 0xc0a   :  { %6483 = vmatprep.subr.mxu0 %v3522_v60  ;;  %v7144_v48 = vpop.eup %7143  ;;  %v3341_v51 = vmul.f32 %v7142_v12, %v7122_v56  ;;  %v5489_v54 = vmul.f32 -1.442695, %v3415_v46 }
 0xc0b   :  { %6484 = vmatpush3.msra.mxu0 %v3522_v60  ;;  %v3340_v35 = vmul.f32 %v7144_v48, %v7140_v2  ;;  %v3336_v24 = vmul.f32 %v3332_v3, %v9241_v8  ;;  %v9490_v8 = vld [vmem:[%s10133_s3 + $0x18] sm:$0xff]  ;;  %7145 = vpow2.f32 %v5490_v0  ;;  %v6475_v60 = vpop.f32.mrf.mxu1 }
 0xc0c   :  { %6485 = vmatprep.subr.mxu0 %v3521_v23  ;;  %v9454_v43 = vadd.f32 %v3341_v51, %v3337_v47  ;;  %7147 = vpow2.f32 %v5492_v30 }
 0xc0d   :  { %6486 = vmatpush3.msra.mxu0 %v3521_v23  ;;  %7149 = vpow2.f32 %v5491_v41  ;;  %v3454_v11 = vpop.f32.mrf.mxu1 }
 0xc0e   :  { %6488 = vmatmul.mubr.msk.f32.vlgmr.msra.gmra.mxu0 %vm105_vm0, %v9212_v21  ;;  %6493 = vmatprep.subr.mxu0 %v9441_v22  ;;  %v9461_v21 = vadd.f32 %v3340_v35, %v3336_v24 }
 0xc0f   :  { %6494 = vmatpush3.msra.mxu0 %v9441_v22  ;;  %6490 = vmatprep.mubr.msk.f32.mxu0 %vm105_vm0, %v9224_v1  ;;  %v9467_v1 = vld [vmem:[%s10133_s3] sm:$0xff]  ;;  %v6478_v31 = vpop.f32.mrf.mxu1 }
 0xc10   :  { %6495 = vmatprep.subr.mxu0 %v9447_v4  ;;  %v3470_v35 = vadd.f32 %v9326_v14, %v6478_v31 }
 0xc11   :  { %6496 = vmatpush3.msra.mxu0 %v9447_v4  ;;  %v3464_v26 = vpop.f32.mrf.mxu1 }
 0xc12   :  { %6491 = vmatmul.mubr.msk.f32.gmra.mxu0 %vm105_vm0, %v9236_v37  ;;  %6497 = vmatprep.subr.mxu0 %v9454_v43  ;;  %v9483_v37 = vld [vmem:[%s10133_s3 + $0x10] sm:$0xff]  ;;  %v3465_v30 = vadd.f32 %v9332_v63, %v3464_v26 }
 0xc13   :  { %6498 = vmatpush3.msra.mxu0 %v9454_v43  ;;  %6501 = vmatprep.mubr.msk.f32.mxu0 %vm105_vm0, %v9467_v1 }
 0xc14   :  { %6499 = vmatprep.subr.mxu0 %v9461_v21 }
 0xc15   :  { %6500 = vmatpush3.msra.mxu0 %v9461_v21 }
 0xc16   :  { %6502 = vmatmul.mubr.msk.f32.vlgmr.msra.gmra.mxu0 %vm105_vm0, %v9476_v55 }
 0xc17   :  { %6504 = vmatprep.mubr.msk.f32.mxu0 %vm105_vm0, %v9483_v37 }
 0xc18   :  { %v7146_v51 = vpop.eup %7145 }
 0xc19   :  { %v7148_v3 = vpop.eup %7147  ;;  %v3486_v24 = vadd.f32 1.0, %v7146_v51 }
 0xc1a   :  { %6505 = vmatmul.mubr.msk.f32.gmra.mxu0 %vm105_vm0, %v9490_v8  ;;  %v7150_v47 = vpop.eup %7149  ;;  %v3488_v17 = vadd.f32 1.0, %v7148_v3 }
 0xc1b   :  { %6507 = vmatprep.mubr.msk.f32.mxu0 %vm105_vm0, %v9497_v25  ;;  %v3487_v0 = vadd.f32 1.0, %v7150_v47 }
 0xc1e   :  { %6508 = vmatmul.mubr.msk.f32.gmra.mxu0 %vm105_vm0, %v9504_v45 }
 0xc1f   :  { %6510 = vmatprep.mubr.msk.f32.mxu0 %vm105_vm0, %v9511_v57 }
 0xc22   :  { %6511 = vmatmul.mubr.msk.f32.gmra.mxu0 %vm105_vm0, %v9518_v39 }
 0xc23   :  { %6513 = vmatprep.mubr.msk.f32.mxu0 %vm105_vm0, %v9525_v16 }
 0xc26   :  { %6514 = vmatmul.mubr.msk.f32.gmra.mxu0 %vm105_vm0, %v9532_v33 }
 0xc27   :  { %6516 = vmatprep.mubr.msk.f32.mxu0 %vm105_vm0, %v9539_v15 }
 0xc2a   :  { %6517 = vmatmul.mubr.msk.f32.gmra.mxu0 %vm105_vm0, %v9546_v53 }
 0xc2b   :  { %6567 = vmatprep.mubr.msk.f32.mxu0 %vm105_vm0, %v9273_v9 }
 0xcce   :  { %v9552_v34 = vpop.f32.mrf.mxu0 }
 0xcd0   :  { %v9554_v18 = vpop.f32.mrf.mxu0 }
 0xcd2   :  { %v6492_v42 = vpop.f32.mrf.mxu0 }
 0xcd3   :  { %v3613_v41 = vadd.f32 %v6492_v42, %v3470_v35 }
 0xcd4   :  { %v3601_v56 = vpop.f32.mrf.mxu0 }
 0xcd5   :  { %v3612_v14 = vadd.f32 %v3601_v56, %v3465_v30 }
 0xcd6   :  { %v9556_v27 = vpop.f32.mrf.mxu0 }
 0xcd8   :  { %v9562_v6 = vpop.f32.mrf.mxu0 }
 0xcda   :  { %v9566_v9 = vpop.f32.mrf.mxu0 }
 0xcdc   :  { %v9568_v49 = vpop.f32.mrf.mxu0 }
 0xcde   :  { %v6509_v10 = vpop.f32.mrf.mxu0 }
 0xcdf   :  { %v3726_v36 = vadd.f32 %v9573_v32, %v6509_v10 }
 0xce0   :  { %v3720_v38 = vpop.f32.mrf.mxu0 }
 0xce1   :  { %v5518_v29 = vmul.f32 -1.442695, %v3726_v36  ;;  %v3721_v5 = vadd.f32 %v9581_v40, %v3720_v38 }
 0xce2   :  { %v6512_v2 = vpop.f32.mrf.mxu0 }
 0xce3   :  { %v5517_v44 = vmul.f32 -1.442695, %v3721_v5  ;;  %v3736_v7 = vadd.f32 %v9587_v20, %v6512_v2  ;;  %7151 = vpow2.f32 %v5518_v29  ;;  %v3460_v29 = vadd.f32 %v9338_v13, %v6475_v60 }
 0xce4   :  { %v3730_v12 = vpop.f32.mrf.mxu0 }
 0xce5   :  { %v5520_v23 = vmul.f32 -1.442695, %v3736_v7  ;;  %v3731_v58 = vadd.f32 %v9593_v59, %v3730_v12  ;;  %7153 = vpow2.f32 %v5517_v44  ;;  %v3455_v44 = vadd.f32 %v9345_v28, %v3454_v11 }
 0xce6   :  { %v3611_v42 = vadd.f32 %v9552_v34, %v3460_v29  ;;  %v9613_v29 = vld [vmem:[%s10134_s5 + $0x8] sm:$0xff] }
 0xce7   :  { %7155 = vpow2.f32 %v5520_v23  ;;  %v5519_v48 = vmul.f32 -1.442695, %v3731_v58  ;;  %v3610_v12 = vadd.f32 %v9554_v18, %v3455_v44 }
 0xce8   :  { %7157 = vpow2.f32 %v5489_v54 }
 0xce9   :  { %7159 = vpow2.f32 %v5519_v48 }
 0xcea   :  { %7161 = vrcp.f32 %v3486_v24 }
 0xceb   :  { %7163 = vrcp.f32 %v3488_v17 }
 0xcec   :  { %7165 = vrcp.f32 %v3487_v0 }
 0xced   :  { %7167 = vtanh.f32 %v3613_v41 }
 0xcf0   :  { %v7152_v19 = vpop.eup %7151 }
 0xcf1   :  { %v3796_v46 = vadd.f32 1.0, %v7152_v19 }
 0xcf2   :  { %v7154_v10 = vpop.eup %7153 }
 0xcf3   :  { %v3795_v7 = vadd.f32 1.0, %v7154_v10 }
 0xcf4   :  { %v7156_v36 = vpop.eup %7155 }
 0xcf5   :  { %v7158_v38 = vpop.eup %7157  ;;  %v3798_v5 = vadd.f32 1.0, %v7156_v36 }
 0xcf6   :  { %v7160_v2 = vpop.eup %7159  ;;  %v3485_v63 = vadd.f32 1.0, %v7158_v38 }
 0xcf7   :  { %7169 = vrcp.f32 %v3798_v5  ;;  %v3797_v54 = vadd.f32 1.0, %v7160_v2  ;;  %v7162_v13 = vpop.eup %7161 }
 0xcf8   :  { %7171 = vrcp.f32 %v3796_v46  ;;  %v7164_v60 = vpop.eup %7163  ;;  %v3619_v30 = vsub.f32 1.0, %v7162_v13 }
 0xcf9   :  { %7173 = vrcp.f32 %v3797_v54  ;;  %v7166_v56 = vpop.eup %7165  ;;  %v3621_v51 = vsub.f32 1.0, %v7164_v60  ;;  %v9657_v54 = vld [vmem:[%s10133_s3 + $0x68] sm:$0xff] }
 0xcfa   :  { %7175 = vtanh.f32 %v3612_v14  ;;  %v7168_v23 = vpop.eup %7167  ;;  %v3620_v24 = vsub.f32 1.0, %v7166_v56  ;;  %v3623_v5 = vmul.f32 %v3619_v30, %v9368_v50  ;;  %v9637_v50 = vld [vmem:[%s10134_s5 + $0x18] sm:$0xff] }
 0xcfb   :  { %7177 = vrcp.f32 %v3795_v7  ;;  %v3629_v35 = vmul.f32 %v7168_v23, %v7164_v60  ;;  %v3625_v19 = vmul.f32 %v3621_v51, %v9355_v52  ;;  %v9692_v60 = vld [vmem:[%s10133_s3 + $0x90] sm:$0xff]  ;;  %v9706_v23 = vld [vmem:[%s10133_s3 + $0xa0] sm:$0xff] }
 0xcfc   :  { %7179 = vrcp.f32 %v3485_v63  ;;  %v3624_v36 = vmul.f32 %v3620_v24, %v9361_v61  ;;  %v9625_v61 = vld [vmem:[%s10134_s5 + $0x10] sm:$0xff]  ;;  %v9753_v24 = vld [vmem:[%s10135_s4 + $0x18] sm:$0xff] }
 0xcfd   :  { %7181 = vtanh.f32 %v3611_v42  ;;  %v9607_v10 = vadd.f32 %v3629_v35, %v3625_v19  ;;  %v9664_v63 = vld [vmem:[%s10133_s3 + $0x70] sm:$0xff]  ;;  %v9671_v42 = vld [vmem:[%s10133_s3 + $0x78] sm:$0xff]  ;;  %10289 = vst [vmem:[#allocation6_spill] sm:$0xff] %v9753_v24 }
 0xcfe   :  { %7183 = vtanh.f32 %v3610_v12  ;;  %v9678_v12 = vld [vmem:[%s10133_s3 + $0x80] sm:$0xff]  ;;  %v9762_v19 = vld [vmem:[%s10135_s4 + $0x10] sm:$0xff] }
 0xcff   :  { %10290 = vst [vmem:[#allocation7_spill] sm:$0xff] %v9762_v19 }
 0xd04   :  { %v7170_v28 = vpop.eup %7169 }
 0xd05   :  { %v7172_v58 = vpop.eup %7171  ;;  %v3810_v11 = vmul.f32 %v7170_v28, %v9441_v22  ;;  %v9713_v28 = vld [vmem:[%s10133_s3 + $0xa8] sm:$0xff] }
 0xd06   :  { %v7174_v48 = vpop.eup %7173  ;;  %v3808_v47 = vmul.f32 %v7172_v58, %v9454_v43  ;;  %10285 = vst [vmem:[#allocation16_spill] sm:$0xff] %v9713_v28  ;;  %v9720_v58 = vld [vmem:[%s10133_s3 + $0xb0] sm:$0xff] }
 0xd07   :  { %v7176_v31 = vpop.eup %7175  ;;  %6519 = vmatprep.subr.mxu1 %v3810_v11  ;;  %v3809_v34 = vmul.f32 %v7174_v48, %v9447_v4  ;;  %10286 = vst [vmem:[#allocation17_spill] sm:$0xff] %v9720_v58  ;;  %v7476_v48 = vld [vmem:[%s10134_s5] sm:$0xff] }
 0xd08   :  { %v7178_v3 = vpop.eup %7177  ;;  %6520 = vmatpush3.msra.mxu1 %v3810_v11  ;;  %v3628_v0 = vmul.f32 %v7176_v31, %v7166_v56  ;;  %v9699_v56 = vld [vmem:[%s10133_s3 + $0x98] sm:$0xff] }
 0xd09   :  { %v7180_v18 = vpop.eup %7179  ;;  %6521 = vmatprep.subr.mxu1 %v3809_v34  ;;  %v3807_v17 = vmul.f32 %v7178_v3, %v9461_v21  ;;  %v9727_v11 = vld [vmem:[%s10133_s3 + $0xb8] sm:$0xff] }
 0xd0a   :  { %v7182_v26 = vpop.eup %7181  ;;  %6522 = vmatpush3.msra.mxu1 %v3809_v34  ;;  %v3618_v38 = vsub.f32 1.0, %v7180_v18  ;;  %v9618_v52 = vadd.f32 %v3628_v0, %v3624_v36  ;;  %10287 = vst [vmem:[#allocation4_spill] sm:$0xff] %v9727_v11  ;;  %v3711_v0 = vadd.f32 %v9762_v19, %v9568_v49  ;;  %v9779_v49 = vld [vmem:[%s10135_s4] sm:$0xff] }
 0xd0b   :  { %6523 = vmatprep.subr.mxu1 %v3808_v47  ;;  %v7184_v41 = vpop.eup %7183  ;;  %v3627_v46 = vmul.f32 %v7182_v26, %v7162_v13  ;;  %v9685_v13 = vld [vmem:[%s10133_s3 + $0x88] sm:$0xff]  ;;  %v3716_v26 = vadd.f32 %v9753_v24, %v9566_v9  ;;  %10292 = vst [vmem:[#allocation8_spill] sm:$0xff] %v9779_v49 }
 0xd0c   :  { %6524 = vmatpush3.msra.mxu1 %v3808_v47  ;;  %v3626_v2 = vmul.f32 %v7184_v41, %v7180_v18  ;;  %v3622_v44 = vmul.f32 %v3618_v38, %v9375_v62  ;;  %v9648_v62 = vld [vmem:[%s10133_s3 + $0x60] sm:$0xff]  ;;  %v9746_v47 = vld [vmem:[%s10135_s4 + $0x8] sm:$0xff] }
 0xd0d   :  { %6525 = vmatprep.subr.mxu1 %v3807_v17  ;;  %v9630_v14 = vadd.f32 %v3627_v46, %v3623_v5  ;;  %10288 = vst [vmem:[#allocation5_spill] sm:$0xff] %v9746_v47  ;;  %v3706_v35 = vadd.f32 %v9746_v47, %v9556_v27  ;;  %v5516_v41 = vmul.f32 -1.442695, %v3716_v26  ;;  %v5515_v46 = vmul.f32 -1.442695, %v3711_v0  ;;  %v9773_v9 = vld [vmem:[%s10135_s4 + $0x88] sm:$0xff] }
 0xd0e   :  { %6526 = vmatpush3.msra.mxu1 %v3807_v17  ;;  %v9642_v7 = vadd.f32 %v3626_v2, %v3622_v44  ;;  %10291 = vst [vmem:[#allocation3_spill] sm:$0xff] %v9773_v9  ;;  %v3701_v2 = vadd.f32 %v9779_v49, %v9562_v6  ;;  %v9798_v49 = vld [vmem:[%s10135_s4 + $0x90] sm:$0xff] }
 0xd0f   :  { %6528 = vmatmul.mubr.msk.f32.vlgmr.msra.gmra.mxu1 %vm105_vm0, %v9613_v29  ;;  %6533 = vmatprep.subr.mxu1 %v9607_v10  ;;  %v5514_v27 = vmul.f32 -1.442695, %v3706_v35  ;;  %v9786_v35 = vld [vmem:[%s10135_s4 + $0x80] sm:$0xff]  ;;  %10295 = vst [vmem:[#allocation11_spill] sm:$0xff] %v9798_v49 }
 0xd10   :  { %6534 = vmatpush3.msra.mxu1 %v9607_v10  ;;  %6530 = vmatprep.mubr.msk.f32.mxu1 %vm105_vm0, %v9625_v61  ;;  %10293 = vst [vmem:[#allocation9_spill] sm:$0xff] %v9786_v35 }
 0xd11   :  { %6535 = vmatprep.subr.mxu1 %v9618_v52  ;;  %7185 = vpow2.f32 %v5514_v27  ;;  %v6515_v27 = vpop.f32.mrf.mxu0 }
 0xd12   :  { %6536 = vmatpush3.msra.mxu1 %v9618_v52  ;;  %7187 = vpow2.f32 %v5516_v41  ;;  %v5513_v41 = vmul.f32 -1.442695, %v3701_v2 }
 0xd13   :  { %6531 = vmatmul.mubr.msk.f32.gmra.mxu1 %vm105_vm0, %v9637_v50  ;;  %6537 = vmatprep.subr.mxu1 %v9630_v14  ;;  %7189 = vpow2.f32 %v5515_v46 }
 0xd14   :  { %6538 = vmatpush3.msra.mxu1 %v9630_v14  ;;  %6541 = vmatprep.mubr.msk.f32.mxu1 %vm105_vm0, %v9648_v62 }
 0xd15   :  { %6539 = vmatprep.subr.mxu1 %v9642_v7 }
 0xd16   :  { %6540 = vmatpush3.msra.mxu1 %v9642_v7 }
 0xd17   :  { %6542 = vmatmul.mubr.msk.f32.vlgmr.msra.gmra.mxu1 %vm105_vm0, %v9657_v54 }
 0xd18   :  { %6544 = vmatprep.mubr.msk.f32.mxu1 %vm105_vm0, %v9664_v63 }
 0xd1b   :  { %6545 = vmatmul.mubr.msk.f32.gmra.mxu1 %vm105_vm0, %v9671_v42 }
 0xd1c   :  { %6547 = vmatprep.mubr.msk.f32.mxu1 %vm105_vm0, %v9678_v12 }
 0xd1e   :  { %v7186_v24 = vpop.eup %7185 }
 0xd1f   :  { %6548 = vmatmul.mubr.msk.f32.gmra.mxu1 %vm105_vm0, %v9685_v13 }
 0xd20   :  { %6550 = vmatprep.mubr.msk.f32.mxu1 %vm105_vm0, %v9692_v60 }
 0xd23   :  { %6551 = vmatmul.mubr.msk.f32.gmra.mxu1 %vm105_vm0, %v9699_v56 }
 0xd24   :  { %6553 = vmatprep.mubr.msk.f32.mxu1 %vm105_vm0, %v9706_v23 }
 0xd27   :  { %6554 = vmatmul.mubr.msk.f32.gmra.mxu1 %vm105_vm0, %v9713_v28 }
 0xd28   :  { %6556 = vmatprep.mubr.msk.f32.mxu1 %vm105_vm0, %v9720_v58 }
 0xd2b   :  { %6557 = vmatmul.mubr.msk.f32.gmra.mxu1 %vm105_vm0, %v9727_v11 }
 0xd2c   :  { %6607 = vmatprep.mubr.msk.f32.mxu1 %vm105_vm0, %v7476_v48 }
 0xdcf   :  { %v9735_v31 = vpop.f32.mrf.mxu1 }
 0xdd1   :  { %v9737_v34 = vpop.f32.mrf.mxu1 }
 0xdd3   :  { %v6532_v51 = vpop.f32.mrf.mxu1 }
 0xdd5   :  { %v9739_v3 = vpop.f32.mrf.mxu1 }
 0xdd7   :  { %v9741_v18 = vpop.f32.mrf.mxu1 }
 0xdd9   :  { %v9757_v17 = vpop.f32.mrf.mxu1 }
 0xddb   :  { %v9766_v30 = vpop.f32.mrf.mxu1 }
 0xddd   :  { %v9768_v36 = vpop.f32.mrf.mxu1 }
 0xddf   :  { %v6549_v38 = vpop.f32.mrf.mxu1 }
 0xde0   :  { %v4012_v5 = vadd.f32 %v9773_v9, %v6549_v38  ;;  %v9792_v9 = vld [vmem:[%s10135_s4 + $0x98] sm:$0xff] }
 0xde1   :  { %v4006_v44 = vpop.f32.mrf.mxu1  ;;  %10294 = vst [vmem:[#allocation10_spill] sm:$0xff] %v9792_v9 }
 0xde2   :  { %v5542_v48 = vmul.f32 -1.442695, %v4012_v5  ;;  %v4007_v26 = vadd.f32 %v9786_v35, %v4006_v44 }
 0xde3   :  { %v6552_v0 = vpop.f32.mrf.mxu1 }
 0xde4   :  { %v5541_v38 = vmul.f32 -1.442695, %v4007_v26  ;;  %v4022_v6 = vadd.f32 %v9792_v9, %v6552_v0  ;;  %7191 = vpow2.f32 %v5542_v48  ;;  %v3740_v26 = vpop.f32.mrf.mxu0  ;;  %v7188_v0 = vpop.eup %7187  ;;  %v9804_v48 = vld [vmem:[%s10135_s4 + $0x58] sm:$0xff]  ;;  %v3772_v9 = vadd.f32 1.0, %v7186_v24  ;;  %v9816_v24 = vld [vmem:[%s10135_s4 + $0x48] sm:$0xff] }
 0xde5   :  { %v4016_v46 = vpop.f32.mrf.mxu1  ;;  %v7190_v2 = vpop.eup %7189  ;;  %10296 = vst [vmem:[#allocation12_spill] sm:$0xff] %v9816_v24 }
 0xde6   :  { %v5544_v5 = vmul.f32 -1.442695, %v4022_v6  ;;  %v4017_v44 = vadd.f32 %v9798_v49, %v4016_v46  ;;  %7193 = vpow2.f32 %v5541_v38  ;;  %v6518_v19 = vpop.f32.mrf.mxu0  ;;  %v3774_v46 = vadd.f32 1.0, %v7188_v0 }
 0xde7   :  { %v3756_v6 = vadd.f32 %v9804_v48, %v6518_v19  ;;  %v3773_v49 = vadd.f32 1.0, %v7190_v2  ;;  %v3746_v19 = vadd.f32 %v9816_v24, %v6515_v27 }
 0xde8   :  { %7195 = vpow2.f32 %v5544_v5  ;;  %v5543_v35 = vmul.f32 -1.442695, %v4017_v44  ;;  %v3750_v47 = vpop.f32.mrf.mxu0 }
 0xde9   :  { %7197 = vpow2.f32 %v5513_v41  ;;  %v3899_v5 = vadd.f32 %v6532_v51, %v3756_v6  ;;  %v9823_v51 = vld [vmem:[%s10135_s4 + $0x40] sm:$0xff] }
 0xdea   :  { %7199 = vpow2.f32 %v5543_v35  ;;  %v9810_v35 = vld [vmem:[%s10135_s4 + $0x50] sm:$0xff]  ;;  %10297 = vst [vmem:[#allocation13_spill] sm:$0xff] %v9823_v51 }
 0xdeb   :  { %v3751_v41 = vadd.f32 %v9810_v35, %v3750_v47  ;;  %7201 = vrcp.f32 %v3772_v9  ;;  %v3741_v9 = vadd.f32 %v9823_v51, %v3740_v26 }
 0xdec   :  { %7203 = vrcp.f32 %v3774_v46 }
 0xded   :  { %7205 = vrcp.f32 %v3773_v49  ;;  %v3898_v47 = vadd.f32 %v9739_v3, %v3751_v41 }
 0xdee   :  { %7207 = vtanh.f32 %v3899_v5 }
 0xdf1   :  { %v7192_v38 = vpop.eup %7191 }
 0xdf2   :  { %v4082_v58 = vadd.f32 1.0, %v7192_v38  ;;  %v3897_v38 = vadd.f32 %v9735_v31, %v3746_v19 }
 0xdf3   :  { %v7194_v44 = vpop.eup %7193 }
 0xdf4   :  { %v4081_v49 = vadd.f32 1.0, %v7194_v44 }
 0xdf5   :  { %v7196_v11 = vpop.eup %7195 }
 0xdf6   :  { %v7198_v28 = vpop.eup %7197  ;;  %v4084_v0 = vadd.f32 1.0, %v7196_v11  ;;  %v3896_v11 = vadd.f32 %v9737_v34, %v3741_v9 }
 0xdf7   :  { %v7200_v2 = vpop.eup %7199  ;;  %v3771_v46 = vadd.f32 1.0, %v7198_v28 }
 0xdf8   :  { %7209 = vrcp.f32 %v4084_v0  ;;  %v4083_v6 = vadd.f32 1.0, %v7200_v2  ;;  %v7202_v3 = vpop.eup %7201 }
 0xdf9   :  { %7211 = vrcp.f32 %v4082_v58  ;;  %v7204_v27 = vpop.eup %7203 }
 0xdfa   :  { %7213 = vrcp.f32 %v4083_v6  ;;  %v7206_v41 = vpop.eup %7205  ;;  %v3907_v19 = vsub.f32 1.0, %v7204_v27 }
 0xdfb   :  { %7215 = vtanh.f32 %v3898_v47  ;;  %v7208_v5 = vpop.eup %7207 }
 0xdfc   :  { %7217 = vrcp.f32 %v4081_v49  ;;  %v3915_v9 = vmul.f32 %v7208_v5, %v7204_v27  ;;  %v3906_v49 = vsub.f32 1.0, %v7206_v41  ;;  %v9839_v27 = vld [vmem:[%s10134_s5 + $0x28] sm:$0xff] }
 0xdfd   :  { %7219 = vrcp.f32 %v3771_v46 }
 0xdfe   :  { %7221 = vtanh.f32 %v3897_v38  ;;  %v3911_v38 = vmul.f32 %v3907_v19, %v9441_v22 }
 0xdff   :  { %7223 = vtanh.f32 %v3896_v11 }
 0xe05   :  { %v7210_v26 = vpop.eup %7209 }
 0xe06   :  { %v7212_v44 = vpop.eup %7211  ;;  %v4096_v0 = vmul.f32 %v7210_v26, %v9607_v10  ;;  %v3905_v26 = vsub.f32 1.0, %v7202_v3 }
 0xe07   :  { %v7214_v28 = vpop.eup %7213  ;;  %v4094_v47 = vmul.f32 %v7212_v44, %v9630_v14 }
 0xe08   :  { %v7216_v58 = vpop.eup %7215  ;;  %6559 = vmatprep.subr.mxu0 %v4096_v0  ;;  %v4095_v31 = vmul.f32 %v7214_v28, %v9618_v52  ;;  %v9833_v28 = vadd.f32 %v3915_v9, %v3911_v38  ;;  %v6555_v38 = vpop.f32.mrf.mxu1 }
 0xe09   :  { %v7218_v2 = vpop.eup %7217  ;;  %6560 = vmatpush3.msra.mxu0 %v4096_v0  ;;  %v3914_v11 = vmul.f32 %v7216_v58, %v7206_v41  ;;  %v3910_v0 = vmul.f32 %v3906_v49, %v9447_v4  ;;  %v3909_v41 = vmul.f32 %v3905_v26, %v9454_v43  ;;  %v9851_v4 = vld [vmem:[%s10134_s5 + $0x30] sm:$0xff]  ;;  %v9863_v43 = vld [vmem:[%s10134_s5 + $0x38] sm:$0xff] }
 0xe0a   :  { %v7220_v34 = vpop.eup %7219  ;;  %6561 = vmatprep.subr.mxu0 %v4095_v31  ;;  %v4093_v46 = vmul.f32 %v7218_v2, %v9642_v7 }
 0xe0b   :  { %v7222_v6 = vpop.eup %7221  ;;  %6562 = vmatpush3.msra.mxu0 %v4095_v31  ;;  %v3904_v44 = vsub.f32 1.0, %v7220_v34  ;;  %v9844_v22 = vadd.f32 %v3914_v11, %v3910_v0 }
 0xe0c   :  { %6563 = vmatprep.subr.mxu0 %v4094_v47  ;;  %v7224_v51 = vpop.eup %7223  ;;  %v3913_v24 = vmul.f32 %v7222_v6, %v7202_v3 }
 0xe0d   :  { %6564 = vmatpush3.msra.mxu0 %v4094_v47  ;;  %v3912_v5 = vmul.f32 %v7224_v51, %v7220_v34  ;;  %v3908_v58 = vmul.f32 %v3904_v44, %v9461_v21  ;;  %v7492_v21 = vld [vmem:[%s10134_s5 + $0x20] sm:$0xff] }
 0xe0e   :  { %6565 = vmatprep.subr.mxu0 %v4093_v46  ;;  %v9856_v3 = vadd.f32 %v3913_v24, %v3909_v41  ;;  %v9940_v47 = vld [vmem:[%s10135_s4 + $0x60] sm:$0xff] }
 0xe0f   :  { %6566 = vmatpush3.msra.mxu0 %v4093_v46  ;;  %v9868_v51 = vadd.f32 %v3912_v5, %v3908_v58  ;;  %v3987_v9 = vadd.f32 %v9940_v47, %v9757_v17  ;;  %v4026_v5 = vpop.f32.mrf.mxu1 }
 0xe10   :  { %6568 = vmatmul.mubr.msk.f32.vlgmr.msra.gmra.mxu0 %vm105_vm0, %v9839_v27  ;;  %6573 = vmatprep.subr.mxu0 %v9833_v28 }
 0xe11   :  { %6574 = vmatpush3.msra.mxu0 %v9833_v28  ;;  %6570 = vmatprep.mubr.msk.f32.mxu0 %vm105_vm0, %v9851_v4  ;;  %v6558_v58 = vpop.f32.mrf.mxu1 }
 0xe12   :  { %6575 = vmatprep.subr.mxu0 %v9844_v22 }
 0xe13   :  { %6576 = vmatpush3.msra.mxu0 %v9844_v22 }
 0xe14   :  { %6571 = vmatmul.mubr.msk.f32.gmra.mxu0 %vm105_vm0, %v9863_v43  ;;  %6577 = vmatprep.subr.mxu0 %v9856_v3 }
 0xe15   :  { %6578 = vmatpush3.msra.mxu0 %v9856_v3  ;;  %6581 = vmatprep.mubr.msk.f32.mxu0 %vm105_vm0, %v9467_v1 }
 0xe16   :  { %6579 = vmatprep.subr.mxu0 %v9868_v51 }
 0xe17   :  { %6580 = vmatpush3.msra.mxu0 %v9868_v51 }
 0xe18   :  { %6582 = vmatmul.mubr.msk.f32.vlgmr.msra.gmra.mxu0 %vm105_vm0, %v9476_v55 }
 0xe19   :  { %6584 = vmatprep.mubr.msk.f32.mxu0 %vm105_vm0, %v9483_v37 }
 0xe1c   :  { %6585 = vmatmul.mubr.msk.f32.gmra.mxu0 %vm105_vm0, %v9490_v8 }
 0xe1d   :  { %6587 = vmatprep.mubr.msk.f32.mxu0 %vm105_vm0, %v9497_v25 }
 0xe20   :  { %6588 = vmatmul.mubr.msk.f32.gmra.mxu0 %vm105_vm0, %v9504_v45  ;;  %v9912_v45 = vld [vmem:[%s10135_s4 + $0x68] sm:$0xff] }
 0xe21   :  { %6590 = vmatprep.mubr.msk.f32.mxu0 %vm105_vm0, %v9511_v57  ;;  %v3992_v57 = vadd.f32 %v9912_v45, %v9741_v18 }
 0xe23   :  { %v5538_v18 = vmul.f32 -1.442695, %v3992_v57 }
 0xe24   :  { %6591 = vmatmul.mubr.msk.f32.gmra.mxu0 %vm105_vm0, %v9518_v39  ;;  %v9919_v39 = vld [vmem:[%s10135_s4 + $0x78] sm:$0xff] }
 0xe25   :  { %6593 = vmatprep.mubr.msk.f32.mxu0 %vm105_vm0, %v9525_v16  ;;  %v4002_v16 = vadd.f32 %v9919_v39, %v9766_v30  ;;  %7225 = vpow2.f32 %v5538_v18  ;;  %v4036_v18 = vpop.f32.mrf.mxu1 }
 0xe27   :  { %v5540_v31 = vmul.f32 -1.442695, %v4002_v16 }
 0xe28   :  { %6594 = vmatmul.mubr.msk.f32.gmra.mxu0 %vm105_vm0, %v9532_v33 }
 0xe29   :  { %6596 = vmatprep.mubr.msk.f32.mxu0 %vm105_vm0, %v9539_v15  ;;  %v9928_v15 = vld [vmem:[%s10135_s4 + $0x70] sm:$0xff]  ;;  %7227 = vpow2.f32 %v5540_v31 }
 0xe2c   :  { %6597 = vmatmul.mubr.msk.f32.gmra.mxu0 %vm105_vm0, %v9546_v53  ;;  %v3997_v53 = vadd.f32 %v9928_v15, %v9768_v36 }
 0xe2d   :  { %6647 = vmatprep.mubr.msk.f32.mxu0 %vm105_vm0, %v7492_v21 }
 0xe2e   :  { %v5539_v2 = vmul.f32 -1.442695, %v3997_v53 }
 0xe30   :  { %7229 = vpow2.f32 %v5539_v2 }
 0xe32   :  { %v7226_v21 = vpop.eup %7225 }
 0xe33   :  { %v4058_v53 = vadd.f32 1.0, %v7226_v21 }
 0xed0   :  { %v9901_v1 = vpop.f32.mrf.mxu0 }
 0xed2   :  { %v9903_v55 = vpop.f32.mrf.mxu0 }
 0xed4   :  { %v6572_v37 = vpop.f32.mrf.mxu0 }
 0xed6   :  { %v9905_v8 = vpop.f32.mrf.mxu0 }
 0xed8   :  { %v9907_v25 = vpop.f32.mrf.mxu0 }
 0xeda   :  { %v9923_v33 = vpop.f32.mrf.mxu0 }
 0xedc   :  { %v9932_v24 = vpop.f32.mrf.mxu0 }
 0xede   :  { %v9934_v19 = vpop.f32.mrf.mxu0 }
 0xee0   :  { %v6589_v34 = vpop.f32.mrf.mxu0 }
 0xee1   :  { %v4298_v30 = vadd.f32 %v9573_v32, %v6589_v34  ;;  %v5537_v32 = vmul.f32 -1.442695, %v3987_v9  ;;  %v9956_v34 = vld [vmem:[%s10135_s4 + $0xb0] sm:$0xff] }
 0xee2   :  { %v4292_v36 = vpop.f32.mrf.mxu0 }
 0xee3   :  { %v5566_v49 = vmul.f32 -1.442695, %v4298_v30  ;;  %v4293_v6 = vadd.f32 %v9581_v40, %v4292_v36  ;;  %v7228_v40 = vpop.eup %7227  ;;  %v4037_v30 = vadd.f32 %v9956_v34, %v4036_v18 }
 0xee4   :  { %v6592_v46 = vpop.f32.mrf.mxu0  ;;  %v7230_v57 = vpop.eup %7229 }
 0xee5   :  { %v5565_v11 = vmul.f32 -1.442695, %v4293_v6  ;;  %v4308_v26 = vadd.f32 %v9587_v20, %v6592_v46  ;;  %7231 = vpow2.f32 %v5566_v49  ;;  %v9950_v20 = vld [vmem:[%s10135_s4 + $0xb8] sm:$0xff]  ;;  %v4059_v2 = vadd.f32 1.0, %v7230_v57 }
 0xee6   :  { %v4302_v0 = vpop.f32.mrf.mxu0  ;;  %v4042_v16 = vadd.f32 %v9950_v20, %v6558_v58 }
 0xee7   :  { %v5568_v44 = vmul.f32 -1.442695, %v4308_v26  ;;  %v4303_v41 = vadd.f32 %v9593_v59, %v4302_v0  ;;  %7233 = vpow2.f32 %v5565_v11  ;;  %v4060_v59 = vadd.f32 1.0, %v7228_v40  ;;  %v9962_v11 = vld [vmem:[%s10135_s4 + $0xa8] sm:$0xff] }
 0xee8   :  { %v4185_v9 = vadd.f32 %v6572_v37, %v4042_v16  ;;  %v4032_v26 = vadd.f32 %v9962_v11, %v6555_v38  ;;  %v9969_v37 = vld [vmem:[%s10135_s4 + $0xa0] sm:$0xff] }
 0xee9   :  { %7235 = vpow2.f32 %v5568_v44  ;;  %v5567_v17 = vmul.f32 -1.442695, %v4303_v41  ;;  %v4184_v44 = vadd.f32 %v9905_v8, %v4037_v30  ;;  %v4027_v41 = vadd.f32 %v9969_v37, %v4026_v5 }
 0xeea   :  { %7237 = vpow2.f32 %v5537_v32  ;;  %v4183_v40 = vadd.f32 %v9901_v1, %v4032_v26 }
 0xeeb   :  { %7239 = vpow2.f32 %v5567_v17  ;;  %v4182_v38 = vadd.f32 %v9903_v55, %v4027_v41 }
 0xeec   :  { %7241 = vrcp.f32 %v4058_v53 }
 0xeed   :  { %7243 = vrcp.f32 %v4060_v59 }
 0xeee   :  { %7245 = vrcp.f32 %v4059_v2 }
 0xeef   :  { %7247 = vtanh.f32 %v4185_v9 }
 0xef2   :  { %v7232_v31 = vpop.eup %7231 }
 0xef3   :  { %v4368_v6 = vadd.f32 1.0, %v7232_v31 }
 0xef4   :  { %v7234_v36 = vpop.eup %7233 }
 0xef5   :  { %v4367_v17 = vadd.f32 1.0, %v7234_v36 }
 0xef6   :  { %v7236_v49 = vpop.eup %7235 }
 0xef7   :  { %v7238_v46 = vpop.eup %7237  ;;  %v4370_v32 = vadd.f32 1.0, %v7236_v49 }
 0xef8   :  { %v7240_v0 = vpop.eup %7239  ;;  %v4057_v21 = vadd.f32 1.0, %v7238_v46 }
 0xef9   :  { %7249 = vrcp.f32 %v4370_v32  ;;  %v4369_v58 = vadd.f32 1.0, %v7240_v0  ;;  %v7242_v8 = vpop.eup %7241 }
 0xefa   :  { %7251 = vrcp.f32 %v4368_v6  ;;  %v7244_v57 = vpop.eup %7243 }
 0xefb   :  { %7253 = vrcp.f32 %v4369_v58  ;;  %v7246_v16 = vpop.eup %7245  ;;  %v4193_v30 = vsub.f32 1.0, %v7244_v57 }
 0xefc   :  { %7255 = vtanh.f32 %v4184_v44  ;;  %v7248_v53 = vpop.eup %7247  ;;  %v4192_v6 = vsub.f32 1.0, %v7246_v16  ;;  %v4191_v44 = vsub.f32 1.0, %v7242_v8 }
 0xefd   :  { %7257 = vrcp.f32 %v4367_v17  ;;  %v4201_v49 = vmul.f32 %v7248_v53, %v7244_v57  ;;  %v4197_v32 = vmul.f32 %v4193_v30, %v9607_v10  ;;  %v10304_v30 = vld [vmem:[#allocation3_spill] sm:$0xff] }
 0xefe   :  { %7259 = vrcp.f32 %v4057_v21  ;;  %v4196_v58 = vmul.f32 %v4192_v6, %v9618_v52  ;;  %v4195_v10 = vmul.f32 %v4191_v44, %v9630_v14  ;;  %v10299_v14 = vld [vmem:[#allocation17_spill] sm:$0xff] }
 0xeff   :  { %7261 = vtanh.f32 %v4183_v40  ;;  %v9979_v17 = vadd.f32 %v4201_v49, %v4197_v32  ;;  %v10306_v49 = vld [vmem:[#allocation9_spill] sm:$0xff]  ;;  %v10307_v32 = vld [vmem:[#allocation10_spill] sm:$0xff] }
 0xf00   :  { %7263 = vtanh.f32 %v4182_v38 }
 0xf06   :  { %v7250_v5 = vpop.eup %7249 }
 0xf07   :  { %v7252_v18 = vpop.eup %7251  ;;  %v4382_v59 = vmul.f32 %v7250_v5, %v9833_v28 }
 0xf08   :  { %v7254_v31 = vpop.eup %7253  ;;  %v4380_v36 = vmul.f32 %v7252_v18, %v9856_v3 }
 0xf09   :  { %v7256_v2 = vpop.eup %7255  ;;  %6599 = vmatprep.subr.mxu1 %v4382_v59  ;;  %v4381_v1 = vmul.f32 %v7254_v31, %v9844_v22 }
 0xf0a   :  { %v7258_v9 = vpop.eup %7257  ;;  %6600 = vmatpush3.msra.mxu1 %v4382_v59  ;;  %v4200_v0 = vmul.f32 %v7256_v2, %v7246_v16  ;;  %v10303_v16 = vld [vmem:[#allocation7_spill] sm:$0xff] }
 0xf0b   :  { %v7260_v55 = vpop.eup %7259  ;;  %6601 = vmatprep.subr.mxu1 %v4381_v1  ;;  %v4379_v26 = vmul.f32 %v7258_v9, %v9868_v51  ;;  %v4283_v53 = vadd.f32 %v10303_v16, %v9934_v19 }
 0xf0c   :  { %v7262_v46 = vpop.eup %7261  ;;  %6602 = vmatpush3.msra.mxu1 %v4381_v1  ;;  %v4190_v40 = vsub.f32 1.0, %v7260_v55  ;;  %v9985_v38 = vadd.f32 %v4200_v0, %v4196_v58 }
 0xf0d   :  { %6603 = vmatprep.subr.mxu1 %v4380_v36  ;;  %v7264_v41 = vpop.eup %7263  ;;  %v4199_v21 = vmul.f32 %v7262_v46, %v7242_v8  ;;  %v5563_v2 = vmul.f32 -1.442695, %v4283_v53  ;;  %v6595_v46 = vpop.f32.mrf.mxu0 }
 0xf0e   :  { %6604 = vmatpush3.msra.mxu1 %v4380_v36  ;;  %v4198_v57 = vmul.f32 %v7264_v41, %v7260_v55  ;;  %v4194_v8 = vmul.f32 %v4190_v40, %v9642_v7 }
 0xf0f   :  { %6605 = vmatprep.subr.mxu1 %v4379_v26  ;;  %v9992_v52 = vadd.f32 %v4199_v21, %v4195_v10  ;;  %v10308_v21 = vld [vmem:[#allocation11_spill] sm:$0xff]  ;;  %v4312_v10 = vpop.f32.mrf.mxu0 }
 0xf10   :  { %6606 = vmatpush3.msra.mxu1 %v4379_v26 }
 0xf11   :  { %6608 = vmatmul.mubr.msk.f32.vlgmr.msra.gmra.mxu1 %vm105_vm0, %v9613_v29  ;;  %6613 = vmatprep.subr.mxu1 %v9979_v17  ;;  %v9999_v29 = vadd.f32 %v4198_v57, %v4194_v8  ;;  %v6598_v57 = vpop.f32.mrf.mxu0 }
 0xf12   :  { %6614 = vmatpush3.msra.mxu1 %v9979_v17  ;;  %6610 = vmatprep.mubr.msk.f32.mxu1 %vm105_vm0, %v9625_v61  ;;  %v10298_v61 = vld [vmem:[#allocation16_spill] sm:$0xff] }
 0xf13   :  { %6615 = vmatprep.subr.mxu1 %v9985_v38 }
 0xf14   :  { %6616 = vmatpush3.msra.mxu1 %v9985_v38 }
 0xf15   :  { %6611 = vmatmul.mubr.msk.f32.gmra.mxu1 %vm105_vm0, %v9637_v50  ;;  %6617 = vmatprep.subr.mxu1 %v9992_v52  ;;  %v10300_v50 = vld [vmem:[#allocation4_spill] sm:$0xff] }
 0xf16   :  { %6618 = vmatpush3.msra.mxu1 %v9992_v52  ;;  %6621 = vmatprep.mubr.msk.f32.mxu1 %vm105_vm0, %v9648_v62 }
 0xf17   :  { %6619 = vmatprep.subr.mxu1 %v9999_v29 }
 0xf18   :  { %6620 = vmatpush3.msra.mxu1 %v9999_v29 }
 0xf19   :  { %6622 = vmatmul.mubr.msk.f32.vlgmr.msra.gmra.mxu1 %vm105_vm0, %v9657_v54 }
 0xf1a   :  { %6624 = vmatprep.mubr.msk.f32.mxu1 %vm105_vm0, %v9664_v63 }
 0xf1d   :  { %6625 = vmatmul.mubr.msk.f32.gmra.mxu1 %vm105_vm0, %v9671_v42 }
 0xf1e   :  { %6627 = vmatprep.mubr.msk.f32.mxu1 %vm105_vm0, %v9678_v12  ;;  %v10301_v12 = vld [vmem:[#allocation5_spill] sm:$0xff] }
 0xf21   :  { %6628 = vmatmul.mubr.msk.f32.gmra.mxu1 %vm105_vm0, %v9685_v13  ;;  %v4278_v13 = vadd.f32 %v10301_v12, %v9907_v25  ;;  %v10305_v25 = vld [vmem:[#allocation8_spill] sm:$0xff] }
 0xf22   :  { %6630 = vmatprep.mubr.msk.f32.mxu1 %vm105_vm0, %v9692_v60  ;;  %v10302_v60 = vld [vmem:[#allocation6_spill] sm:$0xff]  ;;  %v4273_v55 = vadd.f32 %v10305_v25, %v9923_v33 }
 0xf23   :  { %v5562_v18 = vmul.f32 -1.442695, %v4278_v13  ;;  %v4322_v13 = vpop.f32.mrf.mxu0 }
 0xf24   :  { %v5561_v44 = vmul.f32 -1.442695, %v4273_v55  ;;  %v4323_v53 = vadd.f32 %v9810_v35, %v4322_v13 }
 0xf25   :  { %6631 = vmatmul.mubr.msk.f32.gmra.mxu1 %vm105_vm0, %v9699_v56  ;;  %v4288_v56 = vadd.f32 %v10302_v60, %v9932_v24  ;;  %7265 = vpow2.f32 %v5562_v18 }
 0xf26   :  { %6633 = vmatprep.mubr.msk.f32.mxu1 %vm105_vm0, %v9706_v23 }
 0xf27   :  { %v5564_v59 = vmul.f32 -1.442695, %v4288_v56 }
 0xf29   :  { %6634 = vmatmul.mubr.msk.f32.gmra.mxu1 %vm105_vm0, %v10298_v61  ;;  %7267 = vpow2.f32 %v5564_v59 }
 0xf2a   :  { %6636 = vmatprep.mubr.msk.f32.mxu1 %vm105_vm0, %v10299_v14  ;;  %7269 = vpow2.f32 %v5563_v2 }
 0xf2d   :  { %6637 = vmatmul.mubr.msk.f32.gmra.mxu1 %vm105_vm0, %v10300_v50  ;;  %v4328_v50 = vadd.f32 %v9804_v48, %v6598_v57 }
 0xf32   :  { %v7266_v8 = vpop.eup %7265 }
 0xf33   :  { %v4344_v12 = vadd.f32 1.0, %v7266_v8 }
 0xf36   :  { %v7268_v61 = vpop.eup %7267 }
 0xf37   :  { %v7270_v14 = vpop.eup %7269  ;;  %v4346_v60 = vadd.f32 1.0, %v7268_v61 }
 0xf38   :  { %v4345_v16 = vadd.f32 1.0, %v7270_v14 }
 0xfd1   :  { %v10028_v7 = vpop.f32.mrf.mxu1 }
 0xfd3   :  { %v10030_v62 = vpop.f32.mrf.mxu1 }
 0xfd5   :  { %v6612_v54 = vpop.f32.mrf.mxu1 }
 0xfd6   :  { %v4471_v18 = vadd.f32 %v6612_v54, %v4328_v50 }
 0xfd7   :  { %v4459_v63 = vpop.f32.mrf.mxu1 }
 0xfd8   :  { %v4470_v48 = vadd.f32 %v4459_v63, %v4323_v53 }
 0xfd9   :  { %v10032_v42 = vpop.f32.mrf.mxu1 }
 0xfdb   :  { %v10038_v23 = vpop.f32.mrf.mxu1 }
 0xfdd   :  { %v10042_v5 = vpop.f32.mrf.mxu1 }
 0xfdf   :  { %v10044_v31 = vpop.f32.mrf.mxu1 }
 0xfe1   :  { %v6629_v1 = vpop.f32.mrf.mxu1 }
 0xfe2   :  { %v4584_v9 = vadd.f32 %v10304_v30, %v6629_v1 }
 0xfe3   :  { %v4578_v24 = vpop.f32.mrf.mxu1 }
 0xfe4   :  { %v5590_v36 = vmul.f32 -1.442695, %v4584_v9  ;;  %v4579_v19 = vadd.f32 %v10306_v49, %v4578_v24  ;;  %v10309_v9 = vld [vmem:[#allocation12_spill] sm:$0xff] }
 0xfe5   :  { %v6632_v6 = vpop.f32.mrf.mxu1  ;;  %v4318_v25 = vadd.f32 %v10309_v9, %v6595_v46 }
 0xfe6   :  { %v5589_v26 = vmul.f32 -1.442695, %v4579_v19  ;;  %v4594_v0 = vadd.f32 %v10307_v32, %v6632_v6  ;;  %7271 = vpow2.f32 %v5590_v36  ;;  %v10310_v36 = vld [vmem:[#allocation13_spill] sm:$0xff] }
 0xfe7   :  { %v4588_v41 = vpop.f32.mrf.mxu1  ;;  %v4313_v49 = vadd.f32 %v10310_v36, %v4312_v10  ;;  %v4469_v54 = vadd.f32 %v10028_v7, %v4318_v25  ;;  %v4564_v25 = vadd.f32 %v9912_v45, %v10032_v42 }
 0xfe8   :  { %v5592_v58 = vmul.f32 -1.442695, %v4594_v0  ;;  %v4589_v40 = vadd.f32 %v10308_v21, %v4588_v41  ;;  %7273 = vpow2.f32 %v5589_v26 }
 0xfe9   :  { %v4468_v26 = vadd.f32 %v10030_v62, %v4313_v49  ;;  %v5586_v36 = vmul.f32 -1.442695, %v4564_v25 }
 0xfea   :  { %7275 = vpow2.f32 %v5592_v58  ;;  %v5591_v33 = vmul.f32 -1.442695, %v4589_v40 }
 0xfeb   :  { %7277 = vpow2.f32 %v5561_v44 }
 0xfec   :  { %7279 = vpow2.f32 %v5591_v33 }
 0xfed   :  { %7281 = vrcp.f32 %v4344_v12 }
 0xfee   :  { %7283 = vrcp.f32 %v4346_v60 }
 0xfef   :  { %7285 = vrcp.f32 %v4345_v16 }
 0xff0   :  { %7287 = vtanh.f32 %v4471_v18 }
 0xff3   :  { %v7272_v56 = vpop.eup %7271 }
 0xff4   :  { %v4654_v1 = vadd.f32 1.0, %v7272_v56 }
 0xff5   :  { %v7274_v59 = vpop.eup %7273 }
 0xff6   :  { %v4653_v19 = vadd.f32 1.0, %v7274_v59 }
 0xff7   :  { %v7276_v2 = vpop.eup %7275 }
 0xff8   :  { %v7278_v30 = vpop.eup %7277  ;;  %v4656_v55 = vadd.f32 1.0, %v7276_v2 }
 0xff9   :  { %v7280_v24 = vpop.eup %7279  ;;  %v4343_v35 = vadd.f32 1.0, %v7278_v30 }
 0xffa   :  { %7289 = vrcp.f32 %v4656_v55  ;;  %v4655_v6 = vadd.f32 1.0, %v7280_v24  ;;  %v7282_v46 = vpop.eup %7281  ;;  %v4559_v55 = vadd.f32 %v9940_v47, %v10038_v23 }
 0xffb   :  { %7291 = vrcp.f32 %v4654_v1  ;;  %v7284_v32 = vpop.eup %7283  ;;  %v4477_v60 = vsub.f32 1.0, %v7282_v46 }
 0xffc   :  { %7293 = vrcp.f32 %v4655_v6  ;;  %v7286_v63 = vpop.eup %7285  ;;  %v4479_v10 = vsub.f32 1.0, %v7284_v32  ;;  %v5585_v49 = vmul.f32 -1.442695, %v4559_v55 }
 0xffd   :  { %7295 = vtanh.f32 %v4470_v48  ;;  %v7288_v0 = vpop.eup %7287  ;;  %v4478_v61 = vsub.f32 1.0, %v7286_v63  ;;  %v4481_v1 = vmul.f32 %v4477_v60, %v9856_v3  ;;  %v4781_v3 = vld [vmem:[%s10136_s0 + $0x8] sm:$0xff] }
 0xffe   :  { %7297 = vrcp.f32 %v4653_v19  ;;  %v4487_v8 = vmul.f32 %v7288_v0, %v7284_v32  ;;  %v4483_v12 = vmul.f32 %v4479_v10, %v9833_v28  ;;  %v6635_v19 = vpop.f32.mrf.mxu1 }
 0xfff   :  { %7299 = vrcp.f32 %v4343_v35  ;;  %v4482_v53 = vmul.f32 %v4478_v61, %v9844_v22  ;;  %v4780_v22 = vld [vmem:[%s10136_s0] sm:$0xff]  ;;  %v4604_v45 = vadd.f32 %v9962_v11, %v6635_v19 }
0x1000   :  { %7301 = vtanh.f32 %v4469_v54  ;;  %v4491_v16 = vadd.f32 %v4487_v8, %v4483_v12  ;;  %v4598_v6 = vpop.f32.mrf.mxu1 }
0x1001   :  { %7303 = vtanh.f32 %v4468_v26  ;;  %v4599_v23 = vadd.f32 %v9969_v37, %v4598_v6 }
0x1002   :  { %v6638_v35 = vpop.f32.mrf.mxu1 }
0x1007   :  { %v7290_v44 = vpop.eup %7289 }
0x1008   :  { %v7292_v41 = vpop.eup %7291  ;;  %v4668_v58 = vmul.f32 %v7290_v44, %v9979_v17 }
0x1009   :  { %v7294_v21 = vpop.eup %7293  ;;  %v4666_v57 = vmul.f32 %v7292_v41, %v9992_v52 }
0x100a   :  { %v7296_v40 = vpop.eup %7295  ;;  %6639 = vmatprep.subr.mxu0 %v4668_v58  ;;  %v4667_v7 = vmul.f32 %v7294_v21, %v9985_v38 }
0x100b   :  { %v7298_v33 = vpop.eup %7297  ;;  %6640 = vmatpush3.msra.mxu0 %v4668_v58  ;;  %v4486_v13 = vmul.f32 %v7296_v40, %v7286_v63  ;;  %v4614_v63 = vadd.f32 %v9950_v20, %v6638_v35  ;;  %v4779_v20 = vld [vmem:[%s10137_s1 + $0x8] sm:$0xff] }
0x100c   :  { %v7300_v62 = vpop.eup %7299  ;;  %6641 = vmatprep.subr.mxu0 %v4667_v7  ;;  %v4665_v50 = vmul.f32 %v7298_v33, %v9999_v29 }
0x100d   :  { %v7302_v14 = vpop.eup %7301  ;;  %6642 = vmatpush3.msra.mxu0 %v4667_v7  ;;  %v4476_v59 = vsub.f32 1.0, %v7300_v62  ;;  %v4490_v2 = vadd.f32 %v4486_v13, %v4482_v53 }
0x100e   :  { %6643 = vmatprep.subr.mxu0 %v4666_v57  ;;  %v7304_v56 = vpop.eup %7303  ;;  %v4485_v18 = vmul.f32 %v7302_v14, %v7282_v46  ;;  %v4608_v46 = vpop.f32.mrf.mxu1 }
0x100f   :  { %6644 = vmatpush3.msra.mxu0 %v4666_v57  ;;  %v4484_v30 = vmul.f32 %v7304_v56, %v7300_v62  ;;  %v4480_v9 = vmul.f32 %v4476_v59, %v9868_v51  ;;  %v4569_v51 = vadd.f32 %v9928_v15, %v10044_v31  ;;  %v4609_v41 = vadd.f32 %v9956_v34, %v4608_v46 }
0x1010   :  { %6645 = vmatprep.subr.mxu0 %v4665_v50  ;;  %v4489_v28 = vadd.f32 %v4485_v18, %v4481_v1 }
0x1011   :  { %6646 = vmatpush3.msra.mxu0 %v4665_v50  ;;  %v5587_v48 = vmul.f32 -1.442695, %v4569_v51 }
0x1012   :  { %6648 = vmatmul.mubr.msk.f32.vlgmr.msra.gmra.mxu0 %vm105_vm0, %v9839_v27  ;;  %6653 = vmatprep.subr.mxu0 %v4491_v16  ;;  %v4488_v27 = vadd.f32 %v4484_v30, %v4480_v9 }
0x1013   :  { %6654 = vmatpush3.msra.mxu0 %v4491_v16  ;;  %6650 = vmatprep.mubr.msk.f32.mxu0 %vm105_vm0, %v9851_v4  ;;  %v4778_v4 = vld [vmem:[%s10137_s1] sm:$0xff] }
0x1014   :  { %6655 = vmatprep.subr.mxu0 %v4490_v2  ;;  %6668 = vmatprep.mubr.msk.f32.mxu1 %vm4863_vm1, %v4778_v4 }
0x1015   :  { %6656 = vmatpush3.msra.mxu0 %v4490_v2 }
0x1016   :  { %6651 = vmatmul.mubr.msk.f32.gmra.mxu0 %vm105_vm0, %v9863_v43  ;;  %6657 = vmatprep.subr.mxu0 %v4489_v28  ;;  %v4574_v43 = vadd.f32 %v9919_v39, %v10042_v5 }
0x1017   :  { %6658 = vmatpush3.msra.mxu0 %v4489_v28  ;;  %6661 = vmatprep.mubr.msk.f32.mxu0 %vm105_vm0, %v4780_v22 }
0x1018   :  { %6659 = vmatprep.subr.mxu0 %v4488_v27  ;;  %v5588_v24 = vmul.f32 -1.442695, %v4574_v43 }
0x1019   :  { %6660 = vmatpush3.msra.mxu0 %v4488_v27 }
0x101a   :  { %6662 = vmatmul.mubr.msk.f32.vlgmr.msra.gmra.mxu0 %vm105_vm0, %v4781_v3  ;;  %7305 = vpow2.f32 %v5588_v24 }
0x101b   :  { %7307 = vpow2.f32 %v5587_v48 }
0x101c   :  { %7309 = vpow2.f32 %v5586_v36 }
0x101d   :  { %7311 = vpow2.f32 %v5585_v49 }
0x1027   :  { %v7306_v39 = vpop.eup %7305 }
0x1028   :  { %v7308_v5 = vpop.eup %7307  ;;  %v4632_v31 = vadd.f32 1.0, %v7306_v39 }
0x1029   :  { %v7310_v15 = vpop.eup %7309  ;;  %v4631_v42 = vadd.f32 1.0, %v7308_v5 }
0x102a   :  { %v7312_v54 = vpop.eup %7311  ;;  %v4630_v47 = vadd.f32 1.0, %v7310_v15  ;;  %7313 = vrcp.f32 %v4632_v31 }
0x102b   :  { %v4629_v32 = vadd.f32 1.0, %v7312_v54  ;;  %7315 = vrcp.f32 %v4631_v42  ;;  %v15_v42 = vstv %s10138_s9 }
0x102c   :  { %7317 = vrcp.f32 %v4630_v47  ;;  %16 = vst [vmem:[#allocation2] sm:$0x1] %v15_v42 }
0x102d   :  { %7319 = vrcp.f32 %v4629_v32 }
0x1037   :  { %v7314_v34 = vpop.eup %7313 }
0x1038   :  { %v7316_v33 = vpop.eup %7315  ;;  %v4765_v57 = vsub.f32 1.0, %v7314_v34 }
0x1039   :  { %v7318_v62 = vpop.eup %7317  ;;  %v4764_v14 = vsub.f32 1.0, %v7316_v33 }
0x103a   :  { %v7320_v8 = vpop.eup %7319  ;;  %v4769_v13 = vmul.f32 %v4765_v57, %v9979_v17  ;;  %v4763_v56 = vsub.f32 1.0, %v7318_v62 }
0x103b   :  { %v4762_v53 = vsub.f32 1.0, %v7320_v8  ;;  %v4768_v59 = vmul.f32 %v4764_v14, %v9985_v38 }
0x103c   :  { %v4767_v28 = vmul.f32 %v4763_v56, %v9992_v52 }
0x103d   :  { %v4766_v27 = vmul.f32 %v4762_v53, %v9999_v29 }
0x10d2   :  { %v6649_v26 = vpop.f32.mrf.mxu0 }
0x10d3   :  { %v4755_v0 = vadd.f32 %v6649_v26, %v4604_v45 }
0x10d4   :  { %v4735_v44 = vpop.f32.mrf.mxu0 }
0x10d5   :  { %v4754_v58 = vadd.f32 %v4735_v44, %v4599_v23  ;;  %7321 = vtanh.f32 %v4755_v0  ;;  %v5605_v44 = vld [vmem:[%s10139_s6] ss:$0 sm:$0xff] }
0x10d6   :  { %v6652_v21 = vpop.f32.mrf.mxu0 }
0x10d7   :  { %v4757_v11 = vadd.f32 %v6652_v21, %v4614_v63 }
0x10d8   :  { %v4745_v40 = vpop.f32.mrf.mxu0 }
0x10d9   :  { %7323 = vtanh.f32 %v4757_v11  ;;  %v4756_v37 = vadd.f32 %v4745_v40, %v4609_v41  ;;  %v5607_v40 = vld [vmem:[%s10141_s8] ss:$0 sm:$0xff] }
0x10da   :  { %7325 = vtanh.f32 %v4754_v58  ;;  %v6663_v7 = vpop.f32.mrf.mxu0  ;;  %v5606_v58 = vld [vmem:[%s10140_s7] ss:$0 sm:$0xff] }
0x10db   :  { %7327 = vtanh.f32 %v4756_v37  ;;  %6664 = vmatprep.subr.mxu1 %v6663_v7 }
0x10dc   :  { %v4854_v10 = vpop.f32.mrf.mxu0  ;;  %6665 = vmatpush3.msra.mxu1 %v6663_v7 }
0x10dd   :  { %6666 = vmatprep.subr.mxu1 %v4854_v10 }
0x10de   :  { %6667 = vmatpush3.msra.mxu1 %v4854_v10 }
0x10df   :  { %6669 = vmatmul.mubr.msk.f32.vlgmr.msra.gmra.mxu1 %vm4863_vm1, %v4779_v20 }
0x10e0   :  { %6686 = vmatprep.mubr.msk.f32.mxu1 %vm4863_vm1, %v4778_v4 }
0x10e2   :  { %v7322_v61 = vpop.eup %7321 }
0x10e3   :  { %v4771_v1 = vmul.f32 %v7322_v61, %v7318_v62 }
0x10e5   :  { %v4775_v22 = vadd.f32 %v4771_v1, %v4767_v28 }
0x10e6   :  { %v7324_v50 = vpop.eup %7323 }
0x10e7   :  { %v7326_v12 = vpop.eup %7325  ;;  %v4773_v60 = vmul.f32 %v7324_v50, %v7314_v34 }
0x10e8   :  { %v7328_v16 = vpop.eup %7327  ;;  %v4770_v9 = vmul.f32 %v7326_v12, %v7320_v8  ;;  %v5608_v8 = vld [vmem:[#allocation2] ss:$0 sm:$0xff] }
0x10e9   :  { %v4777_v18 = vadd.f32 %v4773_v60, %v4769_v13  ;;  %v4772_v2 = vmul.f32 %v7328_v16, %v7316_v33 }
0x10ea   :  { %v4774_v17 = vadd.f32 %v4770_v9, %v4766_v27 }
0x10eb   :  { %6671 = vmatprep.subr.mxu0 %v4777_v18  ;;  %v4776_v30 = vadd.f32 %v4772_v2, %v4768_v59 }
0x10ec   :  { %6672 = vmatpush3.msra.mxu0 %v4777_v18 }
0x10ed   :  { %6673 = vmatprep.subr.mxu0 %v4776_v30 }
0x10ee   :  { %6674 = vmatpush3.msra.mxu0 %v4776_v30 }
0x10ef   :  { %6675 = vmatprep.subr.mxu0 %v4775_v22 }
0x10f0   :  { %6676 = vmatpush3.msra.mxu0 %v4775_v22 }
0x10f1   :  { %6677 = vmatprep.subr.mxu0 %v4774_v17 }
0x10f2   :  { %6678 = vmatpush3.msra.mxu0 %v4774_v17 }
0x119f   :  { %v6670_v3 = vpop.f32.mrf.mxu1 }
0x11a0   :  { %v4946_v43 = vmax.f32 %v6670_v3, 0.0 }
0x11a1   :  { %v4936_v38 = vpop.f32.mrf.mxu1 }
0x11a2   :  { %v4945_v4 = vmax.f32 %v4936_v38, 0.0 }
0x11a4   :  { %6679 = vmatprep.mubr.msk.f32.mxu0 %vm105_vm0, %v4945_v4 }
0x11a5   :  { %6680 = vmatmul.mubr.msk.f32.vlgmr.msra.gmra.mxu0 %vm105_vm0, %v4946_v43 }
0x1265   :  { %v6681_v52 = vpop.f32.mrf.mxu0 }
0x1266   :  { %6682 = vmatprep.subr.mxu1 %v6681_v52 }
0x1267   :  { %v5019_v51 = vpop.f32.mrf.mxu0  ;;  %6683 = vmatpush3.msra.mxu1 %v6681_v52 }
0x1268   :  { %6684 = vmatprep.subr.mxu1 %v5019_v51 }
0x1269   :  { %6685 = vmatpush3.msra.mxu1 %v5019_v51 }
0x126a   :  { %6687 = vmatmul.mubr.msk.f32.vlgmr.msra.gmra.mxu1 %vm4863_vm1, %v4779_v20 }
0x132a   :  { %v6688_v29 = vpop.f32.mrf.mxu1 }
0x132b   :  { %v5104_v24 = vmax.f32 %v6688_v29, 0.0 }
0x132c   :  { %v5094_v25 = vpop.f32.mrf.mxu1 }
0x132d   :  { %v5103_v55 = vmax.f32 %v5094_v25, 0.0  ;;  %v5108_v36 = vsel %vm105_vm0, %v5104_v24, 0.0 }
0x132f   :  { %v5105_v48 = vsel %vm105_vm0, %v5103_v55, 0.0 }
0x1330   :  { %5106 = vadd.xlane.f32.xlu0 %v5105_v48 }
0x1334   :  { %5109 = vadd.xlane.f32.xlu0 %v5108_v36 }
0x13b9   :  { %v5107_v49 = vpop.xlane.xlu0 %5106 }
0x13ba   :  { %v5112_v19 = vmul.f32 0.03125, %v5107_v49 }
0x13bc   :  { %v5114_v6 = vsub.f32 %v5103_v55, %v5112_v19 }
0x13bd   :  { %v5110_v39 = vpop.xlane.xlu0 %5109 }
0x13be   :  { %v5113_v5 = vmul.f32 0.03125, %v5110_v39  ;;  %v5116_v35 = vmul.f32 %v5114_v6, %v5114_v6 }
0x13c0   :  { %v5115_v15 = vsub.f32 %v5104_v24, %v5113_v5  ;;  %v5118_v31 = vsel %vm105_vm0, %v5116_v35, 0.0 }
0x13c1   :  { %5119 = vadd.xlane.f32.xlu1 %v5118_v31 }
0x13c2   :  { %v5117_v54 = vmul.f32 %v5115_v15, %v5115_v15 }
0x13c4   :  { %v5121_v45 = vsel %vm105_vm0, %v5117_v54, 0.0 }
0x13c5   :  { %5122 = vadd.xlane.f32.xlu1 %v5121_v45 }
0x144a   :  { %v5120_v47 = vpop.xlane.xlu1 %5119 }
0x144b   :  { %v5124_v23 = vmul.f32 0.03125, %v5120_v47 }
0x144d   :  { %v5126_v26 = vadd.f32 1e-05, %v5124_v23 }
0x144e   :  { %v5123_v46 = vpop.xlane.xlu1 %5122 }
0x144f   :  { %7329 = vrsqrt.f32 %v5126_v26  ;;  %v5125_v32 = vmul.f32 0.03125, %v5123_v46 }
0x1451   :  { %v5127_v63 = vadd.f32 1e-05, %v5125_v32 }
0x1453   :  { %7331 = vrsqrt.f32 %v5127_v63 }
0x145c   :  { %v7330_v0 = vpop.eup %7329 }
0x145d   :  { %v5130_v41 = vmul.f32 %v7330_v0, %v5114_v6 }
0x145f   :  { %v5139_v21 = vmul.f32 %v5605_v44, %v5130_v41 }
0x1460   :  { %v7332_v11 = vpop.eup %7331 }
0x1461   :  { %v5148_v37 = vadd.f32 %v5606_v58, %v5139_v21  ;;  %v5131_v7 = vmul.f32 %v7332_v11, %v5115_v15 }
0x1463   :  { %v5157_v10 = vmul.f32 %v5607_v40, %v5148_v37  ;;  %v5140_v20 = vmul.f32 %v5605_v44, %v5131_v7 }
0x1465   :  { %v5159_v34 = vsel %vm105_vm0, %v5157_v10, 0.0  ;;  %v5149_v33 = vadd.f32 %v5606_v58, %v5140_v20 }
0x1466   :  { %5160 = vadd.xlane.f32.xlu0 %v5159_v34 }
0x1467   :  { %v5158_v62 = vmul.f32 %v5607_v40, %v5149_v33 }
0x1469   :  { %v5162_v57 = vsel %vm105_vm0, %v5158_v62, 0.0 }
0x146a   :  { %5163 = vadd.xlane.f32.xlu1 %v5162_v57 }
0x14ef   :  { %v5161_v61 = vpop.xlane.xlu0 %5160 }
0x14f0   :  { %v5172_v14 = vadd.f32 %v5608_v8, %v5161_v61 }
0x14f2   :  { %5175 = vst.msk [vmem:[%s10142_s10] sm:$0xff] %vm5174_vm2, %v5172_v14 }
0x14f3   :  { %v5164_v50 = vpop.xlane.xlu1 %5163 }
0x14f4   :  { %v5173_v12 = vadd.f32 %v5608_v8, %v5164_v50 }
0x14f6   :  { %5176 = vst.msk [vmem:[%s10142_s10 + $0x8] sm:$0xff] %vm5174_vm2, %v5173_v12 }

</bundles_post_ra>
